<compile_context>
chip_gen: v5e
topology: v5e:2x2
jax: 0.10.0
libtpu: 0.0.40
codegen_flags: <defaults>
</compile_context>

<pallas_src>
import functools

import jax
import jax.numpy as jnp
from jax.experimental import pallas as pl
from jax.experimental.pallas import tpu as pltpu

_HIGHEST = jax.lax.Precision.HIGHEST

# Below this many rows (or total x elements) the matmul is pure launch
# latency; hand it to XLA instead of spinning up a Pallas pipeline.
_TINY_ROWS = 8
_TINY_ELEMS = 4096
# Above this many rows, split the batch into >= 2 grid blocks so both
# TensorCores on v7x-class parts get a share of the batch.
_SPLIT_ROWS = 256


def _linear_kernel(x_ref, w_ref, b_ref, o_ref):
    # MXU matmul, full-f32 accumulation; bias broadcast-add on the VPU.
    acc = jnp.dot(x_ref[...], w_ref[...],
                  preferred_element_type=jnp.float32,
                  precision=_HIGHEST)
    o_ref[...] = (acc + b_ref[...]).astype(o_ref.dtype)


@functools.partial(jax.jit, static_argnames=("block_b",))
def _pallas_linear_impl(x, w, b, *, block_b):
    """out = x @ w + b, batch-tiled.  x:(B,F) w:(F,N) b:(1,N) -> (B,N), f32.

    N (10 / 3) is used directly as the last block dim (== full array dim, so
    the BlockSpec is legal). The kernel is HBM-bound on reading x, so the few
    masked partial stores on the narrow output beat padding it to 128 lanes
    and writing 12.8x the output bytes.
    """
    B, F = x.shape
    N = w.shape[1]
    nb = pl.cdiv(B, block_b)  # ragged last block handled by masked stores

    return pl.pallas_call(
        _linear_kernel,
        out_shape=jax.ShapeDtypeStruct((B, N), jnp.float32),
        grid=(nb,),
        in_specs=[
            pl.BlockSpec((block_b, F), lambda i: (i, 0)),  # x: streamed batch tile
            pl.BlockSpec((F, N), lambda i: (0, 0)),        # w: resident across grid
            pl.BlockSpec((1, N), lambda i: (0, 0)),        # b: resident across grid
        ],
        out_specs=pl.BlockSpec((block_b, N), lambda i: (i, 0)),
        compiler_params=pltpu.CompilerParams(
            dimension_semantics=("parallel",),  # megacore-shard batch tiles
        ),
    )(x, w, b)


def _round_up(v, m):
    return ((v + m - 1) // m) * m


def pallas_linear(x, w, b, *, max_block_b=1024):
    """Dispatch: XLA for tiny shapes, Pallas streaming matmul otherwise.

    max_block_b=1024 is safe on v5e's 16 MiB scoped-VMEM default; on v7x with
    very large batches it can be raised to 2048 for another ~15-30%.
    """
    B, F = x.shape
    if B < _TINY_ROWS or B * F <= _TINY_ELEMS:
        # Pure launch latency otherwise (Iris B=2, MNIST B=2); let XLA fuse it.
        return jnp.dot(x, w, precision=_HIGHEST) + b
    if B >= _SPLIT_ROWS:
        # >= 2 grid blocks so both v7x TensorCores get work.
        block_b = min(max_block_b, _round_up(pl.cdiv(B, 2), 8))
    else:
        # Single full-batch block (block shape == full dims): fully
        # VMEM-resident, no masking, no pipeline overhead on small batches.
        block_b = min(max_block_b, B)
    return _pallas_linear_impl(x, w, b, block_b=block_b)


# ---------------------------------------------------------------------------
# QuantumModel2 in JAX: parameter setup + dispatch (glue); matmul in Pallas.
# ---------------------------------------------------------------------------
class QuantumModel2JAX:
    def __init__(self, dataset, key):
        self.dataset = dataset
        k1, k2, k3 = jax.random.split(key, 3)
        if dataset == "MNIST":
            in_f, out_f = 784, 10
            bound = 1.0 / (in_f ** 0.5)
            # nn.Linear stores weight as (out, in); keep (in, out) for the kernel.
            self.fc_w = jax.random.uniform(
                k1, (in_f, out_f), jnp.float32, -bound, bound)
            self.fc_b = jax.random.uniform(
                k2, (1, out_f), jnp.float32, -bound, bound)
        else:  # Iris / MedMNIST: raw parameter matrix (initialization_strategy)
            in_f, out_f = 4, 3
            self.params = jax.random.normal(k3, (in_f, out_f), jnp.float32)
            self.zero_bias = jnp.zeros((1, out_f), jnp.float32)
        # TODO(synk): optimizer (Adam) and compute_loss (CrossEntropyLoss) are
        # training-time pieces, not part of the forward pass ported here.

    def forward(self, X):
        if self.dataset == "MNIST":
            if X.ndim > 2:
                X = X.reshape(X.shape[0], -1)  # X.view(X.size(0), -1)
            return pallas_linear(X, self.fc_w, self.fc_b)
        elif self.dataset in ("Iris", "MedMNIST"):
            return pallas_linear(X, self.params, self.zero_bias)
        # Other datasets are undefined in the reference module.


def _reference(x, w, b):
    return jnp.dot(x, w, precision=_HIGHEST) + b


if __name__ == "__main__":
    key = jax.random.PRNGKey(0)
    kx1, kx2, kx3, kx4, kp = jax.random.split(key, 5)

    # --- MNIST branch: (2,1,28,28) -> flatten -> Linear(784,10) (tiny path) ---
    model_mnist = QuantumModel2JAX("MNIST", kp)
    x_mnist = jax.random.normal(kx1, (2, 1, 28, 28), jnp.float32)
    out_mnist = jax.block_until_ready(model_mnist.forward(x_mnist))
    ref_mnist = _reference(x_mnist.reshape(2, -1), model_mnist.fc_w, model_mnist.fc_b)
    assert out_mnist.shape == (2, 10)
    assert jnp.allclose(out_mnist, ref_mnist, atol=1e-5, rtol=1e-5)

    # --- Iris branch: X.mm(params), (2,4) @ (4,3) (tiny path) ---
    model_iris = QuantumModel2JAX("Iris", kp)
    x_iris = jax.random.normal(kx2, (2, 4), jnp.float32)
    out_iris = jax.block_until_ready(model_iris.forward(x_iris))
    ref_iris = jnp.dot(x_iris, model_iris.params, precision=_HIGHEST)
    assert out_iris.shape == (2, 3)
    assert jnp.allclose(out_iris, ref_iris, atol=1e-5, rtol=1e-5)

    # --- Pallas path: single resident block (B=64 < split threshold) ---
    x_a = jax.random.normal(kx3, (64, 784), jnp.float32)
    out_a = jax.block_until_ready(
        pallas_linear(x_a, model_mnist.fc_w, model_mnist.fc_b))
    ref_a = _reference(x_a, model_mnist.fc_w, model_mnist.fc_b)
    assert out_a.shape == (64, 10)
    assert jnp.allclose(out_a, ref_a, atol=1e-5, rtol=1e-5)

    # --- Pallas path: >=2 blocks + ragged last block (B=300, block_b=128) ---
    x_b = jax.random.normal(kx4, (300, 784), jnp.float32)
    out_b = jax.block_until_ready(
        pallas_linear(x_b, model_mnist.fc_w, model_mnist.fc_b, max_block_b=128))
    ref_b = _reference(x_b, model_mnist.fc_w, model_mnist.fc_b)
    assert out_b.shape == (300, 10)
    assert jnp.allclose(out_b, ref_b, atol=1e-5, rtol=1e-5)

    print("KERNEL_OK")
</pallas_src>

<mosaic_0001>
module attributes {stable_mosaic.version = 11 : i64} {
  func.func @_linear_kernel(%arg0: i32, %arg1: memref<64x784xf32, #tpu.memory_space<vmem>>, %arg2: memref<784x10xf32, #tpu.memory_space<vmem>>, %arg3: memref<1x10xf32, #tpu.memory_space<vmem>>, %arg4: memref<64x10xf32, #tpu.memory_space<vmem>>) attributes {dimension_semantics = [#tpu.dimension_semantics<parallel>], iteration_bounds = array<i64: 1>, scalar_prefetch = 0 : i64, scratch_operands = 0 : i64, tpu.core_type = #tpu.core_type<tc>, window_params = [{transform_indices = @transform_0, window_bounds = array<i64: 64, 784>}, {pipeline_mode = #tpu.pipeline_mode<synchronous>, transform_indices = @transform_1, window_bounds = array<i64: 784, 10>}, {pipeline_mode = #tpu.pipeline_mode<synchronous>, transform_indices = @transform_2, window_bounds = array<i64: 1, 10>}, {transform_indices = @transform_3, window_bounds = array<i64: 64, 10>}]} {
    %c0 = arith.constant 0 : index
    %c0_0 = arith.constant 0 : index
    %0 = vector.load %arg1[%c0, %c0_0] : memref<64x784xf32, #tpu.memory_space<vmem>>, vector<64x784xf32>
    %c0_1 = arith.constant 0 : index
    %c0_2 = arith.constant 0 : index
    %1 = vector.load %arg2[%c0_1, %c0_2] : memref<784x10xf32, #tpu.memory_space<vmem>>, vector<784x10xf32>
    %cst = arith.constant dense<0.000000e+00> : vector<64x10xf32>
    %2 = tpu.matmul %0, %1, %cst {dimension_numbers = #tpu.dot_dimension_numbers<[1], [0], [0], [1], [0, 0, 1, 1], [], []>, precision = #tpu.contract_precision<fp32>} : vector<64x784xf32>, vector<784x10xf32>, vector<64x10xf32> -> vector<64x10xf32>
    %c0_3 = arith.constant 0 : index
    %c0_4 = arith.constant 0 : index
    %3 = vector.load %arg3[%c0_3, %c0_4] : memref<1x10xf32, #tpu.memory_space<vmem>>, vector<1x10xf32>
    %4 = vector.broadcast %3 : vector<1x10xf32> to vector<64x10xf32>
    %5 = arith.addf %2, %4 : vector<64x10xf32>
    %c0_5 = arith.constant 0 : index
    %c0_6 = arith.constant 0 : index
    %6 = vector.load %arg4[%c0_5, %c0_6] : memref<64x10xf32, #tpu.memory_space<vmem>>, vector<64x10xf32>
    tpu.vector_store %arg4[%c0_5, %c0_6], %5 {strides = array<i32>} : memref<64x10xf32, #tpu.memory_space<vmem>>, vector<64x10xf32>,
    return
  }
  func.func @transform_0(%arg0: i32) -> (i32, i32) {
    %c0_i32 = arith.constant 0 : i32
    %c0_i32_0 = arith.constant 0 : i32
    return %arg0, %c0_i32 : i32, i32
  }
  func.func @transform_1(%arg0: i32) -> (i32, i32) {
    %c0_i32 = arith.constant 0 : i32
    %c0_i32_0 = arith.constant 0 : i32
    %c0_i32_1 = arith.constant 0 : i32
    return %c0_i32, %c0_i32_0 : i32, i32
  }
  func.func @transform_2(%arg0: i32) -> (i32, i32) {
    %c0_i32 = arith.constant 0 : i32
    %c0_i32_0 = arith.constant 0 : i32
    %c0_i32_1 = arith.constant 0 : i32
    return %c0_i32, %c0_i32_0 : i32, i32
  }
  func.func @transform_3(%arg0: i32) -> (i32, i32) {
    %c0_i32 = arith.constant 0 : i32
    %c0_i32_0 = arith.constant 0 : i32
    return %arg0, %c0_i32 : i32, i32
  }
}

</mosaic_0001>

<bundles_post_ra>
// kernel: _pallas_linear_impl.1
= control target key start
LH: loop header
LB: loop body
LE: loop exit
PB: predicated region body
PF: predicated region fallthrough
CT: control target
= control target key end

     0   :  { %vm172_vm0 = vcmask 130048   ;;  %vm3921_vm1 = vcmask 80896   ;;  %s7411_s1 = inlined_call_operand.vmem [shape: f32[784,10], index: 1, kind: input, shape index: {}]   ;;  %s7412_s0 = inlined_call_operand.vmem [shape: f32[64,784], index: 0, kind: input, shape index: {}]   ;;  %s7413_s2 = inlined_call_operand.vmem [shape: f32[1,10], index: 2, kind: input, shape index: {}]   ;;  %s7414_s3 = inlined_call_operand.vmem [shape: f32[64,10], index: 3, kind: output, shape index: {}]  }
   0x1   :  { %v85_v0 = vld [vmem:[%s7411_s1 + $0x78] sm:$0xff]  ;;  %v84_v1 = vld [vmem:[%s7411_s1 + $0x70] sm:$0xff]  ;;  %v83_v2 = vld [vmem:[%s7411_s1 + $0x68] sm:$0xff] }
   0x2   :  { %v3996_v3 = vand.u32 4294901760, %v85_v0  ;;  %v3998_v4 = vand.u32 4294901760, %v84_v1  ;;  %v4000_v5 = vand.u32 4294901760, %v83_v2  ;;  %v82_v6 = vld [vmem:[%s7411_s1 + $0x60] sm:$0xff]  ;;  %v81_v7 = vld [vmem:[%s7411_s1 + $0x58] sm:$0xff]  ;;  %v80_v8 = vld [vmem:[%s7411_s1 + $0x50] sm:$0xff] }
   0x3   :  { %v4011_v9 = vand.u32 4294901760, %v82_v6  ;;  %v4013_v10 = vand.u32 4294901760, %v81_v7  ;;  %v4015_v11 = vand.u32 4294901760, %v80_v8  ;;  %v79_v12 = vld [vmem:[%s7411_s1 + $0x48] sm:$0xff]  ;;  %v78_v13 = vld [vmem:[%s7411_s1 + $0x40] sm:$0xff]  ;;  %v77_v17 = vld [vmem:[%s7411_s1 + $0x38] sm:$0xff] }
   0x4   :  { %3934 = vmatpush.msra.mxu2 %v3996_v3  ;;  %v4025_v14 = vsub.f32 %v85_v0, %v3996_v3  ;;  %v4028_v15 = vsub.f32 %v84_v1, %v3998_v4  ;;  %v4031_v16 = vsub.f32 %v83_v2, %v4000_v5  ;;  %198 = vmatpush.msra.mxu0 %v3996_v3  ;;  %v4037_v18 = vand.u32 4294901760, %v79_v12  ;;  %v76_v25 = vld [vmem:[%s7411_s1 + $0x30] sm:$0xff]  ;;  %v75_v33 = vld [vmem:[%s7411_s1 + $0x28] sm:$0xff]  ;;  %v74_v42 = vld [vmem:[%s7411_s1 + $0x20] sm:$0xff] }
   0x5   :  { %v4040_v19 = vsub.f32 %v82_v6, %v4011_v9  ;;  %v4043_v20 = vsub.f32 %v81_v7, %v4013_v10  ;;  %v4049_v24 = vand.u32 4294901760, %v78_v13  ;;  %v4056_v27 = vand.u32 4294901760, %v77_v17  ;;  %v42_v47 = vld [vmem:[%s7412_s0 + $0xe0] sm:$0xff]  ;;  %v73_v49 = vld [vmem:[%s7411_s1 + $0x18] sm:$0xff]  ;;  %v72_v55 = vld [vmem:[%s7411_s1 + $0x10] sm:$0xff] }
   0x6   :  { %3935 = vmatpush.msra.mxu2 %v3998_v4  ;;  %v296_v21 = vand.u32 4294901760, %v4025_v14  ;;  %v302_v22 = vand.u32 4294901760, %v4028_v15  ;;  %v308_v23 = vand.u32 4294901760, %v4031_v16  ;;  %200 = vmatpush.msra.mxu0 %v3998_v4  ;;  %v4059_v28 = vsub.f32 %v80_v8, %v4015_v11  ;;  %v71_v62 = vld [vmem:[%s7411_s1 + $0x8] sm:$0xff]  ;;  %v70_v2 = vld [vmem:[%s7411_s1] sm:$0xff] }
   0x7   :  { %v314_v26 = vand.u32 4294901760, %v4040_v19  ;;  %v320_v32 = vand.u32 4294901760, %v4043_v20  ;;  %v4079_v35 = vand.u32 4294901760, %v76_v25  ;;  %v4082_v36 = vsub.f32 %v79_v12, %v4037_v18  ;;  %v14_v12 = vld [vmem:[%s7412_s0] sm:$0xff] }
   0x8   :  { %3936 = vmatpush.msra.mxu2 %v4000_v5  ;;  %v297_v29 = vsub.f32 %v4025_v14, %v296_v21  ;;  %v303_v30 = vsub.f32 %v4028_v15, %v302_v22  ;;  %v309_v31 = vsub.f32 %v4031_v16, %v308_v23  ;;  %202 = vmatpush.msra.mxu0 %v4000_v5  ;;  %v326_v39 = vand.u32 4294901760, %v4059_v28 }
   0x9   :  { %v315_v34 = vsub.f32 %v4040_v19, %v314_v26  ;;  %v4088_v40 = vsub.f32 %v78_v13, %v4049_v24  ;;  %v4090_v41 = vand.u32 4294901760, %v75_v33  ;;  %v321_v44 = vsub.f32 %v4043_v20, %v320_v32 }
   0xa   :  { %3937 = vmatpush.msra.mxu2 %v4011_v9  ;;  %v298_v37 = vand.u32 4294901760, %v297_v29  ;;  %v304_v38 = vand.u32 4294901760, %v303_v30  ;;  %204 = vmatpush.msra.mxu0 %v4011_v9  ;;  %v310_v43 = vand.u32 4294901760, %v309_v31  ;;  %v332_v45 = vand.u32 4294901760, %v4082_v36  ;;  %v49_v30 = vld [vmem:[%s7412_s0 + $0x118] sm:$0xff] }
   0xb   :  { %v4101_v46 = vsub.f32 %v77_v17, %v4056_v27  ;;  %v338_v48 = vand.u32 4294901760, %v4088_v40  ;;  %v316_v50 = vand.u32 4294901760, %v315_v34  ;;  %v327_v51 = vsub.f32 %v4059_v28, %v326_v39 }
   0xc   :  { %3938 = vmatpush.msra.mxu2 %v4013_v10  ;;  %3950 = vmatpush.msra.mxu3 %v298_v37  ;;  %v4115_v52 = vand.u32 4294901760, %v74_v42  ;;  %v4118_v53 = vsub.f32 %v76_v25, %v4079_v35  ;;  %v4125_v56 = vand.u32 4294901760, %v42_v47  ;;  %v322_v57 = vand.u32 4294901760, %v321_v44 }
   0xd   :  { %299 = vmatpush.msra.mxu1 %v298_v37  ;;  %206 = vmatpush.msra.mxu0 %v4013_v10  ;;  %v7423_v54 = vand.u32 4294901760, %v4101_v46  ;;  %v333_v58 = vsub.f32 %v4082_v36, %v332_v45  ;;  %v4131_v59 = vand.u32 4294901760, %v73_v49  ;;  %v4134_v60 = vsub.f32 %v75_v33, %v4090_v41 }
   0xe   :  { %3939 = vmatpush.msra.mxu2 %v4015_v11  ;;  %3951 = vmatpush.msra.mxu3 %v304_v38  ;;  %v339_v61 = vsub.f32 %v4088_v40, %v338_v48  ;;  %v328_v63 = vand.u32 4294901760, %v327_v51  ;;  %v4144_v0 = vand.u32 4294901760, %v72_v55  ;;  %v7420_v1 = vand.u32 4294901760, %v4118_v53 }
   0xf   :  { %305 = vmatpush.msra.mxu1 %v304_v38  ;;  %208 = vmatpush.msra.mxu0 %v4015_v11  ;;  %v4151_v6 = vsub.f32 %v74_v42, %v4115_v52  ;;  %v345_v7 = vsub.f32 %v4101_v46, %v7423_v54  ;;  %v4158_v8 = vsub.f32 %v42_v47, %v4125_v56  ;;  %v334_v13 = vand.u32 4294901760, %v333_v58 }
  0x10   :  { %3940 = vmatpush.msra.mxu2 %v4037_v18  ;;  %3952 = vmatpush.msra.mxu3 %v310_v43  ;;  %v4164_v17 = vand.u32 4294901760, %v71_v62  ;;  %v7418_v25 = vand.u32 4294901760, %v4134_v60  ;;  %v4168_v29 = vsub.f32 %v73_v49, %v4131_v59  ;;  %v340_v31 = vand.u32 4294901760, %v339_v61 }
  0x11   :  { %311 = vmatpush.msra.mxu1 %v310_v43  ;;  %210 = vmatpush.msra.mxu0 %v4037_v18  ;;  %v4173_v33 = vand.u32 4294901760, %v70_v2  ;;  %v351_v34 = vsub.f32 %v4118_v53, %v7420_v1  ;;  %v7417_v37 = vand.u32 4294901760, %v4151_v6  ;;  %v4182_v38 = vsub.f32 %v72_v55, %v4144_v0 }
  0x12   :  { %3941 = vmatpush.msra.mxu2 %v4049_v24  ;;  %3953 = vmatpush.msra.mxu3 %v316_v50  ;;  %v4184_v42 = vand.u32 4294901760, %v14_v12  ;;  %v346_v43 = vand.u32 4294901760, %v345_v7  ;;  %v7415_v44 = vand.u32 4294901760, %v4158_v8  ;;  %v4188_v47 = vand.u32 4294901760, %v49_v30 }
  0x13   :  { %317 = vmatpush.msra.mxu1 %v316_v50  ;;  %212 = vmatpush.msra.mxu0 %v4049_v24  ;;  %v357_v49 = vsub.f32 %v4134_v60, %v7418_v25  ;;  %v7416_v50 = vand.u32 4294901760, %v4168_v29  ;;  %v4196_v51 = vsub.f32 %v71_v62, %v4164_v17  ;;  %v363_v58 = vsub.f32 %v4151_v6, %v7417_v37 }
  0x14   :  { %3942 = vmatpush.msra.mxu2 %v4056_v27  ;;  %3954 = vmatpush.msra.mxu3 %v322_v57  ;;  %v4199_v55 = vsub.f32 %v14_v12, %v4184_v42  ;;  %v7419_v61 = vand.u32 4294901760, %v4182_v38  ;;  %v264_v62 = vsub.f32 %v4158_v8, %v7415_v44  ;;  %v4215_v7 = vsub.f32 %v49_v30, %v4188_v47 }
  0x15   :  { %323 = vmatpush.msra.mxu1 %v322_v57  ;;  %214 = vmatpush.msra.mxu0 %v4056_v27  ;;  %v352_v57 = vand.u32 4294901760, %v351_v34  ;;  %v7422_v34 = vand.u32 4294901760, %v4196_v51  ;;  %v364_v30 = vand.u32 4294901760, %v363_v58 }
  0x16   :  { %3943 = vmatpush.msra.mxu2 %v4079_v35  ;;  %3955 = vmatpush.msra.mxu3 %v328_v63  ;;  %v7421_v12 = vand.u32 4294901760, %v4199_v55  ;;  %v265_v37 = vand.u32 4294901760, %v264_v62 }
  0x17   :  { %329 = vmatpush.msra.mxu1 %v328_v63  ;;  %216 = vmatpush.msra.mxu0 %v4079_v35  ;;  %v4208_v63 = vsub.f32 %v70_v2, %v4173_v33  ;;  %v369_v2 = vsub.f32 %v4168_v29, %v7416_v50  ;;  %v21_v50 = vld [vmem:[%s7412_s0 + $0x38] sm:$0xff]  ;;  %v381_v1 = vsub.f32 %v4196_v51, %v7422_v34 }
  0x18   :  { %3944 = vmatpush.msra.mxu2 %v4090_v41  ;;  %3956 = vmatpush.msra.mxu3 %v334_v13  ;;  %v232_v58 = vsub.f32 %v4199_v55, %v7421_v12 }
  0x19   :  { %335 = vmatpush.msra.mxu1 %v334_v13  ;;  %218 = vmatpush.msra.mxu0 %v4090_v41  ;;  %v358_v13 = vand.u32 4294901760, %v357_v49  ;;  %v375_v49 = vsub.f32 %v4182_v38, %v7419_v61  ;;  %v386_v44 = vand.u32 4294901760, %v4208_v63  ;;  %v370_v61 = vand.u32 4294901760, %v369_v2 }
  0x1a   :  { %3945 = vmatpush.msra.mxu2 %v4115_v52  ;;  %3957 = vmatpush.msra.mxu3 %v340_v31  ;;  %v233_v34 = vand.u32 4294901760, %v232_v58  ;;  %v382_v54 = vand.u32 4294901760, %v381_v1 }
  0x1b   :  { %341 = vmatpush.msra.mxu1 %v340_v31  ;;  %220 = vmatpush.msra.mxu0 %v4115_v52  ;;  %v56_v31 = vld [vmem:[%s7412_s0 + $0x150] sm:$0xff]  ;;  %v376_v62 = vand.u32 4294901760, %v375_v49  ;;  %v387_v12 = vsub.f32 %v4208_v63, %v386_v44  ;;  %v63_v49 = vld [vmem:[%s7412_s0 + $0x188] sm:$0xff] }
  0x1c   :  { %3946 = vmatpush.msra.mxu2 %v4131_v59  ;;  %3958 = vmatpush.msra.mxu3 %v346_v43  ;;  %v4240_v25 = vand.u32 4294901760, %v56_v31  ;;  %v4269_v1 = vand.u32 4294901760, %v63_v49 }
  0x1d   :  { %347 = vmatpush.msra.mxu1 %v346_v43  ;;  %222 = vmatpush.msra.mxu0 %v4131_v59  ;;  %v271_v43 = vand.u32 4294901760, %v4215_v7 }
  0x1e   :  { %3947 = vmatpush.msra.mxu2 %v4144_v0  ;;  %3959 = vmatpush.msra.mxu3 %v352_v57 }
  0x1f   :  { %353 = vmatpush.msra.mxu1 %v352_v57  ;;  %224 = vmatpush.msra.mxu0 %v4144_v0  ;;  %v4247_v57 = vand.u32 4294901760, %v21_v50  ;;  %v272_v2 = vsub.f32 %v4215_v7, %v271_v43 }
  0x20   :  { %3948 = vmatpush.msra.mxu2 %v4164_v17  ;;  %3960 = vmatpush.msra.mxu3 %v358_v13 }
  0x21   :  { %359 = vmatpush.msra.mxu1 %v358_v13  ;;  %226 = vmatpush.msra.mxu0 %v4164_v17  ;;  %v4257_v13 = vsub.f32 %v56_v31, %v4240_v25  ;;  %v273_v31 = vand.u32 4294901760, %v272_v2  ;;  %v101_v2 = vld [vmem:[%s7411_s1 + $0xf8] sm:$0xff] }
  0x22   :  { %3949 = vmatpush.msra.mxu2 %v4173_v33  ;;  %3961 = vmatpush.msra.mxu3 %v364_v30 }
  0x23   :  { %266 = vmatmul.f32.vlgmr.msra.gmra.mxu2 %v265_v37  ;;  %365 = vmatpush.msra.mxu1 %v364_v30  ;;  %v4265_v37 = vsub.f32 %v21_v50, %v4247_v57  ;;  %v388_v30 = vand.u32 4294901760, %v387_v12  ;;  %v279_v58 = vand.u32 4294901760, %v4257_v13 }
  0x24   :  { %3962 = vmatpush.msra.mxu3 %v370_v61  ;;  %425 = vmatpush.msrb.mxu2 %v4025_v14 }
  0x25   :  { %371 = vmatpush.msra.mxu1 %v370_v61  ;;  %228 = vmatpush.msra.mxu0 %v4173_v33  ;;  %v239_v50 = vand.u32 4294901760, %v4265_v37  ;;  %v28_v61 = vld [vmem:[%s7412_s0 + $0x70] sm:$0xff]  ;;  %v280_v12 = vsub.f32 %v4257_v13, %v279_v58 }
  0x26   :  { %3963 = vmatpush.msra.mxu3 %v376_v62  ;;  %428 = vmatpush.msrb.mxu2 %v4028_v15 }
  0x27   :  { %377 = vmatpush.msra.mxu1 %v376_v62  ;;  %234 = vmatmul.f32.vlgmr.msra.gmra.mxu0 %v233_v34  ;;  %v240_v14 = vsub.f32 %v4265_v37, %v239_v50  ;;  %v281_v34 = vand.u32 4294901760, %v280_v12  ;;  %v7519_v12 = vand.u32 4294901760, %v4101_v46 }
  0x28   :  { %3964 = vmatpush.msra.mxu3 %v382_v54  ;;  %431 = vmatpush.msrb.mxu2 %v4031_v16 }
  0x29   :  { %383 = vmatpush.msra.mxu1 %v382_v54  ;;  %596 = vmatpush.msrb.mxu0 %v296_v21  ;;  %v4284_v54 = vsub.f32 %v63_v49, %v4269_v1  ;;  %v4293_v21 = vand.u32 4294901760, %v28_v61  ;;  %v241_v15 = vand.u32 4294901760, %v240_v14 }
  0x2a   :  { %3965 = vmatpush.msra.mxu3 %v388_v30  ;;  %434 = vmatpush.msrb.mxu2 %v4040_v19 }
  0x2b   :  { %274 = vmatmul.f32.gmra.mxu2 %v273_v31  ;;  %407 = vmatmul.f32.vlgmr.msra.gmra.mxu3 %v4125_v56  ;;  %v287_v62 = vand.u32 4294901760, %v4284_v54 }
  0x2c   :  { %513 = vmatpush.msrb.mxu3 %v3996_v3  ;;  %437 = vmatpush.msrb.mxu2 %v4043_v20  ;;  %v4345_v20 = vand.u32 4294901760, %v101_v2 }
  0x2d   :  { %389 = vmatpush.msra.mxu1 %v388_v30  ;;  %600 = vmatpush.msrb.mxu0 %v302_v22  ;;  %v4307_v22 = vsub.f32 %v28_v61, %v4293_v21  ;;  %v288_v16 = vsub.f32 %v4284_v54, %v287_v62 }
  0x2e   :  { %515 = vmatpush.msrb.mxu3 %v3998_v4  ;;  %440 = vmatpush.msrb.mxu2 %v4059_v28  ;;  %v4364_v49 = vsub.f32 %v101_v2, %v4345_v20  ;;  %v7521_v2 = vand.u32 4294901760, %v4134_v60 }
  0x2f   :  { %391 = vmatmul.f32.vlgmr.msra.gmra.mxu1 %v4184_v42  ;;  %604 = vmatpush.msrb.mxu0 %v308_v23  ;;  %v247_v19 = vand.u32 4294901760, %v4307_v22 }
  0x30   :  { %517 = vmatpush.msrb.mxu3 %v4000_v5  ;;  %443 = vmatpush.msrb.mxu2 %v4082_v36 }
  0x31   :  { %691 = vmatpush.msrb.mxu1 %v3996_v3  ;;  %608 = vmatpush.msrb.mxu0 %v314_v26  ;;  %v35_v3 = vld [vmem:[%s7412_s0 + $0xa8] sm:$0xff]  ;;  %v289_v26 = vand.u32 4294901760, %v288_v16 }
  0x32   :  { %519 = vmatpush.msrb.mxu3 %v4011_v9  ;;  %446 = vmatpush.msrb.mxu2 %v4088_v40  ;;  %v4324_v23 = vand.u32 4294901760, %v35_v3 }
  0x33   :  { %282 = vmatmul.f32.gmra.mxu2 %v281_v34  ;;  %411 = vmatmul.f32.gmra.mxu3 %v4188_v47 }
  0x34   :  { %521 = vmatpush.msrb.mxu3 %v4013_v10  ;;  %449 = vmatpush.msrb.mxu2 %v4101_v46  ;;  %v96_v46 = vld [vmem:[%s7411_s1 + $0xd0] sm:$0xff] }
  0x35   :  { %693 = vmatpush.msrb.mxu1 %v3998_v4  ;;  %242 = vmatmul.f32.gmra.mxu0 %v241_v15  ;;  %v248_v4 = vsub.f32 %v4307_v22, %v247_v19 }
  0x36   :  { %523 = vmatpush.msrb.mxu3 %v4015_v11  ;;  %452 = vmatpush.msrb.mxu2 %v4118_v53 }
  0x37   :  { %695 = vmatpush.msrb.mxu1 %v4000_v5  ;;  %612 = vmatpush.msrb.mxu0 %v320_v32  ;;  %v100_v5 = vld [vmem:[%s7411_s1 + $0xf0] sm:$0xff]  ;;  %v4348_v32 = vsub.f32 %v35_v3, %v4324_v23  ;;  %v7520_v3 = vand.u32 4294901760, %v4118_v53  ;;  %v4428_v53 = vand.u32 4294901760, %v96_v46 }
  0x38   :  { %525 = vmatpush.msrb.mxu3 %v4037_v18  ;;  %455 = vmatpush.msrb.mxu2 %v4134_v60  ;;  %v4356_v28 = vand.u32 4294901760, %v100_v5  ;;  %v7522_v60 = vand.u32 4294901760, %v4151_v6 }
  0x39   :  { %697 = vmatpush.msrb.mxu1 %v4011_v9  ;;  %616 = vmatpush.msrb.mxu0 %v326_v39  ;;  %v99_v9 = vld [vmem:[%s7411_s1 + $0xe8] sm:$0xff]  ;;  %v249_v39 = vand.u32 4294901760, %v248_v4  ;;  %v255_v30 = vand.u32 4294901760, %v4348_v32 }
  0x3a   :  { %527 = vmatpush.msrb.mxu3 %v4049_v24  ;;  %458 = vmatpush.msrb.mxu2 %v4151_v6  ;;  %v4367_v31 = vand.u32 4294901760, %v99_v9  ;;  %v4375_v36 = vsub.f32 %v100_v5, %v4356_v28 }
  0x3b   :  { %290 = vmatmul.f32.gmra.mxu2 %v289_v26  ;;  %415 = vmatmul.f32.gmra.mxu3 %v4240_v25  ;;  %v256_v40 = vsub.f32 %v4348_v32, %v255_v30 }
  0x3c   :  { %529 = vmatpush.msrb.mxu3 %v4056_v27  ;;  %461 = vmatpush.msrb.mxu2 %v4168_v29 }
  0x3d   :  { %395 = vmatmul.f32.gmra.mxu1 %v4247_v57  ;;  %620 = vmatpush.msrb.mxu0 %v332_v45  ;;  %v4388_v45 = vsub.f32 %v99_v9, %v4367_v31  ;;  %v257_v14 = vand.u32 4294901760, %v256_v40 }
  0x3e   :  { %531 = vmatpush.msrb.mxu3 %v4079_v35  ;;  %699 = vmatpush.msrb.mxu1 %v4013_v10  ;;  %v98_v10 = vld [vmem:[%s7411_s1 + $0xe0] sm:$0xff] }
  0x3f   :  { %464 = vmatpush.msrb.mxu2 %v4182_v38  ;;  %624 = vmatpush.msrb.mxu0 %v338_v48  ;;  %v97_v48 = vld [vmem:[%s7411_s1 + $0xd8] sm:$0xff]  ;;  %v4398_v61 = vand.u32 4294901760, %v98_v10  ;;  %v866_v15 = vand.u32 4294901760, %v4388_v45 }
  0x40   :  { %533 = vmatpush.msrb.mxu3 %v4090_v41  ;;  %701 = vmatpush.msrb.mxu1 %v4015_v11  ;;  %v854_v11 = vand.u32 4294901760, %v4364_v49  ;;  %v4409_v16 = vand.u32 4294901760, %v97_v48 }
  0x41   :  { %467 = vmatpush.msrb.mxu2 %v4196_v51  ;;  %250 = vmatmul.f32.gmra.mxu0 %v249_v39  ;;  %v4423_v26 = vsub.f32 %v98_v10, %v4398_v61  ;;  %v867_v5 = vsub.f32 %v4388_v45, %v866_v15  ;;  %v7523_v39 = vand.u32 4294901760, %v4199_v55 }
  0x42   :  { %535 = vmatpush.msrb.mxu3 %v4115_v52  ;;  %703 = vmatpush.msrb.mxu1 %v4037_v18  ;;  %v860_v18 = vand.u32 4294901760, %v4375_v36  ;;  %v855_v34 = vsub.f32 %v4364_v49, %v854_v11  ;;  %v4438_v9 = vsub.f32 %v97_v48, %v4409_v16  ;;  %v7524_v48 = vand.u32 4294901760, %v4168_v29 }
  0x43   :  { %470 = vmatpush.msrb.mxu2 %v4208_v63  ;;  %419 = vmatmul.f32.gmra.mxu3 %v4269_v1  ;;  %v872_v40 = vand.u32 4294901760, %v4423_v26  ;;  %v868_v6 = vand.u32 4294901760, %v867_v5  ;;  %v7525_v29 = vand.u32 4294901760, %v4182_v38 }
  0x44   :  { %473 = vmatmul.f32.vlgmr.msrb.gmra.mxu2 %v4199_v55  ;;  %537 = vmatpush.msrb.mxu3 %v4131_v59  ;;  %v856_v4 = vand.u32 4294901760, %v855_v34  ;;  %v878_v55 = vand.u32 4294901760, %v4438_v9  ;;  %v93_v34 = vld [vmem:[%s7411_s1 + $0xb8] sm:$0xff] }
  0x45   :  { %628 = vmatpush.msrb.mxu0 %v7519_v12  ;;  %705 = vmatpush.msrb.mxu1 %v4049_v24  ;;  %v861_v24 = vsub.f32 %v4375_v36, %v860_v18 }
  0x46   :  { %399 = vmatmul.f32.gmra.mxu1 %v4293_v21  ;;  %539 = vmatpush.msrb.mxu3 %v4144_v0 }
  0x47   :  { %632 = vmatpush.msrb.mxu0 %v7520_v3  ;;  %707 = vmatpush.msrb.mxu1 %v4056_v27  ;;  %v95_v27 = vld [vmem:[%s7411_s1 + $0xc8] sm:$0xff]  ;;  %v862_v10 = vand.u32 4294901760, %v861_v24  ;;  %v7526_v3 = vand.u32 4294901760, %v4196_v51  ;;  %v4479_v24 = vand.u32 4294901760, %v93_v34 }
  0x48   :  { %541 = vmatpush.msrb.mxu3 %v4164_v17  ;;  %756 = vmatpush.msra.mxu2 %v4345_v20  ;;  %v4450_v12 = vand.u32 4294901760, %v95_v27 }
  0x49   :  { %636 = vmatpush.msrb.mxu0 %v7521_v2  ;;  %709 = vmatpush.msrb.mxu1 %v4079_v35  ;;  %v94_v35 = vld [vmem:[%s7411_s1 + $0xc0] sm:$0xff]  ;;  %v879_v2 = vsub.f32 %v4438_v9, %v878_v55 }
  0x4a   :  { %543 = vmatpush.msrb.mxu3 %v4173_v33  ;;  %258 = vmatmul.f32.gmra.mxu0 %v257_v14  ;;  %v4460_v14 = vand.u32 4294901760, %v94_v35 }
  0x4b   :  { %640 = vmatpush.msrb.mxu0 %v7522_v60  ;;  %711 = vmatpush.msrb.mxu1 %v4090_v41  ;;  %v4456_v41 = vsub.f32 %v96_v46, %v4428_v53  ;;  %v4473_v46 = vsub.f32 %v95_v27, %v4450_v12  ;;  %v880_v63 = vand.u32 4294901760, %v879_v2 }
  0x4c   :  { %478 = vmatmul.f32.gmra.mxu2 %v4265_v37  ;;  %547 = vmatmul.f32.vlgmr.msrb.gmra.mxu3 %v7523_v39  ;;  %v4489_v51 = vsub.f32 %v94_v35, %v4460_v14 }
  0x4d   :  { %644 = vmatpush.msrb.mxu0 %v7524_v48  ;;  %713 = vmatpush.msrb.mxu1 %v4115_v52  ;;  %v873_v52 = vsub.f32 %v4423_v26, %v872_v40  ;;  %v884_v38 = vand.u32 4294901760, %v4456_v41  ;;  %v89_v48 = vld [vmem:[%s7411_s1 + $0x98] sm:$0xff] }
  0x4e   :  { %857 = vmatpush.msra.mxu3 %v856_v4  ;;  %403 = vmatmul.f32.gmra.mxu1 %v4324_v23  ;;  %v890_v4 = vand.u32 4294901760, %v4473_v46  ;;  %v896_v37 = vand.u32 4294901760, %v4489_v51 }
  0x4f   :  { %648 = vmatpush.msrb.mxu0 %v7525_v29  ;;  %715 = vmatpush.msrb.mxu1 %v4131_v59  ;;  %v92_v59 = vld [vmem:[%s7411_s1 + $0xb0] sm:$0xff]  ;;  %v874_v27 = vand.u32 4294901760, %v873_v52 }
  0x50   :  { %758 = vmatpush.msra.mxu2 %v4356_v28  ;;  %863 = vmatpush.msra.mxu3 %v862_v10  ;;  %v4501_v5 = vand.u32 4294901760, %v92_v59 }
  0x51   :  { %652 = vmatpush.msrb.mxu0 %v7526_v3  ;;  %717 = vmatpush.msrb.mxu1 %v4144_v0  ;;  %v91_v0 = vld [vmem:[%s7411_s1 + $0xa8] sm:$0xff]  ;;  %v4549_v3 = vand.u32 4294901760, %v89_v48 }
  0x52   :  { %760 = vmatpush.msra.mxu2 %v4367_v31  ;;  %869 = vmatpush.msra.mxu3 %v868_v6  ;;  %v4526_v60 = vsub.f32 %v92_v59, %v4501_v5  ;;  %v897_v6 = vsub.f32 %v4489_v51, %v896_v37 }
  0x53   :  { %656 = vmatpush.msrb.mxu0 %v386_v44  ;;  %719 = vmatpush.msrb.mxu1 %v4164_v17  ;;  %v885_v17 = vsub.f32 %v4456_v41, %v884_v38  ;;  %v4509_v44 = vsub.f32 %v93_v34, %v4479_v24 }
  0x54   :  { %483 = vmatmul.f32.gmra.mxu2 %v4307_v22  ;;  %553 = vmatmul.f32.gmra.mxu3 %v239_v50  ;;  %v4514_v50 = vand.u32 4294901760, %v91_v0  ;;  %v7424_v52 = vand.u32 4294901760, %v4526_v60  ;;  %v88_v22 = vld [vmem:[%s7411_s1 + $0x90] sm:$0xff] }
  0x55   :  { %658 = vmatmul.f32.vlgmr.msrb.gmra.mxu0 %v4184_v42  ;;  %721 = vmatpush.msrb.mxu1 %v4173_v33  ;;  %v90_v33 = vld [vmem:[%s7411_s1 + $0xa0] sm:$0xff]  ;;  %v886_v35 = vand.u32 4294901760, %v885_v17  ;;  %v902_v39 = vand.u32 4294901760, %v4509_v44  ;;  %v87_v17 = vld [vmem:[%s7411_s1 + $0x88] sm:$0xff] }
  0x56   :  { %983 = vmatpush.msra.mxu0 %v4364_v49  ;;  %723 = vmatmul.f32.vlgmr.msrb.gmra.mxu1 %v4184_v42  ;;  %v891_v42 = vsub.f32 %v4473_v46, %v890_v4  ;;  %v4531_v10 = vand.u32 4294901760, %v90_v33  ;;  %v4541_v34 = vsub.f32 %v91_v0, %v4514_v50 }
  0x57   :  { %762 = vmatpush.msra.mxu2 %v4398_v61  ;;  %1071 = vmatpush.msra.mxu1 %v4345_v20  ;;  %v903_v59 = vsub.f32 %v4509_v44, %v902_v39 }
  0x58   :  { %875 = vmatpush.msra.mxu3 %v874_v27  ;;  %986 = vmatpush.msra.mxu0 %v4375_v36  ;;  %v892_v29 = vand.u32 4294901760, %v891_v42  ;;  %v4556_v2 = vsub.f32 %v90_v33, %v4531_v10  ;;  %v7425_v0 = vand.u32 4294901760, %v4541_v34  ;;  %v4564_v27 = vand.u32 4294901760, %v88_v22 }
  0x59   :  { %764 = vmatpush.msra.mxu2 %v4409_v16  ;;  %1073 = vmatpush.msra.mxu1 %v4356_v28  ;;  %v904_v33 = vand.u32 4294901760, %v903_v59 }
  0x5a   :  { %881 = vmatpush.msra.mxu3 %v880_v63  ;;  %989 = vmatpush.msra.mxu0 %v4388_v45  ;;  %v4576_v63 = vsub.f32 %v89_v48, %v4549_v3  ;;  %v920_v42 = vand.u32 4294901760, %v4556_v2  ;;  %v4589_v48 = vsub.f32 %v88_v22, %v4564_v27 }
  0x5b   :  { %766 = vmatpush.msra.mxu2 %v4428_v53  ;;  %1075 = vmatpush.msra.mxu1 %v4367_v31 }
  0x5c   :  { %488 = vmatmul.f32.gmra.mxu2 %v4348_v32  ;;  %559 = vmatmul.f32.gmra.mxu3 %v247_v19  ;;  %v898_v19 = vand.u32 4294901760, %v897_v6  ;;  %v915_v6 = vsub.f32 %v4541_v34, %v7425_v0  ;;  %v921_v22 = vsub.f32 %v4556_v2, %v920_v42  ;;  %v7426_v32 = vand.u32 4294901760, %v4589_v48 }
  0x5d   :  { %662 = vmatmul.f32.gmra.mxu0 %v4247_v57  ;;  %887 = vmatpush.msra.mxu3 %v886_v35  ;;  %v86_v35 = vld [vmem:[%s7411_s1 + $0x80] sm:$0xff] }
  0x5e   :  { %727 = vmatmul.f32.gmra.mxu1 %v4247_v57  ;;  %992 = vmatpush.msra.mxu0 %v4423_v26  ;;  %v909_v57 = vsub.f32 %v4526_v60, %v7424_v52  ;;  %v4599_v52 = vand.u32 4294901760, %v86_v35  ;;  %v916_v0 = vand.u32 4294901760, %v915_v6 }
  0x5f   :  { %768 = vmatpush.msra.mxu2 %v4450_v12  ;;  %1077 = vmatpush.msra.mxu1 %v4398_v61 }
  0x60   :  { %893 = vmatpush.msra.mxu3 %v892_v29  ;;  %995 = vmatpush.msra.mxu0 %v4438_v9  ;;  %v4591_v29 = vand.u32 4294901760, %v87_v17  ;;  %v910_v59 = vand.u32 4294901760, %v909_v57 }
  0x61   :  { %770 = vmatpush.msra.mxu2 %v4460_v14  ;;  %1079 = vmatpush.msra.mxu1 %v4409_v16 }
  0x62   :  { %899 = vmatpush.msra.mxu3 %v898_v19  ;;  %998 = vmatpush.msra.mxu0 %v4456_v41  ;;  %v926_v19 = vand.u32 4294901760, %v4576_v63 }
  0x63   :  { %772 = vmatpush.msra.mxu2 %v4479_v24  ;;  %1081 = vmatpush.msra.mxu1 %v4428_v53 }
  0x64   :  { %493 = vmatmul.f32.gmra.mxu2 %v4158_v8  ;;  %565 = vmatmul.f32.gmra.mxu3 %v255_v30  ;;  %v4609_v30 = vsub.f32 %v87_v17, %v4591_v29  ;;  %v927_v57 = vsub.f32 %v4576_v63, %v926_v19  ;;  %v922_v17 = vand.u32 4294901760, %v921_v22  ;;  %v15_v22 = vld [vmem:[%s7412_s0 + $0x8] sm:$0xff] }
  0x65   :  { %666 = vmatmul.f32.gmra.mxu0 %v4293_v21  ;;  %905 = vmatpush.msra.mxu3 %v904_v33  ;;  %v933_v33 = vsub.f32 %v4589_v48, %v7426_v32 }
  0x66   :  { %731 = vmatmul.f32.gmra.mxu1 %v4293_v21  ;;  %1001 = vmatpush.msra.mxu0 %v4473_v46  ;;  %v4618_v21 = vsub.f32 %v86_v35, %v4599_v52  ;;  %v938_v6 = vand.u32 4294901760, %v4609_v30  ;;  %v7527_v35 = vand.u32 4294901760, %v4158_v8  ;;  %v43_v46 = vld [vmem:[%s7412_s0 + $0xe8] sm:$0xff] }
  0x67   :  { %774 = vmatpush.msra.mxu2 %v4501_v5  ;;  %1083 = vmatpush.msra.mxu1 %v4450_v12  ;;  %v934_v32 = vand.u32 4294901760, %v933_v33 }
  0x68   :  { %911 = vmatpush.msra.mxu3 %v910_v59  ;;  %1004 = vmatpush.msra.mxu0 %v4489_v51  ;;  %v928_v59 = vand.u32 4294901760, %v927_v57  ;;  %v939_v8 = vsub.f32 %v4609_v30, %v938_v6  ;;  %v4645_v57 = vand.u32 4294901760, %v15_v22 }
  0x69   :  { %776 = vmatpush.msra.mxu2 %v4514_v50  ;;  %1085 = vmatpush.msra.mxu1 %v4460_v14 }
  0x6a   :  { %917 = vmatpush.msra.mxu3 %v916_v0  ;;  %1007 = vmatpush.msra.mxu0 %v4509_v44  ;;  %v7429_v0 = vand.u32 4294901760, %v4618_v21  ;;  %v4659_v33 = vsub.f32 %v15_v22, %v4645_v57  ;;  %v7528_v44 = vand.u32 4294901760, %v4526_v60 }
  0x6b   :  { %778 = vmatpush.msra.mxu2 %v4531_v10  ;;  %1087 = vmatpush.msra.mxu1 %v4479_v24 }
  0x6c   :  { %498 = vmatmul.f32.gmra.mxu2 %v4215_v7  ;;  %571 = vmatmul.f32.gmra.mxu3 %v7527_v35 }
  0x6d   :  { %670 = vmatmul.f32.gmra.mxu0 %v4324_v23  ;;  %923 = vmatpush.msra.mxu3 %v922_v17  ;;  %v940_v17 = vand.u32 4294901760, %v939_v8  ;;  %v789_v8 = vand.u32 4294901760, %v4659_v33 }
  0x6e   :  { %735 = vmatmul.f32.gmra.mxu1 %v4324_v23  ;;  %1010 = vmatpush.msra.mxu0 %v4526_v60  ;;  %v945_v23 = vsub.f32 %v4618_v21, %v7429_v0 }
  0x6f   :  { %780 = vmatpush.msra.mxu2 %v4549_v3  ;;  %1089 = vmatpush.msra.mxu1 %v4501_v5 }
  0x70   :  { %929 = vmatpush.msra.mxu3 %v928_v59  ;;  %1013 = vmatpush.msra.mxu0 %v4541_v34  ;;  %v946_v35 = vand.u32 4294901760, %v945_v23  ;;  %v117_v59 = vld [vmem:[%s7411_s1 + $0x178] sm:$0xff] }
  0x71   :  { %782 = vmatpush.msra.mxu2 %v4564_v27  ;;  %1091 = vmatpush.msra.mxu1 %v4514_v50  ;;  %v4670_v7 = vand.u32 4294901760, %v117_v59 }
  0x72   :  { %935 = vmatpush.msra.mxu3 %v934_v32  ;;  %1016 = vmatpush.msra.mxu0 %v4556_v2  ;;  %v22_v32 = vld [vmem:[%s7412_s0 + $0x40] sm:$0xff] }
  0x73   :  { %784 = vmatpush.msra.mxu2 %v4591_v29  ;;  %1093 = vmatpush.msra.mxu1 %v4531_v10  ;;  %v4685_v23 = vsub.f32 %v117_v59, %v4670_v7 }
  0x74   :  { %503 = vmatmul.f32.gmra.mxu2 %v4257_v13  ;;  %577 = vmatmul.f32.gmra.mxu3 %v271_v43  ;;  %v116_v43 = vld [vmem:[%s7411_s1 + $0x170] sm:$0xff]  ;;  %v29_v13 = vld [vmem:[%s7412_s0 + $0x78] sm:$0xff] }
  0x75   :  { %674 = vmatmul.f32.gmra.mxu0 %v4125_v56  ;;  %786 = vmatpush.msra.mxu2 %v4599_v52  ;;  %v4677_v22 = vand.u32 4294901760, %v116_v43  ;;  %v7428_v49 = vand.u32 4294901760, %v4685_v23  ;;  %v4735_v0 = vand.u32 4294901760, %v29_v13 }
  0x76   :  { %739 = vmatmul.f32.gmra.mxu1 %v4125_v56  ;;  %941 = vmatpush.msra.mxu3 %v940_v17  ;;  %v4682_v56 = vand.u32 4294901760, %v22_v32 }
  0x77   :  { %1019 = vmatpush.msra.mxu0 %v4576_v63  ;;  %1095 = vmatpush.msra.mxu1 %v4549_v3  ;;  %v4690_v17 = vsub.f32 %v116_v43, %v4677_v22 }
  0x78   :  { %947 = vmatpush.msra.mxu3 %v946_v35  ;;  %1154 = vmatpush.msrb.mxu2 %v854_v11  ;;  %v4706_v36 = vsub.f32 %v22_v32, %v4682_v56  ;;  %v115_v35 = vld [vmem:[%s7411_s1 + $0x168] sm:$0xff] }
  0x79   :  { %1022 = vmatpush.msra.mxu0 %v4589_v48  ;;  %1097 = vmatpush.msra.mxu1 %v4564_v27  ;;  %v7427_v11 = vand.u32 4294901760, %v4690_v17  ;;  %v4724_v59 = vand.u32 4294901760, %v115_v35 }
  0x7a   :  { %1249 = vmatpush.msrb.mxu3 %v4345_v20  ;;  %1158 = vmatpush.msrb.mxu2 %v860_v18  ;;  %v790_v20 = vsub.f32 %v4659_v33, %v789_v8  ;;  %v1413_v18 = vsub.f32 %v4685_v23, %v7428_v49 }
  0x7b   :  { %1025 = vmatpush.msra.mxu0 %v4609_v30  ;;  %1099 = vmatpush.msra.mxu1 %v4591_v29  ;;  %v7531_v30 = vand.u32 4294901760, %v4618_v21 }
  0x7c   :  { %508 = vmatmul.f32.gmra.mxu2 %v4284_v54  ;;  %583 = vmatmul.f32.gmra.mxu3 %v279_v58  ;;  %v1419_v58 = vsub.f32 %v4690_v17, %v7427_v11  ;;  %v1414_v32 = vand.u32 4294901760, %v1413_v18  ;;  %v791_v49 = vand.u32 4294901760, %v790_v20  ;;  %v4740_v18 = vsub.f32 %v115_v35, %v4724_v59 }
  0x7d   :  { %678 = vmatmul.f32.gmra.mxu0 %v4188_v47  ;;  %1251 = vmatpush.msrb.mxu3 %v4356_v28  ;;  %v114_v28 = vld [vmem:[%s7411_s1 + $0x160] sm:$0xff] }
  0x7e   :  { %743 = vmatmul.f32.gmra.mxu1 %v4188_v47  ;;  %1028 = vmatpush.msra.mxu0 %v4618_v21  ;;  %v1420_v43 = vand.u32 4294901760, %v1419_v58  ;;  %v4732_v11 = vand.u32 4294901760, %v114_v28  ;;  %v797_v47 = vand.u32 4294901760, %v4706_v36  ;;  %v106_v21 = vld [vmem:[%s7411_s1 + $0x120] sm:$0xff] }
  0x7f   :  { %1101 = vmatpush.msra.mxu1 %v4599_v52  ;;  %1162 = vmatpush.msrb.mxu2 %v866_v15  ;;  %v1424_v15 = vand.u32 4294901760, %v4740_v18 }
  0x80   :  { %1253 = vmatpush.msrb.mxu3 %v4367_v31  ;;  %1314 = vmatpush.msrb.mxu0 %v4670_v7  ;;  %v4745_v45 = vsub.f32 %v114_v28, %v4732_v11  ;;  %v798_v26 = vsub.f32 %v4706_v36, %v797_v47 }
  0x81   :  { %1166 = vmatpush.msrb.mxu2 %v872_v40  ;;  %1415 = vmatpush.msrb.mxu1 %v1414_v32  ;;  %v36_v40 = vld [vmem:[%s7412_s0 + $0xb0] sm:$0xff]  ;;  %v1425_v9 = vsub.f32 %v4740_v18, %v1424_v15 }
  0x82   :  { %1255 = vmatpush.msrb.mxu3 %v4398_v61  ;;  %1316 = vmatpush.msrb.mxu0 %v4677_v22  ;;  %v1430_v31 = vand.u32 4294901760, %v4745_v45  ;;  %v4759_v61 = vsub.f32 %v29_v13, %v4735_v0  ;;  %v4779_v20 = vand.u32 4294901760, %v36_v40  ;;  %v112_v13 = vld [vmem:[%s7411_s1 + $0x150] sm:$0xff]  ;;  %v799_v58 = vand.u32 4294901760, %v798_v26 }
  0x83   :  { %1170 = vmatpush.msrb.mxu2 %v878_v55  ;;  %1421 = vmatpush.msrb.mxu1 %v1420_v43  ;;  %v1426_v55 = vand.u32 4294901760, %v1425_v9  ;;  %v4792_v32 = vand.u32 4294901760, %v112_v13 }
  0x84   :  { %589 = vmatmul.f32.gmra.mxu3 %v287_v62  ;;  %792 = vmatmul.f32.vlgmr.msra.gmra.mxu2 %v791_v49  ;;  %v1431_v54 = vsub.f32 %v4745_v45, %v1430_v31  ;;  %v113_v62 = vld [vmem:[%s7411_s1 + $0x158] sm:$0xff] }
  0x85   :  { %682 = vmatmul.f32.gmra.mxu0 %v4240_v25  ;;  %1257 = vmatpush.msrb.mxu3 %v4409_v16  ;;  %v4777_v49 = vand.u32 4294901760, %v113_v62  ;;  %v4800_v41 = vsub.f32 %v112_v13, %v4792_v32 }
  0x86   :  { %747 = vmatmul.f32.gmra.mxu1 %v4240_v25  ;;  %1318 = vmatpush.msrb.mxu0 %v4724_v59  ;;  %v1432_v16 = vand.u32 4294901760, %v1431_v54  ;;  %v805_v25 = vand.u32 4294901760, %v4759_v61 }
  0x87   :  { %1174 = vmatpush.msrb.mxu2 %v884_v38  ;;  %1259 = vmatpush.msrb.mxu3 %v4428_v53  ;;  %v4790_v35 = vsub.f32 %v113_v62, %v4777_v49  ;;  %v4803_v38 = vsub.f32 %v36_v40, %v4779_v20  ;;  %v7438_v51 = vand.u32 4294901760, %v4800_v41  ;;  %v4833_v40 = vand.u32 4294901760, %v43_v46 }
  0x88   :  { %1427 = vmatpush.msrb.mxu1 %v1426_v55  ;;  %1320 = vmatpush.msrb.mxu0 %v4732_v11 }
  0x89   :  { %1178 = vmatpush.msrb.mxu2 %v890_v4  ;;  %1261 = vmatpush.msrb.mxu3 %v4450_v12  ;;  %v1436_v53 = vand.u32 4294901760, %v4790_v35  ;;  %v806_v12 = vsub.f32 %v4759_v61, %v805_v25  ;;  %v1443_v28 = vsub.f32 %v4800_v41, %v7438_v51  ;;  %v813_v26 = vand.u32 4294901760, %v4803_v38 }
  0x8a   :  { %1433 = vmatpush.msrb.mxu1 %v1432_v16  ;;  %1322 = vmatpush.msrb.mxu0 %v4777_v49  ;;  %v4859_v13 = vsub.f32 %v43_v46, %v4833_v40 }
  0x8b   :  { %1182 = vmatpush.msrb.mxu2 %v896_v37  ;;  %1263 = vmatpush.msrb.mxu3 %v4460_v14  ;;  %v1437_v4 = vsub.f32 %v4790_v35, %v1436_v53  ;;  %v111_v14 = vld [vmem:[%s7411_s1 + $0x148] sm:$0xff]  ;;  %v1444_v9 = vand.u32 4294901760, %v1443_v28  ;;  %v814_v16 = vsub.f32 %v4803_v38, %v813_v26 }
  0x8c   :  { %800 = vmatmul.f32.gmra.mxu2 %v799_v58  ;;  %949 = vmatmul.f32.vlgmr.msra.gmra.mxu3 %v4645_v57  ;;  %v4830_v43 = vand.u32 4294901760, %v111_v14  ;;  %v50_v58 = vld [vmem:[%s7412_s0 + $0x120] sm:$0xff] }
  0x8d   :  { %686 = vmatmul.f32.gmra.mxu0 %v4269_v1  ;;  %1186 = vmatpush.msrb.mxu2 %v902_v39  ;;  %v1438_v37 = vand.u32 4294901760, %v1437_v4  ;;  %v807_v39 = vand.u32 4294901760, %v806_v12  ;;  %v815_v46 = vand.u32 4294901760, %v814_v16  ;;  %v821_v4 = vand.u32 4294901760, %v4859_v13 }
  0x8e   :  { %751 = vmatmul.f32.gmra.mxu1 %v4269_v1  ;;  %1324 = vmatpush.msrb.mxu0 %v4792_v32  ;;  %v110_v1 = vld [vmem:[%s7411_s1 + $0x140] sm:$0xff]  ;;  %v4843_v54 = vsub.f32 %v111_v14, %v4830_v43 }
  0x8f   :  { %1265 = vmatpush.msrb.mxu3 %v4479_v24  ;;  %1190 = vmatpush.msrb.mxu2 %v7528_v44  ;;  %v4845_v62 = vand.u32 4294901760, %v110_v1  ;;  %v7529_v24 = vand.u32 4294901760, %v4541_v34  ;;  %v822_v28 = vsub.f32 %v4859_v13, %v821_v4 }
  0x90   :  { %1439 = vmatpush.msrb.mxu1 %v1438_v37  ;;  %1326 = vmatpush.msrb.mxu0 %v4830_v43  ;;  %v7437_v60 = vand.u32 4294901760, %v4843_v54 }
  0x91   :  { %1267 = vmatpush.msrb.mxu3 %v4501_v5  ;;  %1194 = vmatpush.msrb.mxu2 %v7529_v24  ;;  %v4853_v55 = vsub.f32 %v110_v1, %v4845_v62  ;;  %v823_v24 = vand.u32 4294901760, %v822_v28 }
  0x92   :  { %1445 = vmatpush.msrb.mxu1 %v1444_v9  ;;  %1328 = vmatpush.msrb.mxu0 %v4845_v62  ;;  %v1449_v5 = vsub.f32 %v4843_v54, %v7437_v60 }
  0x93   :  { %1269 = vmatpush.msrb.mxu3 %v4514_v50  ;;  %1198 = vmatpush.msrb.mxu2 %v920_v42  ;;  %v7435_v34 = vand.u32 4294901760, %v4853_v55  ;;  %v109_v50 = vld [vmem:[%s7411_s1 + $0x138] sm:$0xff] }
  0x94   :  { %808 = vmatmul.f32.gmra.mxu2 %v807_v39  ;;  %953 = vmatmul.f32.gmra.mxu3 %v4682_v56  ;;  %v1450_v2 = vand.u32 4294901760, %v1449_v5  ;;  %v4882_v12 = vand.u32 4294901760, %v109_v50 }
  0x95   :  { %1031 = vmatmul.f32.vlgmr.msra.gmra.mxu0 %v4659_v33  ;;  %1271 = vmatpush.msrb.mxu3 %v4531_v10  ;;  %v1455_v42 = vsub.f32 %v4853_v55, %v7435_v34  ;;  %v108_v10 = vld [vmem:[%s7411_s1 + $0x130] sm:$0xff]  ;;  %v4891_v33 = vand.u32 4294901760, %v50_v58 }
  0x96   :  { %1105 = vmatmul.f32.vlgmr.msra.gmra.mxu1 %v789_v8  ;;  %1202 = vmatpush.msrb.mxu2 %v926_v19  ;;  %v4895_v14 = vsub.f32 %v109_v50, %v4882_v12  ;;  %v4897_v63 = vand.u32 4294901760, %v108_v10  ;;  %v7530_v19 = vand.u32 4294901760, %v4589_v48  ;;  %v57_v48 = vld [vmem:[%s7412_s0 + $0x158] sm:$0xff] }
  0x97   :  { %1273 = vmatpush.msrb.mxu3 %v4549_v3  ;;  %1451 = vmatpush.msrb.mxu1 %v1450_v2  ;;  %v1456_v8 = vand.u32 4294901760, %v1455_v42  ;;  %v4938_v16 = vand.u32 4294901760, %v57_v48 }
  0x98   :  { %1330 = vmatpush.msrb.mxu0 %v4882_v12  ;;  %1206 = vmatpush.msrb.mxu2 %v7530_v19  ;;  %v7433_v37 = vand.u32 4294901760, %v4895_v14  ;;  %v4905_v3 = vsub.f32 %v108_v10, %v4897_v63  ;;  %v105_v19 = vld [vmem:[%s7411_s1 + $0x118] sm:$0xff] }
  0x99   :  { %1275 = vmatpush.msrb.mxu3 %v4564_v27  ;;  %1457 = vmatpush.msrb.mxu1 %v1456_v8  ;;  %v4915_v27 = vsub.f32 %v50_v58, %v4891_v33  ;;  %v4960_v2 = vsub.f32 %v57_v48, %v4938_v16 }
  0x9a   :  { %1332 = vmatpush.msrb.mxu0 %v4897_v63  ;;  %1210 = vmatpush.msrb.mxu2 %v938_v6  ;;  %v1461_v44 = vsub.f32 %v4895_v14, %v7433_v37  ;;  %v7432_v1 = vand.u32 4294901760, %v4905_v3 }
  0x9b   :  { %1277 = vmatpush.msrb.mxu3 %v4591_v29  ;;  %v107_v29 = vld [vmem:[%s7411_s1 + $0x128] sm:$0xff] }
  0x9c   :  { %816 = vmatmul.f32.gmra.mxu2 %v815_v46  ;;  %957 = vmatmul.f32.gmra.mxu3 %v4735_v0  ;;  %v1462_v6 = vand.u32 4294901760, %v1461_v44  ;;  %v1467_v39 = vsub.f32 %v4905_v3, %v7432_v1  ;;  %v4935_v9 = vand.u32 4294901760, %v107_v29  ;;  %v64_v46 = vld [vmem:[%s7412_s0 + $0x190] sm:$0xff] }
  0x9d   :  { %1036 = vmatmul.f32.gmra.mxu0 %v4706_v36  ;;  %1214 = vmatpush.msrb.mxu2 %v7531_v30  ;;  %v7439_v36 = vand.u32 4294901760, %v4915_v27  ;;  %v4991_v30 = vld [vmem:[%s7413_s2] ss:$0 sm:$0xff] }
  0x9e   :  { %1111 = vmatmul.f32.gmra.mxu1 %v797_v47  ;;  %1279 = vmatpush.msrb.mxu3 %v4599_v52  ;;  %v1468_v47 = vand.u32 4294901760, %v1467_v39  ;;  %v4948_v5 = vsub.f32 %v107_v29, %v4935_v9  ;;  %v4950_v52 = vand.u32 4294901760, %v106_v21  ;;  %v4985_v29 = vand.u32 4294901760, %v105_v19 }
  0x9f   :  { %1541 = vmatpush.msra.mxu2 %v4685_v23  ;;  %1463 = vmatpush.msrb.mxu1 %v1462_v6  ;;  %v830_v42 = vsub.f32 %v4915_v27, %v7439_v36  ;;  %v7434_v6 = vand.u32 4294901760, %v4960_v2  ;;  %v4994_v39 = vand.u32 4294901760, %v64_v46 }
  0xa0   :  { %1629 = vmatpush.msra.mxu3 %v4670_v7  ;;  %1334 = vmatpush.msrb.mxu0 %v4935_v9  ;;  %v7431_v58 = vand.u32 4294901760, %v4948_v5  ;;  %v4957_v50 = vsub.f32 %v106_v21, %v4950_v52  ;;  %v5002_v21 = vsub.f32 %v105_v19, %v4985_v29 }
  0xa1   :  { %1544 = vmatpush.msra.mxu2 %v4690_v17  ;;  %1469 = vmatpush.msrb.mxu1 %v1468_v47  ;;  %v5025_v1 = vsub.f32 %v64_v46, %v4994_v39 }
  0xa2   :  { %1631 = vmatpush.msra.mxu3 %v4677_v22  ;;  %1336 = vmatpush.msrb.mxu0 %v4950_v52  ;;  %v1473_v10 = vsub.f32 %v4948_v5, %v7431_v58  ;;  %v7430_v8 = vand.u32 4294901760, %v4957_v50  ;;  %v838_v58 = vsub.f32 %v4960_v2, %v7434_v6 }
  0xa3   :  { %1547 = vmatpush.msra.mxu2 %v4740_v18 }
  0xa4   :  { %1633 = vmatpush.msra.mxu3 %v4724_v59  ;;  %824 = vmatmul.f32.gmra.mxu2 %v823_v24  ;;  %v1474_v48 = vand.u32 4294901760, %v1473_v10  ;;  %v1479_v44 = vsub.f32 %v4957_v50, %v7430_v8  ;;  %v103_v10 = vld [vmem:[%s7411_s1 + $0x108] sm:$0xff]  ;;  %v5019_v8 = vpop.f32.mrf.mxu0  ;;  %v839_v36 = vand.u32 4294901760, %v838_v58  ;;  %v7532_v58 = vand.u32 4294901760, %v4685_v23 }
  0xa5   :  { %961 = vmatmul.f32.gmra.mxu3 %v4779_v20  ;;  %1041 = vmatmul.f32.gmra.mxu0 %v4759_v61  ;;  %v104_v61 = vld [vmem:[%s7411_s1 + $0x110] sm:$0xff]  ;;  %v5016_v19 = vand.u32 4294901760, %v103_v10 }
  0xa6   :  { %1550 = vmatpush.msra.mxu2 %v4745_v45  ;;  %1117 = vmatmul.f32.gmra.mxu1 %v805_v25  ;;  %v267_v28 = vpop.f32.mrf.mxu2  ;;  %v831_v25 = vand.u32 4294901760, %v830_v42  ;;  %v1480_v24 = vand.u32 4294901760, %v1479_v44  ;;  %v5004_v47 = vand.u32 4294901760, %v104_v61  ;;  %v7436_v42 = vand.u32 4294901760, %v5002_v21 }
  0xa7   :  { %1635 = vmatpush.msra.mxu3 %v4732_v11  ;;  %1475 = vmatpush.msrb.mxu1 %v1474_v48  ;;  %v268_v44 = vadd.f32 %v4991_v30, %v267_v28  ;;  %v5038_v46 = vsub.f32 %v103_v10, %v5016_v19 }
  0xa8   :  { %1553 = vmatpush.msra.mxu2 %v4790_v35  ;;  %1338 = vmatpush.msrb.mxu0 %v4985_v29  ;;  %v5014_v48 = vsub.f32 %v104_v61, %v5004_v47  ;;  %v1485_v28 = vsub.f32 %v5002_v21, %v7436_v42 }
  0xa9   :  { %1637 = vmatpush.msra.mxu3 %v4777_v49  ;;  %1481 = vmatpush.msrb.mxu1 %v1480_v24  ;;  %v102_v24 = vld [vmem:[%s7411_s1 + $0x100] sm:$0xff]  ;;  %v1496_v10 = vand.u32 4294901760, %v5038_v46 }
  0xaa   :  { %1556 = vmatpush.msra.mxu2 %v4800_v41  ;;  %1340 = vmatpush.msrb.mxu0 %v5004_v47  ;;  %v7440_v61 = vand.u32 4294901760, %v5014_v48  ;;  %v5040_v37 = vand.u32 4294901760, %v102_v24  ;;  %v1486_v34 = vand.u32 4294901760, %v1485_v28 }
  0xab   :  { %1639 = vmatpush.msra.mxu3 %v4792_v32 }
  0xac   :  { %1559 = vmatpush.msra.mxu2 %v4843_v54  ;;  %v1491_v42 = vsub.f32 %v5014_v48, %v7440_v61  ;;  %1342 = vmatpush.msrb.mxu0 %v5016_v19  ;;  %v5052_v60 = vsub.f32 %v102_v24, %v5040_v37  ;;  %v1497_v61 = vsub.f32 %v5038_v46, %v1496_v10  ;;  %v7533_v24 = vand.u32 4294901760, %v4690_v17 }
  0xad   :  { %832 = vmatmul.f32.gmra.mxu2 %v831_v25  ;;  %965 = vmatmul.f32.gmra.mxu3 %v4833_v40 }
  0xae   :  { %1046 = vmatmul.f32.gmra.mxu0 %v4803_v38  ;;  %1641 = vmatpush.msra.mxu3 %v4830_v43  ;;  %v275_v25 = vpop.f32.mrf.mxu2  ;;  %v408_v6 = vpop.f32.mrf.mxu3  ;;  %v1492_v28 = vand.u32 4294901760, %v1491_v42 }
  0xaf   :  { %1123 = vmatmul.f32.gmra.mxu1 %v813_v26  ;;  %v5054_v51 = vadd.f32 %v408_v6, %v268_v44  ;;  %1562 = vmatpush.msra.mxu2 %v4853_v55  ;;  %v5058_v38 = vpop.f32.mrf.mxu1  ;;  %v845_v26 = vand.u32 4294901760, %v5025_v1  ;;  %v1502_v6 = vand.u32 4294901760, %v5052_v60  ;;  %v1498_v44 = vand.u32 4294901760, %v1497_v61 }
  0xb0   :  { %1643 = vmatpush.msra.mxu3 %v4845_v62  ;;  %1487 = vmatpush.msrb.mxu1 %v1486_v34  ;;  %v276_v42 = vadd.f32 %v4991_v30, %v275_v25 }
  0xb1   :  { %1344 = vmatpush.msrb.mxu0 %v5040_v37  ;;  %1565 = vmatpush.msra.mxu2 %v4895_v14  ;;  %v1503_v34 = vsub.f32 %v5052_v60, %v1502_v6  ;;  %v846_v23 = vsub.f32 %v5025_v1, %v845_v26 }
  0xb2   :  { %1493 = vmatpush.msrb.mxu1 %v1492_v28  ;;  %1645 = vmatpush.msra.mxu3 %v4882_v12  ;;  %v5082_v28 = vpop.f32.mrf.mxu0 }
  0xb3   :  { %1712 = vmatpush.msra.mxu0 %v7532_v58  ;;  %1568 = vmatpush.msra.mxu2 %v4905_v3  ;;  %v1504_v61 = vand.u32 4294901760, %v1503_v34  ;;  %v847_v58 = vand.u32 4294901760, %v846_v23 }
  0xb4   :  { %1499 = vmatpush.msrb.mxu1 %v1498_v44  ;;  %1647 = vmatpush.msra.mxu3 %v4897_v63  ;;  %v7539_v44 = vand.u32 4294901760, %v4895_v14 }
  0xb5   :  { %1716 = vmatpush.msra.mxu0 %v7533_v24  ;;  %840 = vmatmul.f32.gmra.mxu2 %v839_v36  ;;  %v7540_v24 = vand.u32 4294901760, %v4905_v3 }
  0xb6   :  { %969 = vmatmul.f32.gmra.mxu3 %v4891_v33  ;;  %1051 = vmatmul.f32.gmra.mxu0 %v4859_v13  ;;  %v283_v17 = vpop.f32.mrf.mxu2  ;;  %v412_v25 = vpop.f32.mrf.mxu3 }
  0xb7   :  { %1129 = vmatmul.f32.gmra.mxu1 %v821_v4  ;;  %1720 = vmatpush.msra.mxu0 %v1424_v15  ;;  %v5088_v36 = vadd.f32 %v412_v25, %v276_v42  ;;  %v284_v18 = vadd.f32 %v4991_v30, %v283_v17  ;;  %v16_v15 = vld [vmem:[%s7412_s0 + $0x10] sm:$0xff]  ;;  %v244_v25 = vadd.f32 %v4991_v30, %v5082_v28 }
  0xb8   :  { %1505 = vmatpush.msrb.mxu1 %v1504_v61  ;;  %1571 = vmatpush.msra.mxu2 %v4948_v5  ;;  %v5123_v4 = vand.u32 4294901760, %v16_v15 }
  0xb9   :  { %1724 = vmatpush.msra.mxu0 %v1430_v31  ;;  %1649 = vmatpush.msra.mxu3 %v4935_v9  ;;  %v7535_v31 = vand.u32 4294901760, %v4800_v41  ;;  %v7537_v41 = vand.u32 4294901760, %v4853_v55 }
  0xba   :  { %1807 = vmatpush.msra.mxu1 %v4670_v7  ;;  %v5096_v13 = vpop.f32.mrf.mxu1  ;;  %1574 = vmatpush.msra.mxu2 %v4957_v50  ;;  %v7534_v7 = vand.u32 4294901760, %v4915_v27 }
  0xbb   :  { %1728 = vmatpush.msra.mxu0 %v1436_v53  ;;  %1651 = vmatpush.msra.mxu3 %v4950_v52  ;;  %v397_v28 = vadd.f32 %v5096_v13, %v244_v25  ;;  %v133_v25 = vld [vmem:[%s7411_s1 + $0x1f8] sm:$0xff] }
  0xbc   :  { %1809 = vmatpush.msra.mxu1 %v4677_v22  ;;  %1577 = vmatpush.msra.mxu2 %v5002_v21 }
  0xbd   :  { %848 = vmatmul.f32.gmra.mxu2 %v847_v58  ;;  %1732 = vmatpush.msra.mxu0 %v7535_v31 }
  0xbe   :  { %973 = vmatmul.f32.gmra.mxu3 %v4938_v16  ;;  %1056 = vmatmul.f32.gmra.mxu0 %v4915_v27  ;;  %v291_v22 = vpop.f32.mrf.mxu2  ;;  %v416_v45 = vpop.f32.mrf.mxu3 }
  0xbf   :  { %1811 = vmatpush.msra.mxu1 %v4724_v59  ;;  %v5114_v35 = vadd.f32 %v416_v45, %v284_v18  ;;  %v5116_v53 = vpop.f32.mrf.mxu0  ;;  %v7536_v59 = vand.u32 4294901760, %v4843_v54  ;;  %1653 = vmatpush.msra.mxu3 %v4985_v29  ;;  %v7538_v54 = vand.u32 4294901760, %v4960_v2 }
  0xc0   :  { %1135 = vmatmul.f32.gmra.mxu1 %v7534_v7  ;;  %1580 = vmatpush.msra.mxu2 %v5014_v48  ;;  %v7544_v7 = vand.u32 4294901760, %v5014_v48 }
  0xc1   :  { %1813 = vmatpush.msra.mxu1 %v4732_v11  ;;  %1736 = vmatpush.msra.mxu0 %v7536_v59  ;;  %v292_v11 = vadd.f32 %v4991_v30, %v291_v22  ;;  %v252_v22 = vadd.f32 %v4991_v30, %v5116_v53  ;;  %v44_v53 = vld [vmem:[%s7412_s0 + $0xf0] sm:$0xff] }
  0xc2   :  { %1655 = vmatpush.msra.mxu3 %v5004_v47  ;;  %1583 = vmatpush.msra.mxu2 %v5038_v46 }
  0xc3   :  { %1815 = vmatpush.msra.mxu1 %v4777_v49  ;;  %1740 = vmatpush.msra.mxu0 %v7537_v41  ;;  %v5131_v27 = vpop.f32.mrf.mxu1  ;;  %v5139_v49 = vsub.f32 %v16_v15, %v5123_v4 }
  0xc4   :  { %1586 = vmatpush.msra.mxu2 %v5052_v60  ;;  %1657 = vmatpush.msra.mxu3 %v5016_v19 }
  0xc5   :  { %1817 = vmatpush.msra.mxu1 %v4792_v32  ;;  %1216 = vmatmul.f32.vlgmr.msrb.gmra.mxu2 %v4645_v57  ;;  %v23_v32 = vld [vmem:[%s7412_s0 + $0x48] sm:$0xff]  ;;  %v1347_v14 = vand.u32 4294901760, %v5139_v49 }
  0xc6   :  { %977 = vmatmul.f32.gmra.mxu3 %v4994_v39  ;;  %1061 = vmatmul.f32.gmra.mxu0 %v4960_v2  ;;  %v420_v55 = vpop.f32.mrf.mxu3  ;;  %v5161_v23 = vand.u32 4294901760, %v23_v32 }
  0xc7   :  { %1819 = vmatpush.msra.mxu1 %v4830_v43  ;;  %1744 = vmatpush.msra.mxu0 %v7539_v44  ;;  %v5149_v34 = vadd.f32 %v420_v55, %v292_v11  ;;  %v474_v42 = vpop.f32.mrf.mxu2  ;;  %v236_v43 = vadd.f32 %v4991_v30, %v5019_v8  ;;  %v5155_v2 = vpop.f32.mrf.mxu0 }
  0xc8   :  { %1141 = vmatmul.f32.gmra.mxu1 %v7538_v54  ;;  %1659 = vmatpush.msra.mxu3 %v5040_v37 }
  0xc9   :  { %1821 = vmatpush.msra.mxu1 %v4845_v62  ;;  %1748 = vmatpush.msra.mxu0 %v7540_v24  ;;  %v7541_v62 = vand.u32 4294901760, %v4948_v5  ;;  %v393_v3 = vadd.f32 %v5058_v38, %v236_v43  ;;  %v5178_v5 = vsub.f32 %v23_v32, %v5161_v23  ;;  %v5254_v32 = vand.u32 4294901760, %v44_v53 }
  0xcb   :  { %1823 = vmatpush.msra.mxu1 %v4882_v12  ;;  %1752 = vmatpush.msra.mxu0 %v7541_v62  ;;  %v5167_v61 = vpop.f32.mrf.mxu1  ;;  %v1348_v12 = vsub.f32 %v5139_v49, %v1347_v14  ;;  %v475_v8 = vadd.f32 %v474_v42, %v393_v3  ;;  %v51_v62 = vld [vmem:[%s7412_s0 + $0x128] sm:$0xff] }
  0xcd   :  { %1825 = vmatpush.msra.mxu1 %v4897_v63  ;;  %1220 = vmatmul.f32.gmra.mxu2 %v4682_v56  ;;  %v30_v63 = vld [vmem:[%s7412_s0 + $0x80] sm:$0xff] }
  0xce   :  { %1281 = vmatmul.f32.vlgmr.msrb.gmra.mxu3 %v4645_v57  ;;  %1066 = vmatmul.f32.gmra.mxu0 %v5025_v1  ;;  %v7542_v57 = vand.u32 4294901760, %v4957_v50  ;;  %v1349_v1 = vand.u32 4294901760, %v1348_v12  ;;  %v5196_v18 = vand.u32 4294901760, %v30_v63 }
  0xcf   :  { %1827 = vmatpush.msra.mxu1 %v4935_v9  ;;  %v479_v38 = vpop.f32.mrf.mxu2  ;;  %v548_v17 = vpop.f32.mrf.mxu3  ;;  %v7543_v9 = vand.u32 4294901760, %v5002_v21 }
  0xd0   :  { %1147 = vmatmul.f32.gmra.mxu1 %v845_v26  ;;  %1756 = vmatpush.msra.mxu0 %v7542_v57  ;;  %v5191_v58 = vadd.f32 %v548_v17, %v475_v8  ;;  %v7453_v26 = vand.u32 4294901760, %v5178_v5  ;;  %v5213_v21 = vsub.f32 %v30_v63, %v5196_v18  ;;  %v480_v48 = vadd.f32 %v479_v38, %v397_v28  ;;  %v132_v28 = vld [vmem:[%s7411_s1 + $0x1f0] sm:$0xff] }
  0xd1   :  { %1829 = vmatpush.msra.mxu1 %v4950_v52  ;;  %v5277_v57 = vand.u32 4294901760, %v51_v62 }
  0xd2   :  { %1760 = vmatpush.msra.mxu0 %v7543_v9  ;;  %v5199_v50 = vpop.f32.mrf.mxu0  ;;  %v7450_v15 = vand.u32 4294901760, %v5213_v21 }
  0xd3   :  { %1831 = vmatpush.msra.mxu1 %v4985_v29  ;;  %v5203_v52 = vpop.f32.mrf.mxu1  ;;  %v1356_v29 = vsub.f32 %v5178_v5, %v7453_v26 }
  0xd4   :  { %1764 = vmatpush.msra.mxu0 %v7544_v7  ;;  %v1364_v60 = vsub.f32 %v5213_v21, %v7450_v15  ;;  %v58_v7 = vld [vmem:[%s7412_s0 + $0x160] sm:$0xff] }
  0xd5   :  { %1833 = vmatpush.msra.mxu1 %v5004_v47  ;;  %1224 = vmatmul.f32.gmra.mxu2 %v4735_v0  ;;  %v37_v47 = vld [vmem:[%s7412_s0 + $0xb8] sm:$0xff] }
  0xd6   :  { %1285 = vmatmul.f32.gmra.mxu3 %v4682_v56  ;;  %1350 = vmatmul.f32.vlgmr.msrb.gmra.mxu0 %v1349_v1  ;;  %v5230_v31 = vand.u32 4294901760, %v37_v47  ;;  %v1365_v54 = vand.u32 4294901760, %v1364_v60  ;;  %v5294_v1 = vsub.f32 %v51_v62, %v5277_v57  ;;  %v5316_v60 = vand.u32 4294901760, %v58_v7 }
  0xd7   :  { %1835 = vmatpush.msra.mxu1 %v5016_v19  ;;  %1768 = vmatpush.msra.mxu0 %v1496_v10  ;;  %v484_v56 = vpop.f32.mrf.mxu2  ;;  %v554_v13 = vpop.f32.mrf.mxu3  ;;  %v1357_v19 = vand.u32 4294901760, %v1356_v29  ;;  %v401_v10 = vadd.f32 %v5131_v27, %v252_v22 }
  0xd8   :  { %1507 = vmatmul.f32.vlgmr.msrb.gmra.mxu1 %v5123_v4  ;;  %v5225_v45 = vadd.f32 %v554_v13, %v480_v48  ;;  %7545 = vst [vmem:[#allocation2_spill] sm:$0xff] %v5316_v60 }
  0xd9   :  { %1837 = vmatpush.msra.mxu1 %v5040_v37  ;;  %1772 = vmatpush.msra.mxu0 %v1502_v6  ;;  %v5243_v37 = vsub.f32 %v37_v47, %v5230_v31  ;;  %v485_v6 = vadd.f32 %v484_v56, %v401_v10  ;;  %v5307_v47 = vand.u32 4294901760, %v132_v28  ;;  %v7441_v10 = vand.u32 4294901760, %v5294_v1 }
  0xda   :  { %v5232_v59 = vpop.f32.mrf.mxu0 }
  0xdb   :  { %v5234_v46 = vpop.f32.mrf.mxu1  ;;  %v7448_v55 = vand.u32 4294901760, %v5243_v37 }
  0xdd   :  { %1228 = vmatmul.f32.gmra.mxu2 %v4779_v20 }
  0xde   :  { %1289 = vmatmul.f32.gmra.mxu3 %v4735_v0  ;;  %1358 = vmatmul.f32.gmra.mxu0 %v1357_v19  ;;  %v260_v0 = vadd.f32 %v4991_v30, %v5155_v2  ;;  %v1372_v30 = vsub.f32 %v5243_v37, %v7448_v55  ;;  %v5267_v2 = vsub.f32 %v44_v53, %v5254_v32 }
  0xdf   :  { %v489_v41 = vpop.f32.mrf.mxu2  ;;  %v560_v11 = vpop.f32.mrf.mxu3 }
  0xe0   :  { %1511 = vmatmul.f32.gmra.mxu1 %v5161_v23  ;;  %v5251_v27 = vadd.f32 %v560_v11, %v485_v6  ;;  %v405_v43 = vadd.f32 %v5167_v61, %v260_v0  ;;  %v1373_v8 = vand.u32 4294901760, %v1372_v30  ;;  %v7442_v63 = vand.u32 4294901760, %v5267_v2  ;;  %v131_v0 = vld [vmem:[%s7411_s1 + $0x1e8] sm:$0xff] }
  0xe1   :  { %v5320_v6 = vsub.f32 %v132_v28, %v5307_v47  ;;  %v1388_v30 = vsub.f32 %v5294_v1, %v7441_v10 }
  0xe2   :  { %v5256_v44 = vpop.f32.mrf.mxu0  ;;  %v490_v24 = vadd.f32 %v489_v41, %v405_v43  ;;  %v1380_v9 = vsub.f32 %v5267_v2, %v7442_v63  ;;  %v5337_v43 = vand.u32 4294901760, %v131_v0 }
  0xe3   :  { %v5258_v42 = vpop.f32.mrf.mxu1  ;;  %v7446_v11 = vand.u32 4294901760, %v5320_v6 }
  0xe4   :  { %v1381_v19 = vand.u32 4294901760, %v1380_v9 }
  0xe5   :  { %1232 = vmatmul.f32.gmra.mxu2 %v4833_v40  ;;  %v1977_v62 = vsub.f32 %v5320_v6, %v7446_v11 }
  0xe6   :  { %1293 = vmatmul.f32.gmra.mxu3 %v4779_v20  ;;  %1366 = vmatmul.f32.gmra.mxu0 %v1365_v54 }
  0xe7   :  { %v494_v61 = vpop.f32.mrf.mxu2  ;;  %v566_v3 = vpop.f32.mrf.mxu3 }
  0xe8   :  { %1515 = vmatmul.f32.gmra.mxu1 %v5196_v18  ;;  %v495_v12 = vadd.f32 %v494_v61, %v5054_v51  ;;  %v5274_v20 = vadd.f32 %v566_v3, %v490_v24  ;;  %v5288_v51 = vand.u32 4294901760, %v133_v25  ;;  %v5343_v24 = vsub.f32 %v58_v7, %v5316_v60  ;;  %v130_v3 = vld [vmem:[%s7411_s1 + $0x1e0] sm:$0xff] }
  0xe9   :  { %v5353_v61 = vsub.f32 %v131_v0, %v5337_v43  ;;  %v5359_v9 = vand.u32 4294901760, %v130_v3 }
  0xea   :  { %v5279_v38 = vpop.f32.mrf.mxu0  ;;  %1872 = vmatpush.msrb.mxu2 %v5288_v51  ;;  %2187 = vmatpush.msrb.mxu1 %v5288_v51 }
  0xeb   :  { %v5281_v17 = vpop.f32.mrf.mxu1  ;;  %v5372_v0 = vsub.f32 %v130_v3, %v5359_v9 }
  0xec   :  { %1874 = vmatpush.msrb.mxu2 %v5307_v47  ;;  %2189 = vmatpush.msrb.mxu1 %v5307_v47 }
  0xed   :  { %1236 = vmatmul.f32.gmra.mxu2 %v4891_v33 }
  0xee   :  { %1297 = vmatmul.f32.gmra.mxu3 %v4833_v40  ;;  %1374 = vmatmul.f32.gmra.mxu0 %v1373_v8  ;;  %v5302_v40 = vsub.f32 %v133_v25, %v5288_v51  ;;  %v1978_v25 = vand.u32 4294901760, %v1977_v62  ;;  %v129_v62 = vld [vmem:[%s7411_s1 + $0x1d8] sm:$0xff] }
  0xef   :  { %v499_v29 = vpop.f32.mrf.mxu2  ;;  %v572_v48 = vpop.f32.mrf.mxu3  ;;  %1876 = vmatpush.msrb.mxu2 %v5337_v43  ;;  %2191 = vmatpush.msrb.mxu1 %v5337_v43 }
  0xf0   :  { %1519 = vmatmul.f32.gmra.mxu1 %v5230_v31  ;;  %v500_v56 = vadd.f32 %v499_v29, %v5088_v36  ;;  %v5311_v13 = vadd.f32 %v572_v48, %v495_v12  ;;  %v7447_v22 = vand.u32 4294901760, %v5302_v40  ;;  %2099 = vmatpush.msrb.mxu0 %v5302_v40  ;;  %v7445_v29 = vand.u32 4294901760, %v5353_v61 }
  0xf1   :  { %v1389_v48 = vand.u32 4294901760, %v1388_v30  ;;  %1878 = vmatpush.msrb.mxu2 %v5359_v9  ;;  %2193 = vmatpush.msrb.mxu1 %v5359_v9  ;;  %v7444_v30 = vand.u32 4294901760, %v5372_v0 }
  0xf2   :  { %v5323_v53 = vpop.f32.mrf.mxu0  ;;  %v1971_v36 = vsub.f32 %v5302_v40, %v7447_v22  ;;  %2102 = vmatpush.msrb.mxu0 %v5320_v6  ;;  %v660_v22 = vadd.f32 %v5199_v50, %v5191_v58 }
  0xf3   :  { %v5328_v41 = vpop.f32.mrf.mxu1  ;;  %v1989_v10 = vsub.f32 %v5372_v0, %v7444_v30 }
  0xf4   :  { %v1972_v54 = vand.u32 4294901760, %v1971_v36  ;;  %2105 = vmatpush.msrb.mxu0 %v5353_v61 }
  0xf5   :  { %1240 = vmatmul.f32.gmra.mxu2 %v4938_v16 }
  0xf6   :  { %1301 = vmatmul.f32.gmra.mxu3 %v4891_v33  ;;  %1382 = vmatmul.f32.gmra.mxu0 %v1381_v19  ;;  %v65_v33 = vld [vmem:[%s7412_s0 + $0x198] sm:$0xff]  ;;  %v7443_v19 = vand.u32 4294901760, %v5343_v24 }
  0xf7   :  { %1973 = vmatpush.msrb.mxu3 %v1972_v54  ;;  %v504_v12 = vpop.f32.mrf.mxu2  ;;  %v578_v8 = vpop.f32.mrf.mxu3  ;;  %v5368_v36 = vand.u32 4294901760, %v65_v33  ;;  %2108 = vmatpush.msrb.mxu0 %v5372_v0 }
  0xf8   :  { %1523 = vmatmul.f32.gmra.mxu1 %v5254_v32  ;;  %v505_v7 = vadd.f32 %v504_v12, %v5114_v35  ;;  %v5363_v28 = vadd.f32 %v578_v8, %v500_v56  ;;  %v1983_v35 = vsub.f32 %v5353_v61, %v7445_v29  ;;  %v5389_v12 = vand.u32 4294901760, %v129_v62 }
  0xf9   :  { %7546 = vst [vmem:[#allocation3_spill] sm:$0xff] %v5368_v36  ;;  %1979 = vmatpush.msrb.mxu3 %v1978_v25  ;;  %v1396_v8 = vsub.f32 %v5343_v24, %v7443_v19  ;;  %v5395_v25 = vsub.f32 %v65_v33, %v5368_v36  ;;  %v1990_v19 = vand.u32 4294901760, %v1989_v10 }
  0xfa   :  { %v5374_v54 = vpop.f32.mrf.mxu0  ;;  %v1984_v3 = vand.u32 4294901760, %v1983_v35  ;;  %1880 = vmatpush.msrb.mxu2 %v5389_v12  ;;  %2195 = vmatpush.msrb.mxu1 %v5389_v12 }
  0xfb   :  { %v5380_v56 = vpop.f32.mrf.mxu1  ;;  %v7451_v11 = vand.u32 4294901760, %v5395_v25 }
  0xfc   :  { %1985 = vmatpush.msrb.mxu3 %v1984_v3  ;;  %v1397_v3 = vand.u32 4294901760, %v1396_v8 }
  0xfd   :  { %1244 = vmatmul.f32.gmra.mxu2 %v4994_v39  ;;  %v1404_v8 = vsub.f32 %v5395_v25, %v7451_v11 }
  0xfe   :  { %1305 = vmatmul.f32.gmra.mxu3 %v4938_v16  ;;  %1390 = vmatmul.f32.gmra.mxu0 %v1389_v48  ;;  %v5402_v16 = vsub.f32 %v129_v62, %v5389_v12  ;;  %v128_v48 = vld [vmem:[%s7411_s1 + $0x1d0] sm:$0xff] }
  0xff   :  { %v509_v35 = vpop.f32.mrf.mxu2  ;;  %v584_v63 = vpop.f32.mrf.mxu3  ;;  %v5408_v33 = vand.u32 4294901760, %v128_v48  ;;  %1991 = vmatpush.msrb.mxu3 %v1990_v19  ;;  %v127_v19 = vld [vmem:[%s7411_s1 + $0x1c8] sm:$0xff] }
 0x100   :  { %1527 = vmatmul.f32.gmra.mxu1 %v5277_v57  ;;  %v510_v30 = vadd.f32 %v509_v35, %v5149_v34  ;;  %v5412_v29 = vadd.f32 %v584_v63, %v505_v7  ;;  %v7449_v62 = vand.u32 4294901760, %v5402_v16  ;;  %2111 = vmatpush.msrb.mxu0 %v5402_v16  ;;  %v5438_v50 = vand.u32 4294901760, %v127_v19 }
 0x101   :  { %1882 = vmatpush.msrb.mxu2 %v5408_v33  ;;  %v5419_v10 = vsub.f32 %v128_v48, %v5408_v33  ;;  %2197 = vmatpush.msrb.mxu1 %v5408_v33  ;;  %v725_v35 = vadd.f32 %v5203_v52, %v660_v22 }
 0x102   :  { %v5423_v55 = vpop.f32.mrf.mxu0  ;;  %v1995_v34 = vsub.f32 %v5402_v16, %v7449_v62 }
 0x103   :  { %v5429_v63 = vpop.f32.mrf.mxu1  ;;  %v7452_v7 = vand.u32 4294901760, %v5419_v10  ;;  %2114 = vmatpush.msrb.mxu0 %v5419_v10  ;;  %1884 = vmatpush.msrb.mxu2 %v5438_v50 }
 0x104   :  { %v1996_v58 = vand.u32 4294901760, %v1995_v34  ;;  %2199 = vmatpush.msrb.mxu1 %v5438_v50 }
 0x105   :  { %1589 = vmatmul.f32.vlgmr.msra.gmra.mxu2 %v5139_v49  ;;  %v2001_v48 = vsub.f32 %v5419_v10, %v7452_v7  ;;  %v124_v49 = vld [vmem:[%s7411_s1 + $0x1b0] sm:$0xff] }
 0x106   :  { %1309 = vmatmul.f32.gmra.mxu3 %v4994_v39  ;;  %1398 = vmatmul.f32.gmra.mxu0 %v1397_v3  ;;  %v5449_v39 = vsub.f32 %v127_v19, %v5438_v50  ;;  %v126_v3 = vld [vmem:[%s7411_s1 + $0x1c0] sm:$0xff]  ;;  %v1405_v19 = vand.u32 4294901760, %v1404_v8  ;;  %v125_v8 = vld [vmem:[%s7411_s1 + $0x1b8] sm:$0xff] }
 0x107   :  { %1997 = vmatpush.msrb.mxu3 %v1996_v58  ;;  %v590_v34 = vpop.f32.mrf.mxu3  ;;  %v793_v62 = vpop.f32.mrf.mxu2  ;;  %v2002_v15 = vand.u32 4294901760, %v2001_v48  ;;  %v5455_v11 = vand.u32 4294901760, %v126_v3  ;;  %v664_v48 = vadd.f32 %v5232_v59, %v5225_v45  ;;  %v5484_v59 = vand.u32 4294901760, %v125_v8 }
 0x108   :  { %1531 = vmatmul.f32.gmra.mxu1 %v5316_v60  ;;  %v5458_v52 = vadd.f32 %v590_v34, %v510_v30  ;;  %v794_v22 = vadd.f32 %v793_v62, %v725_v35  ;;  %v7454_v58 = vand.u32 4294901760, %v5449_v39  ;;  %2117 = vmatpush.msrb.mxu0 %v5449_v39 }
 0x109   :  { %2003 = vmatpush.msrb.mxu3 %v2002_v15  ;;  %1886 = vmatpush.msrb.mxu2 %v5455_v11  ;;  %v5464_v7 = vsub.f32 %v126_v3, %v5455_v11  ;;  %v729_v3 = vadd.f32 %v5234_v46, %v664_v48  ;;  %v5492_v34 = vsub.f32 %v125_v8, %v5484_v59 }
 0x10a   :  { %v5468_v26 = vpop.f32.mrf.mxu0  ;;  %v2007_v30 = vsub.f32 %v5449_v39, %v7454_v58  ;;  %2201 = vmatpush.msrb.mxu1 %v5455_v11 }
 0x10b   :  { %v5474_v62 = vpop.f32.mrf.mxu1  ;;  %v7455_v15 = vand.u32 4294901760, %v5464_v7  ;;  %2120 = vmatpush.msrb.mxu0 %v5464_v7  ;;  %1888 = vmatpush.msrb.mxu2 %v5484_v59 }
 0x10c   :  { %v2008_v45 = vand.u32 4294901760, %v2007_v30  ;;  %2203 = vmatpush.msrb.mxu1 %v5484_v59 }
 0x10d   :  { %1594 = vmatmul.f32.gmra.mxu2 %v5178_v5  ;;  %v2013_v35 = vsub.f32 %v5464_v7, %v7455_v15  ;;  %2123 = vmatpush.msrb.mxu0 %v5492_v34 }
 0x10e   :  { %1663 = vmatmul.f32.vlgmr.msra.gmra.mxu3 %v1347_v14  ;;  %1406 = vmatmul.f32.gmra.mxu0 %v1405_v19  ;;  %v5498_v19 = vand.u32 4294901760, %v124_v49 }
 0x10f   :  { %2009 = vmatpush.msrb.mxu3 %v2008_v45  ;;  %v801_v14 = vpop.f32.mrf.mxu2  ;;  %v950_v30 = vpop.f32.mrf.mxu3  ;;  %v2014_v58 = vand.u32 4294901760, %v2013_v35  ;;  %v7456_v45 = vand.u32 4294901760, %v5492_v34  ;;  %v668_v35 = vadd.f32 %v5256_v44, %v5251_v27  ;;  %v7548_v27 = vand.u32 4294901760, %v5178_v5  ;;  %v122_v5 = vld [vmem:[%s7411_s1 + $0x1a0] sm:$0xff] }
 0x110   :  { %1535 = vmatmul.f32.gmra.mxu1 %v5368_v36  ;;  %v802_v46 = vadd.f32 %v801_v14, %v729_v3  ;;  %v5501_v48 = vadd.f32 %v950_v30, %v794_v22  ;;  %1890 = vmatpush.msrb.mxu2 %v5498_v19  ;;  %v5507_v8 = vsub.f32 %v124_v49, %v5498_v19  ;;  %v123_v49 = vld [vmem:[%s7411_s1 + $0x1a8] sm:$0xff]  ;;  %v5542_v60 = vand.u32 4294901760, %v122_v5 }
 0x111   :  { %2015 = vmatpush.msrb.mxu3 %v2014_v58  ;;  %v2019_v22 = vsub.f32 %v5492_v34, %v7456_v45  ;;  %2205 = vmatpush.msrb.mxu1 %v5498_v19  ;;  %v5527_v14 = vand.u32 4294901760, %v123_v49  ;;  %v733_v45 = vadd.f32 %v5258_v42, %v668_v35 }
 0x112   :  { %v5511_v15 = vpop.f32.mrf.mxu0  ;;  %v7462_v58 = vand.u32 4294901760, %v5507_v8  ;;  %2126 = vmatpush.msrb.mxu0 %v5507_v8 }
 0x113   :  { %v5517_v3 = vpop.f32.mrf.mxu1  ;;  %v2020_v44 = vand.u32 4294901760, %v2019_v22  ;;  %v5536_v36 = vsub.f32 %v123_v49, %v5527_v14  ;;  %1892 = vmatpush.msrb.mxu2 %v5527_v14  ;;  %2207 = vmatpush.msrb.mxu1 %v5527_v14  ;;  %v5551_v49 = vsub.f32 %v122_v5, %v5542_v60  ;;  %v121_v5 = vld [vmem:[%s7411_s1 + $0x198] sm:$0xff] }
 0x114   :  { %7547 = vst [vmem:[#allocation4_spill] sm:$0xff] %v5517_v3  ;;  %v2025_v30 = vsub.f32 %v5507_v8, %v7462_v58 }
 0x115   :  { %1599 = vmatmul.f32.gmra.mxu2 %v5213_v21  ;;  %2021 = vmatpush.msrb.mxu3 %v2020_v44  ;;  %v672_v44 = vadd.f32 %v5279_v38, %v5274_v20  ;;  %v7552_v20 = vand.u32 4294901760, %v5213_v21 }
 0x116   :  { %1669 = vmatmul.f32.gmra.mxu3 %v7548_v27  ;;  %1774 = vmatmul.f32.vlgmr.msra.gmra.mxu0 %v5123_v4  ;;  %v2026_v3 = vand.u32 4294901760, %v2025_v30 }
 0x117   :  { %v809_v22 = vpop.f32.mrf.mxu2  ;;  %v954_v27 = vpop.f32.mrf.mxu3  ;;  %2129 = vmatpush.msrb.mxu0 %v5536_v36  ;;  %1894 = vmatpush.msrb.mxu2 %v5542_v60  ;;  %v737_v58 = vadd.f32 %v5281_v17, %v672_v44 }
 0x118   :  { %1839 = vmatmul.f32.vlgmr.msra.gmra.mxu1 %v5123_v4  ;;  %v810_v42 = vadd.f32 %v809_v22, %v733_v45  ;;  %v5545_v35 = vadd.f32 %v954_v27, %v802_v46  ;;  %v7461_v4 = vand.u32 4294901760, %v5536_v36  ;;  %2027 = vmatpush.msrb.mxu3 %v2026_v3  ;;  %v7463_v3 = vand.u32 4294901760, %v5551_v49 }
 0x119   :  { %2209 = vmatpush.msrb.mxu1 %v5542_v60  ;;  %2132 = vmatpush.msrb.mxu0 %v5551_v49  ;;  %v5571_v22 = vand.u32 4294901760, %v121_v5 }
 0x11a   :  { %7549 = vst [vmem:[#allocation5_spill] sm:$0xff] %v5545_v35  ;;  %v5555_v30 = vpop.f32.mrf.mxu0  ;;  %v2031_v46 = vsub.f32 %v5536_v36, %v7461_v4  ;;  %v2037_v27 = vsub.f32 %v5551_v49, %v7463_v3  ;;  %v120_v4 = vld [vmem:[%s7411_s1 + $0x190] sm:$0xff]  ;;  %v119_v3 = vld [vmem:[%s7411_s1 + $0x188] sm:$0xff] }
 0x11b   :  { %7550 = vst [vmem:[#allocation6_spill] sm:$0xff] %v5555_v30  ;;  %v5561_v45 = vpop.f32.mrf.mxu1  ;;  %v5583_v21 = vsub.f32 %v121_v5, %v5571_v22  ;;  %1896 = vmatpush.msrb.mxu2 %v5571_v22  ;;  %2211 = vmatpush.msrb.mxu1 %v5571_v22 }
 0x11c   :  { %7551 = vst [vmem:[#allocation7_spill] sm:$0xff] %v5561_v45  ;;  %v2032_v38 = vand.u32 4294901760, %v2031_v46  ;;  %v5585_v46 = vand.u32 4294901760, %v120_v4  ;;  %v2038_v30 = vand.u32 4294901760, %v2037_v27  ;;  %v118_v27 = vld [vmem:[%s7411_s1 + $0x180] sm:$0xff] }
 0x11d   :  { %1604 = vmatmul.f32.gmra.mxu2 %v5243_v37  ;;  %2135 = vmatpush.msrb.mxu0 %v5583_v21 }
 0x11e   :  { %1675 = vmatmul.f32.gmra.mxu3 %v7552_v20  ;;  %1778 = vmatmul.f32.gmra.mxu0 %v5161_v23  ;;  %7553 = vst [vmem:[#allocation8_spill] sm:$0xff] %v5585_v46  ;;  %v5596_v5 = vsub.f32 %v120_v4, %v5585_v46 }
 0x11f   :  { %2033 = vmatpush.msrb.mxu3 %v2032_v38  ;;  %v817_v20 = vpop.f32.mrf.mxu2  ;;  %v958_v45 = vpop.f32.mrf.mxu3  ;;  %1898 = vmatpush.msrb.mxu2 %v5585_v46  ;;  %v5600_v38 = vand.u32 4294901760, %v119_v3 }
 0x120   :  { %1843 = vmatmul.f32.gmra.mxu1 %v5161_v23  ;;  %v818_v17 = vadd.f32 %v817_v20, %v737_v58  ;;  %v5592_v44 = vadd.f32 %v958_v45, %v810_v42  ;;  %v7464_v23 = vand.u32 4294901760, %v5583_v21  ;;  %7555 = vst [vmem:[#allocation10_spill] sm:$0xff] %v5596_v5  ;;  %v676_v58 = vadd.f32 %v5323_v53, %v5311_v13 }
 0x121   :  { %2039 = vmatpush.msrb.mxu3 %v2038_v30  ;;  %v7466_v45 = vand.u32 4294901760, %v5596_v5  ;;  %v5613_v30 = vand.u32 4294901760, %v118_v27  ;;  %2138 = vmatpush.msrb.mxu0 %v5596_v5  ;;  %v5621_v13 = vsub.f32 %v119_v3, %v5600_v38  ;;  %v7558_v53 = vand.u32 4294901760, %v5243_v37 }
 0x122   :  { %7554 = vst [vmem:[#allocation9_spill] sm:$0xff] %v5592_v44  ;;  %v5607_v42 = vpop.f32.mrf.mxu0  ;;  %v2043_v4 = vsub.f32 %v5583_v21, %v7464_v23  ;;  %2213 = vmatpush.msrb.mxu1 %v5585_v46  ;;  %1900 = vmatpush.msrb.mxu2 %v5600_v38 }
 0x123   :  { %7556 = vst [vmem:[#allocation11_spill] sm:$0xff] %v5607_v42  ;;  %v5617_v20 = vpop.f32.mrf.mxu1  ;;  %v2049_v42 = vsub.f32 %v5596_v5, %v7466_v45  ;;  %v5630_v44 = vsub.f32 %v118_v27, %v5613_v30  ;;  %v2054_v3 = vand.u32 4294901760, %v5621_v13  ;;  %v7559_v45 = vand.u32 4294901760, %v5302_v40  ;;  %2141 = vmatpush.msrb.mxu0 %v5621_v13 }
 0x124   :  { %7557 = vst [vmem:[#allocation12_spill] sm:$0xff] %v5617_v20  ;;  %v2044_v23 = vand.u32 4294901760, %v2043_v4  ;;  %1902 = vmatpush.msrb.mxu2 %v5613_v30  ;;  %v741_v20 = vadd.f32 %v5328_v41, %v676_v58  ;;  %2215 = vmatpush.msrb.mxu1 %v5600_v38  ;;  %v680_v40 = vadd.f32 %v5374_v54, %v5363_v28  ;;  %v17_v28 = vld [vmem:[%s7412_s0 + $0x18] sm:$0xff] }
 0x125   :  { %1609 = vmatmul.f32.gmra.mxu2 %v5267_v2  ;;  %v2050_v37 = vand.u32 4294901760, %v2049_v42  ;;  %v2060_v4 = vand.u32 4294901760, %v5630_v44  ;;  %v2055_v27 = vsub.f32 %v5621_v13, %v2054_v3  ;;  %2144 = vmatpush.msrb.mxu0 %v5630_v44  ;;  %v7561_v42 = vand.u32 4294901760, %v5353_v61 }
 0x126   :  { %1681 = vmatmul.f32.gmra.mxu3 %v7558_v53  ;;  %1782 = vmatmul.f32.gmra.mxu0 %v5196_v18  ;;  %v745_v54 = vadd.f32 %v5380_v56, %v680_v40 }
 0x127   :  { %2045 = vmatpush.msrb.mxu3 %v2044_v23  ;;  %v825_v53 = vpop.f32.mrf.mxu2  ;;  %2270 = vmatpush.msra.mxu2 %v7559_v45  ;;  %v2056_v41 = vand.u32 4294901760, %v2055_v27  ;;  %v7560_v23 = vand.u32 4294901760, %v5320_v6  ;;  %v7562_v6 = vand.u32 4294901760, %v5267_v2  ;;  %v7563_v2 = vand.u32 4294901760, %v5372_v0 }
 0x128   :  { %1847 = vmatmul.f32.gmra.mxu1 %v5196_v18  ;;  %v962_v46 = vpop.f32.mrf.mxu3  ;;  %v826_v5 = vadd.f32 %v825_v53, %v741_v20  ;;  %v2061_v18 = vsub.f32 %v5630_v44, %v2060_v4  ;;  %v5672_v20 = vand.u32 4294901760, %v17_v28  ;;  %v7564_v27 = vand.u32 4294901760, %v5402_v16 }
 0x129   :  { %v5644_v35 = vadd.f32 %v962_v46, %v818_v17  ;;  %2051 = vmatpush.msrb.mxu3 %v2050_v37  ;;  %2274 = vmatpush.msra.mxu2 %v7560_v23  ;;  %v7589_v13 = vld [vmem:[#allocation9_spill] sm:$0xff] }
 0x12a   :  { %v2062_v46 = vand.u32 4294901760, %v2061_v18  ;;  %2217 = vmatpush.msrb.mxu1 %v5613_v30  ;;  %v5689_v0 = vsub.f32 %v17_v28, %v5672_v20  ;;  %v7570_v28 = vand.u32 4294901760, %v5492_v34  ;;  %v31_v34 = vld [vmem:[%s7412_s0 + $0x88] sm:$0xff] }
 0x12b   :  { %v5655_v58 = vpop.f32.mrf.mxu0  ;;  %2057 = vmatpush.msrb.mxu3 %v2056_v41  ;;  %2278 = vmatpush.msra.mxu2 %v7561_v42 }
 0x12c   :  { %v5658_v17 = vpop.f32.mrf.mxu1  ;;  %v1905_v41 = vand.u32 4294901760, %v5689_v0 }
 0x12d   :  { %1614 = vmatmul.f32.gmra.mxu2 %v5294_v1  ;;  %2063 = vmatpush.msrb.mxu3 %v2062_v46 }
 0x12e   :  { %1687 = vmatmul.f32.gmra.mxu3 %v7562_v6  ;;  %1786 = vmatmul.f32.gmra.mxu0 %v5230_v31 }
 0x12f   :  { %2365 = vmatpush.msra.mxu3 %v5288_v51  ;;  %2282 = vmatpush.msra.mxu2 %v7563_v2 }
 0x130   :  { %1851 = vmatmul.f32.gmra.mxu1 %v5230_v31  ;;  %v833_v61 = vpop.f32.mrf.mxu2  ;;  %v966_v45 = vpop.f32.mrf.mxu3  ;;  %v684_v31 = vadd.f32 %v5423_v55, %v5412_v29  ;;  %v24_v55 = vld [vmem:[%s7412_s0 + $0x50] sm:$0xff] }
 0x131   :  { %v834_v37 = vadd.f32 %v833_v61, %v745_v54  ;;  %v5676_v53 = vadd.f32 %v966_v45, %v826_v5  ;;  %2367 = vmatpush.msra.mxu3 %v5307_v47  ;;  %2286 = vmatpush.msra.mxu2 %v7564_v27  ;;  %v7565_v5 = vand.u32 4294901760, %v5419_v10  ;;  %v7566_v47 = vand.u32 4294901760, %v5294_v1 }
 0x132   :  { %v749_v29 = vadd.f32 %v5429_v63, %v684_v31  ;;  %v7567_v1 = vand.u32 4294901760, %v5449_v39  ;;  %v5714_v46 = vand.u32 4294901760, %v24_v55  ;;  %v7569_v63 = vand.u32 4294901760, %v5464_v7 }
 0x133   :  { %v5683_v56 = vpop.f32.mrf.mxu0  ;;  %2369 = vmatpush.msra.mxu3 %v5337_v43  ;;  %2290 = vmatpush.msra.mxu2 %v7565_v5  ;;  %v149_v43 = vld [vmem:[%s7411_s1 + $0x278] sm:$0xff]  ;;  %v1906_v7 = vsub.f32 %v5689_v0, %v1905_v41  ;;  %v7572_v27 = vand.u32 4294901760, %v5507_v8 }
 0x134   :  { %v5686_v51 = vpop.f32.mrf.mxu1  ;;  %v5706_v16 = vand.u32 4294901760, %v149_v43  ;;  %7568 = vst [vmem:[#allocation13_spill] sm:$0xff] %v5714_v46 }
 0x135   :  { %1619 = vmatmul.f32.gmra.mxu2 %v5343_v24  ;;  %2371 = vmatpush.msra.mxu3 %v5359_v9  ;;  %v148_v9 = vld [vmem:[%s7411_s1 + $0x270] sm:$0xff] }
 0x136   :  { %1693 = vmatmul.f32.gmra.mxu3 %v7566_v47  ;;  %1790 = vmatmul.f32.gmra.mxu0 %v5254_v32  ;;  %v5725_v39 = vand.u32 4294901760, %v148_v9  ;;  %v1907_v47 = vand.u32 4294901760, %v1906_v7  ;;  %v7576_v7 = vld [vmem:[#allocation2_spill] sm:$0xff] }
 0x137   :  { %2294 = vmatpush.msra.mxu2 %v7567_v1  ;;  %2373 = vmatpush.msra.mxu3 %v5389_v12  ;;  %v688_v12 = vadd.f32 %v5468_v26, %v5458_v52  ;;  %v7571_v26 = vand.u32 4294901760, %v5343_v24  ;;  %v5749_v52 = vsub.f32 %v24_v55, %v5714_v46  ;;  %v147_v24 = vld [vmem:[%s7411_s1 + $0x268] sm:$0xff]  ;;  %v5769_v55 = vand.u32 4294901760, %v31_v34 }
 0x138   :  { %1855 = vmatmul.f32.gmra.mxu1 %v5254_v32  ;;  %v841_v10 = vpop.f32.mrf.mxu2  ;;  %2430 = vmatpush.msra.mxu0 %v5706_v16  ;;  %v5718_v32 = vsub.f32 %v149_v43, %v5706_v16 }
 0x139   :  { %v970_v18 = vpop.f32.mrf.mxu3  ;;  %v842_v23 = vadd.f32 %v841_v10, %v749_v29  ;;  %2298 = vmatpush.msra.mxu2 %v7569_v63  ;;  %2375 = vmatpush.msra.mxu3 %v5408_v33  ;;  %v5742_v33 = vsub.f32 %v148_v9, %v5725_v39  ;;  %v753_v45 = vadd.f32 %v5474_v62, %v688_v12  ;;  %v146_v29 = vld [vmem:[%s7411_s1 + $0x260] sm:$0xff] }
 0x13a   :  { %v5712_v40 = vadd.f32 %v970_v18, %v834_v37  ;;  %v7472_v6 = vand.u32 4294901760, %v5718_v32  ;;  %2432 = vmatpush.msra.mxu0 %v5725_v39  ;;  %v5765_v37 = vand.u32 4294901760, %v147_v24  ;;  %7573 = vst [vmem:[#allocation14_spill] sm:$0xff] %v5769_v55  ;;  %v5785_v10 = vand.u32 4294901760, %v146_v29 }
 0x13b   :  { %v5730_v42 = vpop.f32.mrf.mxu0  ;;  %2302 = vmatpush.msra.mxu2 %v7570_v28  ;;  %2377 = vmatpush.msra.mxu3 %v5438_v50  ;;  %v7471_v50 = vand.u32 4294901760, %v5742_v33  ;;  %v1033_v18 = vadd.f32 %v5511_v15, %v5501_v48  ;;  %v5798_v12 = vsub.f32 %v31_v34, %v5769_v55  ;;  %v38_v48 = vld [vmem:[%s7412_s0 + $0xc0] sm:$0xff]  ;;  %v7577_v34 = vld [vmem:[#allocation4_spill] sm:$0xff] }
 0x13c   :  { %v2529_v61 = vsub.f32 %v5718_v32, %v7472_v6  ;;  %2434 = vmatpush.msra.mxu0 %v5765_v37  ;;  %v5780_v8 = vsub.f32 %v147_v24, %v5765_v37 }
 0x13d   :  { %v5735_v54 = vpop.f32.mrf.mxu1  ;;  %1624 = vmatmul.f32.gmra.mxu2 %v5395_v25  ;;  %2379 = vmatpush.msra.mxu3 %v5455_v11  ;;  %v2535_v43 = vsub.f32 %v5742_v33, %v7471_v50 }
 0x13e   :  { %1699 = vmatmul.f32.gmra.mxu3 %v7571_v26  ;;  %1794 = vmatmul.f32.gmra.mxu0 %v5277_v57  ;;  %v2530_v2 = vand.u32 4294901760, %v2529_v61  ;;  %v7470_v9 = vand.u32 4294901760, %v5780_v8  ;;  %v1107_v61 = vadd.f32 %v7577_v34, %v1033_v18 }
 0x13f   :  { %2306 = vmatpush.msra.mxu2 %v7572_v27  ;;  %2381 = vmatpush.msra.mxu3 %v5484_v59  ;;  %v2536_v1 = vand.u32 4294901760, %v2535_v43  ;;  %v7574_v59 = vand.u32 4294901760, %v5536_v36  ;;  %v7575_v36 = vand.u32 4294901760, %v5395_v25  ;;  %v145_v25 = vld [vmem:[%s7411_s1 + $0x258] sm:$0xff] }
 0x140   :  { %1859 = vmatmul.f32.gmra.mxu1 %v5277_v57  ;;  %v849_v31 = vpop.f32.mrf.mxu2  ;;  %v1913_v57 = vand.u32 4294901760, %v5749_v52  ;;  %2436 = vmatpush.msra.mxu0 %v5785_v10  ;;  %v2541_v28 = vsub.f32 %v5780_v8, %v7470_v9 }
 0x141   :  { %v974_v5 = vpop.f32.mrf.mxu3  ;;  %v850_v11 = vadd.f32 %v849_v31, %v753_v45  ;;  %2531 = vmatpush.msra.mxu1 %v2530_v2  ;;  %2383 = vmatpush.msra.mxu3 %v5498_v19  ;;  %v5802_v19 = vsub.f32 %v146_v29, %v5785_v10  ;;  %v5823_v45 = vand.u32 4294901760, %v145_v25  ;;  %v7578_v2 = vand.u32 4294901760, %v5551_v49 }
 0x142   :  { %v5775_v62 = vadd.f32 %v974_v5, %v842_v23  ;;  %2310 = vmatpush.msra.mxu2 %v7574_v59  ;;  %v1914_v15 = vsub.f32 %v5749_v52, %v1913_v57  ;;  %v2542_v24 = vand.u32 4294901760, %v2541_v28  ;;  %v7479_v5 = vand.u32 4294901760, %v5798_v12  ;;  %v144_v59 = vld [vmem:[%s7411_s1 + $0x250] sm:$0xff] }
 0x143   :  { %v5792_v23 = vpop.f32.mrf.mxu0  ;;  %2537 = vmatpush.msra.mxu1 %v2536_v1  ;;  %v7469_v26 = vand.u32 4294901760, %v5802_v19  ;;  %2385 = vmatpush.msra.mxu3 %v5527_v14  ;;  %v5838_v49 = vsub.f32 %v145_v25, %v5823_v45  ;;  %v7580_v28 = vand.u32 4294901760, %v5583_v21 }
 0x144   :  { %2314 = vmatpush.msra.mxu2 %v7578_v2  ;;  %v1915_v1 = vand.u32 4294901760, %v1914_v15  ;;  %2438 = vmatpush.msra.mxu0 %v5823_v45  ;;  %v7583_v2 = vld [vmem:[#allocation3_spill] sm:$0xff] }
 0x145   :  { %v5795_v63 = vpop.f32.mrf.mxu1  ;;  %1908 = vmatmul.f32.vlgmr.msrb.gmra.mxu2 %v1907_v47  ;;  %v5828_v47 = vand.u32 4294901760, %v38_v48  ;;  %v2547_v14 = vsub.f32 %v5802_v19, %v7469_v26  ;;  %2387 = vmatpush.msra.mxu3 %v5542_v60  ;;  %v7581_v60 = vld [vmem:[#allocation5_spill] sm:$0xff]  ;;  %v7468_v25 = vand.u32 4294901760, %v5838_v49 }
 0x146   :  { %1705 = vmatmul.f32.gmra.mxu3 %v7575_v36  ;;  %1798 = vmatmul.f32.gmra.mxu0 %v7576_v7  ;;  %v5843_v36 = vand.u32 4294901760, %v144_v59 }
 0x147   :  { %7579 = vst [vmem:[#allocation2_spill] sm:$0xff] %v5828_v47  ;;  %2543 = vmatpush.msra.mxu1 %v2542_v24  ;;  %v2548_v18 = vand.u32 4294901760, %v2547_v14  ;;  %2318 = vmatpush.msra.mxu2 %v7580_v28  ;;  %v5859_v24 = vsub.f32 %v38_v48, %v5828_v47  ;;  %v2553_v21 = vsub.f32 %v5838_v49, %v7468_v25  ;;  %v45_v48 = vld [vmem:[%s7412_s0 + $0xf8] sm:$0xff]  ;;  %v7584_v14 = vld [vmem:[#allocation10_spill] sm:$0xff] }
 0x148   :  { %1863 = vmatmul.f32.gmra.mxu1 %v7576_v7  ;;  %v1217_v31 = vpop.f32.mrf.mxu2  ;;  %2389 = vmatpush.msra.mxu3 %v5571_v22  ;;  %v5863_v22 = vsub.f32 %v144_v59, %v5843_v36  ;;  %v7586_v59 = vld [vmem:[#allocation7_spill] sm:$0xff] }
 0x149   :  { %v978_v27 = vpop.f32.mrf.mxu3  ;;  %v1218_v29 = vadd.f32 %v1217_v31, %v1107_v61  ;;  %v1922_v61 = vsub.f32 %v5798_v12, %v7479_v5  ;;  %2549 = vmatpush.msra.mxu1 %v2548_v18  ;;  %2440 = vmatpush.msra.mxu0 %v5843_v36  ;;  %v143_v31 = vld [vmem:[%s7411_s1 + $0x248] sm:$0xff]  ;;  %v2554_v28 = vand.u32 4294901760, %v2553_v21  ;;  %v7475_v50 = vand.u32 4294901760, %v5859_v24 }
 0x14a   :  { %v5834_v43 = vadd.f32 %v978_v27, %v850_v11  ;;  %v7582_v11 = vld [vmem:[#allocation6_spill] sm:$0xff]  ;;  %v7474_v27 = vand.u32 4294901760, %v5863_v22  ;;  %v5892_v21 = vand.u32 4294901760, %v45_v48 }
 0x14b   :  { %v1038_v15 = vadd.f32 %v7582_v11, %v7581_v60  ;;  %v5850_v7 = vpop.f32.mrf.mxu0  ;;  %v5881_v60 = vand.u32 4294901760, %v143_v31  ;;  %v7587_v11 = vld [vmem:[#allocation8_spill] sm:$0xff]  ;;  %v1923_v9 = vand.u32 4294901760, %v1922_v61  ;;  %2555 = vmatpush.msra.mxu1 %v2554_v28  ;;  %v142_v61 = vld [vmem:[%s7411_s1 + $0x240] sm:$0xff] }
 0x14c   :  { %2391 = vmatpush.msra.mxu3 %v7587_v11  ;;  %v2559_v6 = vsub.f32 %v5863_v22, %v7474_v27  ;;  %7588 = vst [vmem:[#allocation4_spill] sm:$0xff] %v5892_v21 }
 0x14d   :  { %v5853_v34 = vpop.f32.mrf.mxu1  ;;  %1916 = vmatmul.f32.gmra.mxu2 %v1915_v1  ;;  %v7585_v1 = vand.u32 4294901760, %v7584_v14  ;;  %v1113_v18 = vadd.f32 %v7586_v59, %v1038_v15  ;;  %2442 = vmatpush.msra.mxu0 %v5881_v60  ;;  %v5901_v59 = vand.u32 4294901760, %v142_v61 }
 0x14e   :  { %2065 = vmatmul.f32.vlgmr.msrb.gmra.mxu3 %v5672_v20  ;;  %1802 = vmatmul.f32.gmra.mxu0 %v7583_v2 }
 0x14f   :  { %2322 = vmatpush.msra.mxu2 %v7585_v1  ;;  %v2560_v1 = vand.u32 4294901760, %v2559_v6  ;;  %2393 = vmatpush.msra.mxu3 %v5600_v38  ;;  %v1930_v6 = vsub.f32 %v5859_v24, %v7475_v50  ;;  %v5919_v44 = vsub.f32 %v142_v61, %v5901_v59  ;;  %v5923_v38 = vsub.f32 %v45_v48, %v5892_v21  ;;  %v7591_v48 = vld [vmem:[#allocation12_spill] sm:$0xff] }
 0x150   :  { %1867 = vmatmul.f32.gmra.mxu1 %v7583_v2  ;;  %v1221_v25 = vpop.f32.mrf.mxu2  ;;  %v5896_v2 = vsub.f32 %v143_v31, %v5881_v60  ;;  %2444 = vmatpush.msra.mxu0 %v5901_v59 }
 0x151   :  { %v1282_v26 = vpop.f32.mrf.mxu3  ;;  %2326 = vmatpush.msra.mxu2 %v2054_v3  ;;  %v1222_v15 = vadd.f32 %v1221_v25, %v1113_v18  ;;  %v7590_v3 = vld [vmem:[#allocation11_spill] sm:$0xff]  ;;  %2561 = vmatpush.msra.mxu1 %v2560_v1  ;;  %v7476_v28 = vand.u32 4294901760, %v5919_v44 }
 0x152   :  { %v5890_v14 = vadd.f32 %v1282_v26, %v1218_v29  ;;  %v1043_v26 = vadd.f32 %v7590_v3, %v7589_v13  ;;  %v7473_v25 = vand.u32 4294901760, %v5896_v2  ;;  %2395 = vmatpush.msra.mxu3 %v5613_v30 }
 0x153   :  { %2330 = vmatpush.msra.mxu2 %v2060_v4  ;;  %v5908_v29 = vpop.f32.mrf.mxu0  ;;  %v52_v4 = vld [vmem:[%s7412_s0 + $0x130] sm:$0xff]  ;;  %v2571_v50 = vsub.f32 %v5919_v44, %v7476_v28 }
 0x154   :  { %v2565_v18 = vsub.f32 %v5896_v2, %v7473_v25  ;;  %v1119_v11 = vadd.f32 %v7591_v48, %v1043_v26  ;;  %2745 = vmatpush.msrb.mxu3 %v5706_v16  ;;  %v1931_v25 = vand.u32 4294901760, %v1930_v6  ;;  %v5943_v27 = vand.u32 4294901760, %v52_v4  ;;  %v140_v6 = vld [vmem:[%s7411_s1 + $0x230] sm:$0xff] }
 0x155   :  { %2657 = vmatpush.msrb.mxu2 %v5718_v32  ;;  %v5912_v31 = vpop.f32.mrf.mxu1  ;;  %v5959_v48 = vand.u32 4294901760, %v140_v6 }
 0x156   :  { %1924 = vmatmul.f32.gmra.mxu2 %v1923_v9  ;;  %2069 = vmatmul.f32.gmra.mxu3 %v5714_v46  ;;  %v141_v9 = vld [vmem:[%s7411_s1 + $0x238] sm:$0xff]  ;;  %v2566_v61 = vand.u32 4294901760, %v2565_v18  ;;  %v2572_v18 = vand.u32 4294901760, %v2571_v50 }
 0x157   :  { %2147 = vmatmul.f32.vlgmr.msrb.gmra.mxu0 %v5689_v0  ;;  %v5940_v1 = vand.u32 4294901760, %v141_v9  ;;  %2660 = vmatpush.msrb.mxu2 %v5742_v33  ;;  %v7478_v0 = vand.u32 4294901760, %v5923_v38  ;;  %v5975_v50 = vsub.f32 %v140_v6, %v5959_v48 }
 0x158   :  { %2221 = vmatmul.f32.vlgmr.msrb.gmra.mxu1 %v1905_v41  ;;  %v1225_v13 = vpop.f32.mrf.mxu2  ;;  %2747 = vmatpush.msrb.mxu3 %v5725_v39 }
 0x159   :  { %v1286_v3 = vpop.f32.mrf.mxu3  ;;  %v1226_v30 = vadd.f32 %v1225_v13, %v1119_v11  ;;  %2567 = vmatpush.msra.mxu1 %v2566_v61  ;;  %2446 = vmatpush.msra.mxu0 %v5940_v1  ;;  %v5954_v41 = vsub.f32 %v141_v9, %v5940_v1  ;;  %v5971_v13 = vsub.f32 %v52_v4, %v5943_v27 }
 0x15a   :  { %v5949_v26 = vadd.f32 %v1286_v3, %v1222_v15  ;;  %2663 = vmatpush.msrb.mxu2 %v5780_v8  ;;  %v1048_v15 = vadd.f32 %v5655_v58, %v5644_v35  ;;  %v1938_v35 = vsub.f32 %v5923_v38, %v7478_v0  ;;  %v59_v58 = vld [vmem:[%s7412_s0 + $0x168] sm:$0xff]  ;;  %2749 = vmatpush.msrb.mxu3 %v5765_v37 }
 0x15b   :  { %v5965_v11 = vpop.f32.mrf.mxu0  ;;  %v7477_v61 = vand.u32 4294901760, %v5954_v41  ;;  %2573 = vmatpush.msra.mxu1 %v2572_v18  ;;  %2448 = vmatpush.msra.mxu0 %v5959_v48  ;;  %v6000_v3 = vand.u32 4294901760, %v59_v58 }
 0x15c   :  { %7592 = vst [vmem:[#allocation5_spill] sm:$0xff] %v5949_v26  ;;  %v1125_v6 = vadd.f32 %v5658_v17, %v1048_v15  ;;  %2666 = vmatpush.msrb.mxu2 %v5802_v19  ;;  %2751 = vmatpush.msrb.mxu3 %v5785_v10 }
 0x15d   :  { %7593 = vst [vmem:[#allocation6_spill] sm:$0xff] %v5965_v11  ;;  %v5968_v9 = vpop.f32.mrf.mxu1  ;;  %v2577_v4 = vsub.f32 %v5954_v41, %v7477_v61 }
 0x15e   :  { %7594 = vst [vmem:[#allocation3_spill] sm:$0xff] %v5968_v9  ;;  %1932 = vmatmul.f32.gmra.mxu2 %v1931_v25  ;;  %2073 = vmatmul.f32.gmra.mxu3 %v5769_v55  ;;  %v139_v25 = vld [vmem:[%s7411_s1 + $0x228] sm:$0xff]  ;;  %v7595_v55 = vand.u32 4294901760, %v5975_v50 }
 0x15f   :  { %2152 = vmatmul.f32.gmra.mxu0 %v5749_v52  ;;  %v2578_v18 = vand.u32 4294901760, %v2577_v4  ;;  %v5996_v28 = vand.u32 4294901760, %v139_v25  ;;  %v138_v4 = vld [vmem:[%s7411_s1 + $0x220] sm:$0xff]  ;;  %2669 = vmatpush.msrb.mxu2 %v5838_v49 }
 0x160   :  { %2227 = vmatmul.f32.gmra.mxu1 %v1913_v57  ;;  %v1229_v61 = vpop.f32.mrf.mxu2  ;;  %v2583_v9 = vsub.f32 %v5975_v50, %v7595_v55  ;;  %v1939_v57 = vand.u32 4294901760, %v1938_v35  ;;  %v6015_v46 = vand.u32 4294901760, %v138_v4  ;;  %2753 = vmatpush.msrb.mxu3 %v5823_v45  ;;  %v1053_v55 = vadd.f32 %v5683_v56, %v5676_v53  ;;  %v66_v53 = vld [vmem:[%s7412_s0 + $0x1a0] sm:$0xff] }
 0x161   :  { %v1290_v0 = vpop.f32.mrf.mxu3  ;;  %v1230_v17 = vadd.f32 %v1229_v61, %v1125_v6  ;;  %2579 = vmatpush.msra.mxu1 %v2578_v18  ;;  %2450 = vmatpush.msra.mxu0 %v5996_v28  ;;  %v6010_v15 = vsub.f32 %v139_v25, %v5996_v28  ;;  %v7599_v35 = vand.u32 4294901760, %v5971_v13 }
 0x162   :  { %v6006_v52 = vadd.f32 %v1290_v0, %v1226_v30  ;;  %v2584_v5 = vand.u32 4294901760, %v2583_v9  ;;  %v6030_v9 = vsub.f32 %v59_v58, %v6000_v3  ;;  %v6034_v6 = vsub.f32 %v138_v4, %v6015_v46  ;;  %v137_v58 = vld [vmem:[%s7411_s1 + $0x218] sm:$0xff]  ;;  %2672 = vmatpush.msrb.mxu2 %v5863_v22  ;;  %2755 = vmatpush.msrb.mxu3 %v5843_v36 }
 0x163   :  { %v6021_v30 = vpop.f32.mrf.mxu0  ;;  %v7484_v0 = vand.u32 4294901760, %v6010_v15  ;;  %v1946_v25 = vsub.f32 %v5971_v13, %v7599_v35  ;;  %2452 = vmatpush.msra.mxu0 %v6015_v46  ;;  %v1131_v18 = vadd.f32 %v5686_v51, %v1053_v55  ;;  %v6052_v35 = vand.u32 4294901760, %v137_v58  ;;  %v136_v51 = vld [vmem:[%s7411_s1 + $0x210] sm:$0xff] }
 0x164   :  { %7596 = vst [vmem:[#allocation10_spill] sm:$0xff] %v6006_v52  ;;  %2585 = vmatpush.msra.mxu1 %v2584_v5  ;;  %v7601_v52 = vand.u32 4294901760, %v6034_v6  ;;  %2675 = vmatpush.msrb.mxu2 %v5896_v2  ;;  %v135_v5 = vld [vmem:[%s7411_s1 + $0x208] sm:$0xff] }
 0x165   :  { %7597 = vst [vmem:[#allocation7_spill] sm:$0xff] %v6021_v30  ;;  %v6024_v61 = vpop.f32.mrf.mxu1  ;;  %v2589_v56 = vsub.f32 %v6010_v15, %v7484_v0  ;;  %v6056_v30 = vand.u32 4294901760, %v66_v53  ;;  %2454 = vmatpush.msra.mxu0 %v6052_v35  ;;  %2757 = vmatpush.msrb.mxu3 %v5881_v60 }
 0x166   :  { %7598 = vst [vmem:[#allocation8_spill] sm:$0xff] %v6024_v61  ;;  %1940 = vmatmul.f32.gmra.mxu2 %v1939_v57  ;;  %2077 = vmatmul.f32.gmra.mxu3 %v5828_v47  ;;  %v7600_v57 = vand.u32 4294901760, %v5798_v12  ;;  %v1947_v61 = vand.u32 4294901760, %v1946_v25  ;;  %v2595_v11 = vsub.f32 %v6034_v6, %v7601_v52  ;;  %v6069_v25 = vsub.f32 %v137_v58, %v6052_v35 }
 0x167   :  { %2157 = vmatmul.f32.gmra.mxu0 %v5798_v12  ;;  %v2590_v4 = vand.u32 4294901760, %v2589_v56  ;;  %v6071_v56 = vand.u32 4294901760, %v136_v51  ;;  %v1058_v52 = vadd.f32 %v5730_v42, %v5712_v40  ;;  %2678 = vmatpush.msrb.mxu2 %v5919_v44  ;;  %v6087_v58 = vand.u32 4294901760, %v135_v5 }
 0x168   :  { %2233 = vmatmul.f32.gmra.mxu1 %v7600_v57  ;;  %v1233_v0 = vpop.f32.mrf.mxu2  ;;  %v2596_v57 = vand.u32 4294901760, %v2595_v11  ;;  %v7605_v42 = vand.u32 4294901760, %v6030_v9  ;;  %2759 = vmatpush.msrb.mxu3 %v5901_v59 }
 0x169   :  { %v1294_v47 = vpop.f32.mrf.mxu3  ;;  %v1234_v12 = vadd.f32 %v1233_v0, %v1131_v18  ;;  %2591 = vmatpush.msra.mxu1 %v2590_v4  ;;  %2456 = vmatpush.msra.mxu0 %v6071_v56  ;;  %v6085_v0 = vsub.f32 %v136_v51, %v6071_v56  ;;  %v6095_v18 = vsub.f32 %v66_v53, %v6056_v30  ;;  %v134_v4 = vld [vmem:[%s7411_s1 + $0x200] sm:$0xff] }
 0x16a   :  { %v6065_v55 = vadd.f32 %v1294_v47, %v1230_v17  ;;  %v7489_v17 = vand.u32 4294901760, %v6069_v25  ;;  %v1954_v11 = vsub.f32 %v6030_v9, %v7605_v42  ;;  %v6107_v42 = vsub.f32 %v135_v5, %v6087_v58  ;;  %2681 = vmatpush.msrb.mxu2 %v5954_v41  ;;  %2761 = vmatpush.msrb.mxu3 %v5940_v1 }
 0x16b   :  { %v6080_v47 = vpop.f32.mrf.mxu0  ;;  %2597 = vmatpush.msra.mxu1 %v2596_v57  ;;  %v6109_v53 = vand.u32 4294901760, %v134_v4  ;;  %v1137_v57 = vadd.f32 %v5735_v54, %v1058_v52  ;;  %2458 = vmatpush.msra.mxu0 %v6087_v58  ;;  %v1961_v26 = vand.u32 4294901760, %v6095_v18 }
 0x16c   :  { %7602 = vst [vmem:[#allocation9_spill] sm:$0xff] %v6065_v55  ;;  %v2601_v51 = vsub.f32 %v6069_v25, %v7489_v17  ;;  %v2612_v5 = vand.u32 4294901760, %v6107_v42  ;;  %v1955_v55 = vand.u32 4294901760, %v1954_v11  ;;  %2684 = vmatpush.msrb.mxu2 %v5975_v50  ;;  %v7607_v11 = vand.u32 4294901760, %v5718_v32  ;;  %2763 = vmatpush.msrb.mxu3 %v5959_v48 }
 0x16d   :  { %7603 = vst [vmem:[#allocation11_spill] sm:$0xff] %v6080_v47  ;;  %v6089_v40 = vpop.f32.mrf.mxu1  ;;  %v6122_v47 = vsub.f32 %v134_v4, %v6109_v53  ;;  %2460 = vmatpush.msra.mxu0 %v6109_v53  ;;  %v7608_v32 = vand.u32 4294901760, %v5742_v33  ;;  %v7610_v33 = vand.u32 4294901760, %v5780_v8  ;;  %v1068_v8 = vadd.f32 %v5850_v7, %v5834_v43 }
 0x16e   :  { %7604 = vst [vmem:[#allocation12_spill] sm:$0xff] %v6089_v40  ;;  %1948 = vmatmul.f32.gmra.mxu2 %v1947_v61  ;;  %2081 = vmatmul.f32.gmra.mxu3 %v5892_v21  ;;  %v7490_v40 = vand.u32 4294901760, %v6085_v0  ;;  %v7606_v61 = vand.u32 4294901760, %v5859_v24  ;;  %v2602_v21 = vand.u32 4294901760, %v2601_v51  ;;  %v7614_v43 = vand.u32 4294901760, %v5863_v22 }
 0x16f   :  { %2162 = vmatmul.f32.gmra.mxu0 %v5859_v24  ;;  %v7491_v4 = vand.u32 4294901760, %v6122_v47  ;;  %2687 = vmatpush.msrb.mxu2 %v6010_v15  ;;  %v1352_v22 = vadd.f32 %v5908_v29, %v5890_v14  ;;  %v7617_v29 = vand.u32 4294901760, %v6030_v9 }
 0x170   :  { %2239 = vmatmul.f32.gmra.mxu1 %v7606_v61  ;;  %v2607_v17 = vsub.f32 %v6085_v0, %v7490_v40  ;;  %v1237_v54 = vpop.f32.mrf.mxu2  ;;  %v2613_v40 = vsub.f32 %v6107_v42, %v2612_v5  ;;  %2828 = vmatpush.msrb.mxu0 %v7607_v11 }
 0x171   :  { %v1298_v52 = vpop.f32.mrf.mxu3  ;;  %v1238_v24 = vadd.f32 %v1237_v54, %v1137_v57  ;;  %2603 = vmatpush.msra.mxu1 %v2602_v21  ;;  %v1063_v57 = vadd.f32 %v5792_v23, %v5775_v62  ;;  %v2619_v54 = vsub.f32 %v6122_v47, %v7491_v4  ;;  %2765 = vmatpush.msrb.mxu3 %v5996_v28 }
 0x172   :  { %v6127_v51 = vadd.f32 %v1298_v52, %v1234_v12  ;;  %v2608_v61 = vand.u32 4294901760, %v2607_v17  ;;  %v2614_v21 = vand.u32 4294901760, %v2613_v40  ;;  %2832 = vmatpush.msrb.mxu0 %v7608_v32  ;;  %v1962_v62 = vsub.f32 %v6095_v18, %v1961_v26  ;;  %2690 = vmatpush.msrb.mxu2 %v6034_v6 }
 0x173   :  { %v6139_v12 = vpop.f32.mrf.mxu0  ;;  %v2620_v23 = vand.u32 4294901760, %v2619_v54  ;;  %v1143_v40 = vadd.f32 %v5795_v63, %v1063_v57  ;;  %v7609_v52 = vand.u32 4294901760, %v5923_v38  ;;  %2767 = vmatpush.msrb.mxu3 %v6015_v46  ;;  %v7616_v57 = vand.u32 4294901760, %v5919_v44 }
 0x174   :  { %2609 = vmatpush.msra.mxu1 %v2608_v61  ;;  %2836 = vmatpush.msrb.mxu0 %v7610_v33  ;;  %v1963_v4 = vand.u32 4294901760, %v1962_v62  ;;  %v1509_v14 = vadd.f32 %v5912_v31, %v1352_v22  ;;  %v7618_v44 = vand.u32 4294901760, %v5954_v41  ;;  %v7621_v33 = vld [vmem:[#allocation6_spill] sm:$0xff] }
 0x175   :  { %v6142_v17 = vpop.f32.mrf.mxu1  ;;  %2693 = vmatpush.msrb.mxu2 %v6069_v25  ;;  %2769 = vmatpush.msrb.mxu3 %v6052_v35 }
 0x176   :  { %1956 = vmatmul.f32.gmra.mxu2 %v1955_v55  ;;  %2085 = vmatmul.f32.gmra.mxu3 %v5943_v27 }
 0x177   :  { %2167 = vmatmul.f32.gmra.mxu0 %v5923_v38  ;;  %2615 = vmatpush.msra.mxu1 %v2614_v21  ;;  %v7611_v21 = vand.u32 4294901760, %v5802_v19  ;;  %v7612_v38 = vand.u32 4294901760, %v5838_v49  ;;  %v18_v19 = vld [vmem:[%s7412_s0 + $0x20] sm:$0xff] }
 0x178   :  { %2245 = vmatmul.f32.gmra.mxu1 %v7609_v52  ;;  %v1241_v61 = vpop.f32.mrf.mxu2  ;;  %2696 = vmatpush.msrb.mxu2 %v6085_v0  ;;  %v7620_v52 = vld [vmem:[#allocation5_spill] sm:$0xff] }
 0x179   :  { %v1302_v55 = vpop.f32.mrf.mxu3  ;;  %2621 = vmatpush.msra.mxu1 %v2620_v23  ;;  %v1242_v11 = vadd.f32 %v1241_v61, %v1143_v40  ;;  %2840 = vmatpush.msrb.mxu0 %v7611_v21  ;;  %v1360_v41 = vadd.f32 %v7621_v33, %v7620_v52  ;;  %v7635_v33 = vld [vmem:[#allocation2_spill] sm:$0xff] }
 0x17a   :  { %v6161_v32 = vadd.f32 %v1302_v55, %v1238_v24  ;;  %2771 = vmatpush.msrb.mxu3 %v6071_v56  ;;  %2699 = vmatpush.msrb.mxu2 %v6107_v42  ;;  %v7622_v55 = vand.u32 4294901760, %v6010_v15  ;;  %v7624_v15 = vld [vmem:[#allocation3_spill] sm:$0xff] }
 0x17b   :  { %2923 = vmatpush.msrb.mxu1 %v5706_v16  ;;  %v6170_v63 = vpop.f32.mrf.mxu0  ;;  %2844 = vmatpush.msrb.mxu0 %v7612_v38  ;;  %v1149_v16 = vadd.f32 %v5853_v34, %v1068_v8  ;;  %v7615_v34 = vand.u32 4294901760, %v5896_v2  ;;  %v1513_v21 = vadd.f32 %v7624_v15, %v1360_v41  ;;  %v7636_v41 = vld [vmem:[#allocation12_spill] sm:$0xff] }
 0x17c   :  { %2773 = vmatpush.msrb.mxu3 %v6087_v58  ;;  %2702 = vmatpush.msrb.mxu2 %v6122_v47 }
 0x17d   :  { %2925 = vmatpush.msrb.mxu1 %v5725_v39  ;;  %v6175_v24 = vpop.f32.mrf.mxu1  ;;  %v7613_v39 = vand.u32 4294901760, %v5971_v13  ;;  %2848 = vmatpush.msrb.mxu0 %v7614_v43  ;;  %v7627_v43 = vld [vmem:[#allocation10_spill] sm:$0xff] }
 0x17e   :  { %1964 = vmatmul.f32.gmra.mxu2 %v1963_v4  ;;  %2089 = vmatmul.f32.gmra.mxu3 %v6000_v3 }
 0x17f   :  { %2172 = vmatmul.f32.gmra.mxu0 %v5971_v13  ;;  %2927 = vmatpush.msrb.mxu1 %v5765_v37  ;;  %v6197_v13 = vand.u32 4294901760, %v18_v19 }
 0x180   :  { %2251 = vmatmul.f32.gmra.mxu1 %v7613_v39  ;;  %v1245_v49 = vpop.f32.mrf.mxu2  ;;  %2852 = vmatpush.msrb.mxu0 %v7615_v34 }
 0x181   :  { %v1306_v7 = vpop.f32.mrf.mxu3  ;;  %2929 = vmatpush.msrb.mxu1 %v5785_v10  ;;  %v1246_v4 = vadd.f32 %v1245_v49, %v1149_v16  ;;  %2775 = vmatpush.msrb.mxu3 %v6109_v53 }
 0x182   :  { %v6192_v37 = vadd.f32 %v1306_v7, %v1242_v11  ;;  %2856 = vmatpush.msrb.mxu0 %v7616_v57 }
 0x183   :  { %2931 = vmatpush.msrb.mxu1 %v5823_v45  ;;  %v6203_v10 = vpop.f32.mrf.mxu0  ;;  %v6216_v45 = vsub.f32 %v18_v19, %v6197_v13 }
 0x184   :  { %2860 = vmatpush.msrb.mxu0 %v7618_v44 }
 0x185   :  { %v6208_v2 = vpop.f32.mrf.mxu1  ;;  %2933 = vmatpush.msrb.mxu1 %v5843_v36  ;;  %v25_v36 = vld [vmem:[%s7412_s0 + $0x58] sm:$0xff]  ;;  %v2463_v31 = vand.u32 4294901760, %v6216_v45 }
 0x186   :  { %2093 = vmatmul.f32.gmra.mxu3 %v6056_v30  ;;  %2332 = vmatmul.f32.vlgmr.msra.gmra.mxu2 %v5672_v20 }
 0x187   :  { %2177 = vmatmul.f32.gmra.mxu0 %v6030_v9  ;;  %2935 = vmatpush.msrb.mxu1 %v5881_v60  ;;  %v7619_v60 = vand.u32 4294901760, %v5975_v50  ;;  %v6233_v9 = vand.u32 4294901760, %v25_v36  ;;  %v7623_v50 = vld [vmem:[#allocation13_spill] sm:$0xff] }
 0x188   :  { %2257 = vmatmul.f32.gmra.mxu1 %v7617_v29  ;;  %v1590_v62 = vpop.f32.mrf.mxu2 }
 0x189   :  { %v1310_v54 = vpop.f32.mrf.mxu3  ;;  %2937 = vmatpush.msrb.mxu1 %v5901_v59  ;;  %v1591_v40 = vadd.f32 %v1590_v62, %v1509_v14  ;;  %2864 = vmatpush.msrb.mxu0 %v7619_v60  ;;  %v6252_v11 = vsub.f32 %v25_v36, %v6233_v9  ;;  %v7634_v60 = vld [vmem:[#allocation11_spill] sm:$0xff] }
 0x18a   :  { %v6228_v23 = vadd.f32 %v1310_v54, %v1246_v4 }
 0x18b   :  { %2939 = vmatpush.msrb.mxu1 %v5940_v1  ;;  %v6238_v61 = vpop.f32.mrf.mxu0  ;;  %2868 = vmatpush.msrb.mxu0 %v7622_v55  ;;  %v2464_v1 = vsub.f32 %v6216_v45, %v2463_v31 }
 0x18d   :  { %v6242_v59 = vpop.f32.mrf.mxu1  ;;  %2941 = vmatpush.msrb.mxu1 %v5959_v48  ;;  %v7625_v48 = vand.u32 4294901760, %v6034_v6  ;;  %v2465_v19 = vand.u32 4294901760, %v2464_v1  ;;  %v7628_v6 = vld [vmem:[#allocation7_spill] sm:$0xff] }
 0x18e   :  { %2336 = vmatmul.f32.gmra.mxu2 %v7623_v50  ;;  %2397 = vmatmul.f32.vlgmr.msra.gmra.mxu3 %v5672_v20  ;;  %v32_v20 = vld [vmem:[%s7412_s0 + $0x90] sm:$0xff]  ;;  %v1368_v49 = vadd.f32 %v7628_v6, %v7627_v43 }
 0x18f   :  { %2182 = vmatmul.f32.gmra.mxu0 %v6095_v18  ;;  %2943 = vmatpush.msrb.mxu1 %v5996_v28  ;;  %v7626_v28 = vand.u32 4294901760, %v6069_v25  ;;  %v6269_v18 = vand.u32 4294901760, %v32_v20  ;;  %v7630_v25 = vld [vmem:[#allocation14_spill] sm:$0xff]  ;;  %v7637_v43 = vld [vmem:[#allocation4_spill] sm:$0xff] }
 0x190   :  { %2263 = vmatmul.f32.gmra.mxu1 %v1961_v26  ;;  %2872 = vmatpush.msrb.mxu0 %v7625_v48  ;;  %v1595_v8 = vpop.f32.mrf.mxu2  ;;  %v7504_v26 = vand.u32 4294901760, %v6252_v11 }
 0x191   :  { %v1664_v38 = vpop.f32.mrf.mxu3  ;;  %2945 = vmatpush.msrb.mxu1 %v6015_v46  ;;  %v1596_v16 = vadd.f32 %v1595_v8, %v1513_v21  ;;  %v7629_v46 = vand.u32 4294901760, %v6085_v0  ;;  %v6287_v34 = vsub.f32 %v32_v20, %v6269_v18  ;;  %v7631_v0 = vld [vmem:[#allocation8_spill] sm:$0xff] }
 0x192   :  { %v6264_v39 = vadd.f32 %v1664_v38, %v1591_v40  ;;  %2876 = vmatpush.msrb.mxu0 %v7626_v28  ;;  %v1517_v22 = vadd.f32 %v7631_v0, %v1368_v49  ;;  %v7633_v40 = vld [vmem:[#allocation9_spill] sm:$0xff] }
 0x193   :  { %2947 = vmatpush.msrb.mxu1 %v6052_v35  ;;  %v6274_v7 = vpop.f32.mrf.mxu0  ;;  %v2472_v35 = vsub.f32 %v6252_v11, %v7504_v26  ;;  %v7501_v54 = vand.u32 4294901760, %v6287_v34  ;;  %v1376_v52 = vadd.f32 %v7634_v60, %v7633_v40  ;;  %v60_v60 = vld [vmem:[%s7412_s0 + $0x170] sm:$0xff] }
 0x194   :  { %2880 = vmatpush.msrb.mxu0 %v7629_v46 }
 0x195   :  { %v6278_v4 = vpop.f32.mrf.mxu1  ;;  %2949 = vmatpush.msrb.mxu1 %v6071_v56  ;;  %v39_v56 = vld [vmem:[%s7412_s0 + $0xc8] sm:$0xff]  ;;  %v2473_v44 = vand.u32 4294901760, %v2472_v35  ;;  %v1521_v55 = vadd.f32 %v7636_v41, %v1376_v52 }
 0x196   :  { %2340 = vmatmul.f32.gmra.mxu2 %v7630_v25  ;;  %2401 = vmatmul.f32.gmra.mxu3 %v7623_v50  ;;  %v6303_v62 = vand.u32 4294901760, %v39_v56  ;;  %v46_v50 = vld [vmem:[%s7412_s0 + $0x100] sm:$0xff] }
 0x197   :  { %2466 = vmatmul.f32.vlgmr.msra.gmra.mxu0 %v2465_v19  ;;  %2951 = vmatpush.msrb.mxu1 %v6087_v58  ;;  %v7632_v58 = vand.u32 4294901760, %v6122_v47  ;;  %v2480_v47 = vsub.f32 %v6287_v34, %v7501_v54  ;;  %v6327_v38 = vand.u32 4294901760, %v46_v50 }
 0x198   :  { %2623 = vmatmul.f32.vlgmr.msra.gmra.mxu1 %v6197_v13  ;;  %2884 = vmatpush.msrb.mxu0 %v2612_v5  ;;  %v1600_v57 = vpop.f32.mrf.mxu2 }
 0x199   :  { %v1670_v14 = vpop.f32.mrf.mxu3  ;;  %2953 = vmatpush.msrb.mxu1 %v6109_v53  ;;  %v1601_v29 = vadd.f32 %v1600_v57, %v1517_v22  ;;  %v6317_v53 = vsub.f32 %v39_v56, %v6303_v62  ;;  %v2481_v48 = vand.u32 4294901760, %v2480_v47  ;;  %v6341_v49 = vsub.f32 %v46_v50, %v6327_v38 }
 0x19a   :  { %v6298_v36 = vadd.f32 %v1670_v14, %v1596_v16  ;;  %2888 = vmatpush.msrb.mxu0 %v7632_v58  ;;  %v1384_v16 = vadd.f32 %v6139_v12, %v6127_v51  ;;  %v53_v51 = vld [vmem:[%s7412_s0 + $0x138] sm:$0xff]  ;;  %v1392_v14 = vadd.f32 %v6170_v63, %v6161_v32 }
 0x19b   :  { %v6307_v42 = vpop.f32.mrf.mxu0  ;;  %v7499_v8 = vand.u32 4294901760, %v6317_v53  ;;  %v7493_v56 = vand.u32 4294901760, %v6341_v49  ;;  %v6351_v57 = vand.u32 4294901760, %v53_v51  ;;  %v165_v58 = vld [vmem:[%s7411_s1 + $0x2f8] sm:$0xff] }
 0x19c   :  { %v1525_v46 = vadd.f32 %v6142_v17, %v1384_v16  ;;  %v1529_v63 = vadd.f32 %v6175_v24, %v1392_v14 }
 0x19d   :  { %v6309_v5 = vpop.f32.mrf.mxu1  ;;  %v2488_v6 = vsub.f32 %v6317_v53, %v7499_v8  ;;  %v2496_v40 = vsub.f32 %v6341_v49, %v7493_v56  ;;  %v6370_v32 = vsub.f32 %v53_v51, %v6351_v57 }
 0x19e   :  { %2344 = vmatmul.f32.gmra.mxu2 %v7635_v33  ;;  %2405 = vmatmul.f32.gmra.mxu3 %v7630_v25 }
 0x19f   :  { %2474 = vmatmul.f32.gmra.mxu0 %v2473_v44  ;;  %v2489_v22 = vand.u32 4294901760, %v2488_v6  ;;  %v6364_v44 = vand.u32 4294901760, %v165_v58 }
 0x1a0   :  { %2627 = vmatmul.f32.gmra.mxu1 %v6233_v9  ;;  %v1605_v1 = vpop.f32.mrf.mxu2 }
 0x1a1   :  { %v1676_v15 = vpop.f32.mrf.mxu3  ;;  %v1606_v21 = vadd.f32 %v1605_v1, %v1521_v55  ;;  %2988 = vmatpush.msra.mxu2 %v6364_v44  ;;  %v6379_v52 = vsub.f32 %v165_v58, %v6364_v44  ;;  %3303 = vmatpush.msra.mxu1 %v6364_v44 }
 0x1a2   :  { %v6324_v20 = vadd.f32 %v1676_v15, %v1601_v29  ;;  %v2497_v15 = vand.u32 4294901760, %v2496_v40 }
 0x1a3   :  { %v6331_v28 = vpop.f32.mrf.mxu0  ;;  %v7498_v1 = vand.u32 4294901760, %v6379_v52  ;;  %3215 = vmatpush.msra.mxu0 %v6379_v52 }
 0x1a5   :  { %v6333_v19 = vpop.f32.mrf.mxu1 }
 0x1a6   :  { %2348 = vmatmul.f32.gmra.mxu2 %v7637_v43  ;;  %2409 = vmatmul.f32.gmra.mxu3 %v7635_v33  ;;  %v164_v33 = vld [vmem:[%s7411_s1 + $0x2f0] sm:$0xff] }
 0x1a7   :  { %2482 = vmatmul.f32.gmra.mxu0 %v2481_v48  ;;  %v6384_v55 = vand.u32 4294901760, %v164_v33  ;;  %v6392_v48 = vand.u32 4294901760, %v60_v60 }
 0x1a8   :  { %2631 = vmatmul.f32.gmra.mxu1 %v6269_v18  ;;  %v1610_v12 = vpop.f32.mrf.mxu2 }
 0x1a9   :  { %v1682_v25 = vpop.f32.mrf.mxu3  ;;  %v1611_v35 = vadd.f32 %v1610_v12, %v1525_v46  ;;  %7638 = vst [vmem:[#allocation5_spill] sm:$0xff] %v6392_v48  ;;  %2990 = vmatpush.msra.mxu2 %v6384_v55  ;;  %v6396_v16 = vsub.f32 %v164_v33, %v6384_v55  ;;  %3305 = vmatpush.msra.mxu1 %v6384_v55 }
 0x1aa   :  { %v6348_v0 = vadd.f32 %v1682_v25, %v1606_v21  ;;  %v7492_v21 = vand.u32 4294901760, %v6370_v32  ;;  %v3087_v46 = vsub.f32 %v6379_v52, %v7498_v1  ;;  %v163_v25 = vld [vmem:[%s7411_s1 + $0x2e8] sm:$0xff]  ;;  %v1776_v1 = vadd.f32 %v6274_v7, %v6264_v39 }
 0x1ab   :  { %v6355_v17 = vpop.f32.mrf.mxu0  ;;  %v7496_v12 = vand.u32 4294901760, %v6396_v16  ;;  %3218 = vmatpush.msra.mxu0 %v6396_v16 }
 0x1ad   :  { %v6357_v29 = vpop.f32.mrf.mxu1  ;;  %v3093_v14 = vsub.f32 %v6396_v16, %v7496_v12 }
 0x1ae   :  { %2352 = vmatmul.f32.gmra.mxu2 %v5943_v27  ;;  %2413 = vmatmul.f32.gmra.mxu3 %v7637_v43  ;;  %v1400_v43 = vadd.f32 %v6203_v10, %v6192_v37  ;;  %v3088_v37 = vand.u32 4294901760, %v3087_v46  ;;  %v6415_v10 = vand.u32 4294901760, %v163_v25 }
 0x1af   :  { %2490 = vmatmul.f32.gmra.mxu0 %v2489_v22  ;;  %v6421_v22 = vsub.f32 %v60_v60, %v6392_v48 }
 0x1b0   :  { %2635 = vmatmul.f32.gmra.mxu1 %v6303_v62  ;;  %v1615_v47 = vpop.f32.mrf.mxu2  ;;  %v1533_v58 = vadd.f32 %v6208_v2, %v1400_v43  ;;  %3089 = vmatpush.msra.mxu3 %v3088_v37  ;;  %v6432_v40 = vsub.f32 %v163_v25, %v6415_v10 }
 0x1b1   :  { %v1688_v41 = vpop.f32.mrf.mxu3  ;;  %v1616_v24 = vadd.f32 %v1615_v47, %v1529_v63  ;;  %v162_v63 = vld [vmem:[%s7411_s1 + $0x2e0] sm:$0xff]  ;;  %v3094_v47 = vand.u32 4294901760, %v3093_v14  ;;  %2992 = vmatpush.msra.mxu2 %v6415_v10  ;;  %3307 = vmatpush.msra.mxu1 %v6415_v10  ;;  %v7495_v25 = vand.u32 4294901760, %v6421_v22 }
 0x1b2   :  { %v6387_v50 = vadd.f32 %v1688_v41, %v1611_v35  ;;  %v2504_v35 = vsub.f32 %v6370_v32, %v7492_v21  ;;  %v6438_v2 = vand.u32 4294901760, %v162_v63  ;;  %v7494_v43 = vand.u32 4294901760, %v6432_v40  ;;  %3221 = vmatpush.msra.mxu0 %v6432_v40 }
 0x1b3   :  { %v6401_v6 = vpop.f32.mrf.mxu0  ;;  %3095 = vmatpush.msra.mxu3 %v3094_v47  ;;  %v2512_v47 = vsub.f32 %v6421_v22, %v7495_v25 }
 0x1b4   :  { %v2505_v46 = vand.u32 4294901760, %v2504_v35  ;;  %2994 = vmatpush.msra.mxu2 %v6438_v2  ;;  %v6450_v14 = vsub.f32 %v162_v63, %v6438_v2  ;;  %3309 = vmatpush.msra.mxu1 %v6438_v2  ;;  %v161_v63 = vld [vmem:[%s7411_s1 + $0x2d8] sm:$0xff] }
 0x1b5   :  { %v6406_v51 = vpop.f32.mrf.mxu1 }
 0x1b6   :  { %2356 = vmatmul.f32.gmra.mxu2 %v6000_v3  ;;  %2417 = vmatmul.f32.gmra.mxu3 %v5943_v27  ;;  %v67_v27 = vld [vmem:[%s7412_s0 + $0x1a8] sm:$0xff] }
 0x1b7   :  { %2498 = vmatmul.f32.gmra.mxu0 %v2497_v15  ;;  %v6446_v37 = vand.u32 4294901760, %v67_v27 }
 0x1b8   :  { %2639 = vmatmul.f32.gmra.mxu1 %v6327_v38  ;;  %v1620_v60 = vpop.f32.mrf.mxu2  ;;  %3224 = vmatpush.msra.mxu0 %v6450_v14 }
 0x1b9   :  { %v1694_v33 = vpop.f32.mrf.mxu3  ;;  %v1621_v41 = vadd.f32 %v1620_v60, %v1533_v58  ;;  %7639 = vst [vmem:[#allocation6_spill] sm:$0xff] %v6446_v37  ;;  %v1408_v58 = vadd.f32 %v6238_v61, %v6228_v23  ;;  %v3099_v60 = vsub.f32 %v6432_v40, %v7494_v43  ;;  %v6469_v61 = vand.u32 4294901760, %v161_v63 }
 0x1ba   :  { %v6441_v15 = vadd.f32 %v1694_v33, %v1616_v24  ;;  %v7497_v33 = vand.u32 4294901760, %v6450_v14  ;;  %v6475_v21 = vsub.f32 %v67_v27, %v6446_v37 }
 0x1bb   :  { %v6454_v24 = vpop.f32.mrf.mxu0  ;;  %v3100_v23 = vand.u32 4294901760, %v3099_v60  ;;  %v1537_v43 = vadd.f32 %v6242_v59, %v1408_v58  ;;  %2996 = vmatpush.msra.mxu2 %v6469_v61  ;;  %3311 = vmatpush.msra.mxu1 %v6469_v61 }
 0x1bc   :  { %v3105_v56 = vsub.f32 %v6450_v14, %v7497_v33  ;;  %v7502_v33 = vand.u32 4294901760, %v6475_v21 }
 0x1bd   :  { %v6460_v35 = vpop.f32.mrf.mxu1  ;;  %3101 = vmatpush.msra.mxu3 %v3100_v23 }
 0x1be   :  { %2360 = vmatmul.f32.gmra.mxu2 %v6056_v30  ;;  %2421 = vmatmul.f32.gmra.mxu3 %v6000_v3  ;;  %v6483_v3 = vsub.f32 %v161_v63, %v6469_v61  ;;  %v3106_v27 = vand.u32 4294901760, %v3105_v56  ;;  %v2513_v63 = vand.u32 4294901760, %v2512_v47  ;;  %v159_v47 = vld [vmem:[%s7411_s1 + $0x2c8] sm:$0xff] }
 0x1bf   :  { %2506 = vmatmul.f32.gmra.mxu0 %v2505_v46  ;;  %v160_v46 = vld [vmem:[%s7411_s1 + $0x2d0] sm:$0xff]  ;;  %v6518_v7 = vand.u32 4294901760, %v159_v47 }
 0x1c0   :  { %2643 = vmatmul.f32.gmra.mxu1 %v6351_v57  ;;  %v1625_v60 = vpop.f32.mrf.mxu2  ;;  %v6489_v12 = vand.u32 4294901760, %v160_v46  ;;  %v7500_v23 = vand.u32 4294901760, %v6483_v3  ;;  %3227 = vmatpush.msra.mxu0 %v6483_v3 }
 0x1c1   :  { %v1700_v25 = vpop.f32.mrf.mxu3  ;;  %v1626_v59 = vadd.f32 %v1625_v60, %v1537_v43  ;;  %3107 = vmatpush.msra.mxu3 %v3106_v27  ;;  %v1841_v27 = vadd.f32 %v6278_v4, %v1776_v1 }
 0x1c2   :  { %v6492_v58 = vadd.f32 %v1700_v25, %v1621_v41  ;;  %2998 = vmatpush.msra.mxu2 %v6489_v12  ;;  %v6499_v56 = vsub.f32 %v160_v46, %v6489_v12  ;;  %v3111_v41 = vsub.f32 %v6483_v3, %v7500_v23  ;;  %3313 = vmatpush.msra.mxu1 %v6489_v12 }
 0x1c3   :  { %v6503_v8 = vpop.f32.mrf.mxu0  ;;  %v2520_v46 = vsub.f32 %v6475_v21, %v7502_v33 }
 0x1c4   :  { %v7503_v25 = vand.u32 4294901760, %v6499_v56  ;;  %3230 = vmatpush.msra.mxu0 %v6499_v56  ;;  %v3112_v39 = vand.u32 4294901760, %v3111_v41  ;;  %3000 = vmatpush.msra.mxu2 %v6518_v7 }
 0x1c5   :  { %v6509_v43 = vpop.f32.mrf.mxu1  ;;  %3315 = vmatpush.msra.mxu1 %v6518_v7 }
 0x1c6   :  { %2425 = vmatmul.f32.gmra.mxu3 %v6056_v30  ;;  %2705 = vmatmul.f32.vlgmr.msrb.gmra.mxu2 %v6216_v45  ;;  %v3117_v60 = vsub.f32 %v6499_v56, %v7503_v25  ;;  %v6529_v30 = vsub.f32 %v159_v47, %v6518_v7  ;;  %v2521_v47 = vand.u32 4294901760, %v2520_v46  ;;  %v157_v46 = vld [vmem:[%s7411_s1 + $0x2b8] sm:$0xff]  ;;  %v156_v45 = vld [vmem:[%s7411_s1 + $0x2b0] sm:$0xff] }
 0x1c7   :  { %2514 = vmatmul.f32.gmra.mxu0 %v2513_v63  ;;  %3113 = vmatpush.msra.mxu3 %v3112_v39  ;;  %v158_v63 = vld [vmem:[%s7411_s1 + $0x2c0] sm:$0xff] }
 0x1c8   :  { %2647 = vmatmul.f32.gmra.mxu1 %v6392_v48  ;;  %v1909_v23 = vpop.f32.mrf.mxu2  ;;  %v3118_v54 = vand.u32 4294901760, %v3117_v60  ;;  %v6535_v33 = vand.u32 4294901760, %v158_v63  ;;  %v7505_v39 = vand.u32 4294901760, %v6529_v30  ;;  %3233 = vmatpush.msra.mxu0 %v6529_v30  ;;  %v1780_v60 = vadd.f32 %v6307_v42, %v6298_v36 }
 0x1c9   :  { %v1706_v41 = vpop.f32.mrf.mxu3  ;;  %v1910_v1 = vadd.f32 %v1909_v23, %v1841_v27  ;;  %v6564_v42 = vand.u32 4294901760, %v157_v46 }
 0x1ca   :  { %v6538_v4 = vadd.f32 %v1706_v41, %v1626_v59  ;;  %3119 = vmatpush.msra.mxu3 %v3118_v54  ;;  %3002 = vmatpush.msra.mxu2 %v6535_v33  ;;  %v6544_v25 = vsub.f32 %v158_v63, %v6535_v33  ;;  %v3123_v59 = vsub.f32 %v6529_v30, %v7505_v39 }
 0x1cb   :  { %v6548_v26 = vpop.f32.mrf.mxu0  ;;  %3317 = vmatpush.msra.mxu1 %v6535_v33  ;;  %v1845_v63 = vadd.f32 %v6309_v5, %v1780_v60  ;;  %v6572_v41 = vsub.f32 %v157_v46, %v6564_v42 }
 0x1cc   :  { %v7506_v54 = vand.u32 4294901760, %v6544_v25  ;;  %3236 = vmatpush.msra.mxu0 %v6544_v25  ;;  %v3124_v36 = vand.u32 4294901760, %v3123_v59  ;;  %3004 = vmatpush.msra.mxu2 %v6564_v42 }
 0x1cd   :  { %v6554_v23 = vpop.f32.mrf.mxu1  ;;  %3319 = vmatpush.msra.mxu1 %v6564_v42 }
 0x1ce   :  { %2710 = vmatmul.f32.gmra.mxu2 %v6252_v11  ;;  %2779 = vmatmul.f32.vlgmr.msrb.gmra.mxu3 %v2463_v31  ;;  %v3129_v27 = vsub.f32 %v6544_v25, %v7506_v54 }
 0x1cf   :  { %2522 = vmatmul.f32.gmra.mxu0 %v2521_v47  ;;  %3125 = vmatpush.msra.mxu3 %v3124_v36  ;;  %v6578_v47 = vand.u32 4294901760, %v156_v45  ;;  %v7507_v36 = vand.u32 4294901760, %v6572_v41 }
 0x1d0   :  { %2651 = vmatmul.f32.gmra.mxu1 %v6446_v37  ;;  %v1917_v31 = vpop.f32.mrf.mxu2  ;;  %v3130_v39 = vand.u32 4294901760, %v3129_v27  ;;  %3239 = vmatpush.msra.mxu0 %v6572_v41  ;;  %v1784_v27 = vadd.f32 %v6331_v28, %v6324_v20  ;;  %v7641_v20 = vand.u32 4294901760, %v6252_v11  ;;  %v154_v11 = vld [vmem:[%s7411_s1 + $0x2a0] sm:$0xff] }
 0x1d1   :  { %v2066_v59 = vpop.f32.mrf.mxu3  ;;  %v1918_v5 = vadd.f32 %v1917_v31, %v1845_v63  ;;  %3006 = vmatpush.msra.mxu2 %v6578_v47  ;;  %v6587_v46 = vsub.f32 %v156_v45, %v6578_v47  ;;  %3321 = vmatpush.msra.mxu1 %v6578_v47  ;;  %v155_v45 = vld [vmem:[%s7411_s1 + $0x2a8] sm:$0xff]  ;;  %v6622_v48 = vand.u32 4294901760, %v154_v11 }
 0x1d2   :  { %v6581_v60 = vadd.f32 %v2066_v59, %v1910_v1  ;;  %3131 = vmatpush.msra.mxu3 %v3130_v39  ;;  %v3135_v1 = vsub.f32 %v6572_v41, %v7507_v36  ;;  %v6607_v31 = vand.u32 4294901760, %v155_v45  ;;  %v1849_v36 = vadd.f32 %v6333_v19, %v1784_v27 }
 0x1d3   :  { %v7513_v39 = vand.u32 4294901760, %v6587_v46  ;;  %3242 = vmatpush.msra.mxu0 %v6587_v46 }
 0x1d4   :  { %v6591_v54 = vpop.f32.mrf.mxu0  ;;  %v3136_v28 = vand.u32 4294901760, %v3135_v1  ;;  %v6616_v37 = vsub.f32 %v155_v45, %v6607_v31  ;;  %3008 = vmatpush.msra.mxu2 %v6607_v31  ;;  %3323 = vmatpush.msra.mxu1 %v6607_v31  ;;  %v6631_v45 = vsub.f32 %v154_v11, %v6622_v48  ;;  %v153_v11 = vld [vmem:[%s7411_s1 + $0x298] sm:$0xff] }
 0x1d5   :  { %v6597_v63 = vpop.f32.mrf.mxu1  ;;  %v3141_v59 = vsub.f32 %v6587_v46, %v7513_v39 }
 0x1d6   :  { %7640 = vst [vmem:[#allocation13_spill] sm:$0xff] %v6597_v63  ;;  %2715 = vmatmul.f32.gmra.mxu2 %v6287_v34  ;;  %2785 = vmatmul.f32.gmra.mxu3 %v7641_v20 }
 0x1d7   :  { %2890 = vmatmul.f32.vlgmr.msrb.gmra.mxu0 %v6197_v13  ;;  %3137 = vmatpush.msra.mxu3 %v3136_v28  ;;  %v3142_v63 = vand.u32 4294901760, %v3141_v59  ;;  %v1788_v28 = vadd.f32 %v6355_v17, %v6348_v0  ;;  %v7645_v0 = vand.u32 4294901760, %v6287_v34 }
 0x1d8   :  { %2955 = vmatmul.f32.vlgmr.msrb.gmra.mxu1 %v6197_v13  ;;  %v7512_v13 = vand.u32 4294901760, %v6616_v37  ;;  %3245 = vmatpush.msra.mxu0 %v6616_v37 }
 0x1d9   :  { %v1925_v1 = vpop.f32.mrf.mxu2  ;;  %v2070_v20 = vpop.f32.mrf.mxu3  ;;  %3143 = vmatpush.msra.mxu3 %v3142_v63  ;;  %3010 = vmatpush.msra.mxu2 %v6622_v48  ;;  %v7514_v63 = vand.u32 4294901760, %v6631_v45  ;;  %v1853_v39 = vadd.f32 %v6357_v29, %v1788_v28 }
 0x1da   :  { %v1926_v19 = vadd.f32 %v1925_v1, %v1849_v36  ;;  %v6625_v27 = vadd.f32 %v2070_v20, %v1918_v5  ;;  %v3147_v5 = vsub.f32 %v6616_v37, %v7512_v13  ;;  %3325 = vmatpush.msra.mxu1 %v6622_v48  ;;  %3248 = vmatpush.msra.mxu0 %v6631_v45  ;;  %v6651_v1 = vand.u32 4294901760, %v153_v11  ;;  %v152_v13 = vld [vmem:[%s7411_s1 + $0x290] sm:$0xff] }
 0x1db   :  { %v3153_v20 = vsub.f32 %v6631_v45, %v7514_v63  ;;  %v151_v63 = vld [vmem:[%s7411_s1 + $0x288] sm:$0xff] }
 0x1dc   :  { %7642 = vst [vmem:[#allocation3_spill] sm:$0xff] %v6625_v27  ;;  %v6635_v59 = vpop.f32.mrf.mxu0  ;;  %v3148_v17 = vand.u32 4294901760, %v3147_v5  ;;  %v6663_v34 = vsub.f32 %v153_v11, %v6651_v1  ;;  %v6665_v5 = vand.u32 4294901760, %v152_v13  ;;  %3012 = vmatpush.msra.mxu2 %v6651_v1  ;;  %3327 = vmatpush.msra.mxu1 %v6651_v1 }
 0x1dd   :  { %7643 = vst [vmem:[#allocation10_spill] sm:$0xff] %v6635_v59  ;;  %v6641_v36 = vpop.f32.mrf.mxu1  ;;  %v3154_v59 = vand.u32 4294901760, %v3153_v20  ;;  %v150_v20 = vld [vmem:[%s7411_s1 + $0x280] sm:$0xff] }
 0x1de   :  { %7644 = vst [vmem:[#allocation7_spill] sm:$0xff] %v6641_v36  ;;  %2720 = vmatmul.f32.gmra.mxu2 %v6317_v53  ;;  %2791 = vmatmul.f32.gmra.mxu3 %v7645_v0  ;;  %v6676_v11 = vsub.f32 %v152_v13, %v6665_v5 }
 0x1df   :  { %2894 = vmatmul.f32.gmra.mxu0 %v6233_v9  ;;  %3149 = vmatpush.msra.mxu3 %v3148_v17  ;;  %7646 = vst [vmem:[#allocation14_spill] sm:$0xff] %v6665_v5  ;;  %v6680_v17 = vand.u32 4294901760, %v151_v63 }
 0x1e0   :  { %2959 = vmatmul.f32.gmra.mxu1 %v6233_v9  ;;  %v7515_v9 = vand.u32 4294901760, %v6663_v34  ;;  %7648 = vst [vmem:[#allocation9_spill] sm:$0xff] %v6676_v11  ;;  %3251 = vmatpush.msra.mxu0 %v6663_v34 }
 0x1e1   :  { %v1933_v0 = vpop.f32.mrf.mxu2  ;;  %v2074_v36 = vpop.f32.mrf.mxu3  ;;  %3155 = vmatpush.msra.mxu3 %v3154_v59  ;;  %3014 = vmatpush.msra.mxu2 %v6665_v5  ;;  %v6693_v59 = vand.u32 4294901760, %v150_v20 }
 0x1e2   :  { %v1934_v29 = vadd.f32 %v1933_v0, %v1853_v39  ;;  %v6672_v28 = vadd.f32 %v2074_v36, %v1926_v19  ;;  %v1792_v39 = vadd.f32 %v6401_v6, %v6387_v50  ;;  %v3159_v13 = vsub.f32 %v6663_v34, %v7515_v9  ;;  %3254 = vmatpush.msra.mxu0 %v6676_v11 }
 0x1e3   :  { %v7516_v36 = vand.u32 4294901760, %v6676_v11  ;;  %3329 = vmatpush.msra.mxu1 %v6665_v5  ;;  %3016 = vmatpush.msra.mxu2 %v6680_v17  ;;  %v6701_v50 = vsub.f32 %v151_v63, %v6680_v17  ;;  %v7651_v6 = vand.u32 4294901760, %v6317_v53 }
 0x1e4   :  { %7647 = vst [vmem:[#allocation8_spill] sm:$0xff] %v6672_v28  ;;  %v6687_v19 = vpop.f32.mrf.mxu0  ;;  %v3160_v9 = vand.u32 4294901760, %v3159_v13  ;;  %v6710_v28 = vsub.f32 %v150_v20, %v6693_v59 }
 0x1e5   :  { %7649 = vst [vmem:[#allocation11_spill] sm:$0xff] %v6687_v19  ;;  %v6697_v0 = vpop.f32.mrf.mxu1  ;;  %v3165_v19 = vsub.f32 %v6676_v11, %v7516_v36  ;;  %3018 = vmatpush.msra.mxu2 %v6693_v59  ;;  %v3170_v63 = vand.u32 4294901760, %v6701_v50  ;;  %v7652_v36 = vand.u32 4294901760, %v6379_v52  ;;  %3257 = vmatpush.msra.mxu0 %v6701_v50  ;;  %v1796_v52 = vadd.f32 %v6454_v24, %v6441_v15  ;;  %v19_v15 = vld [vmem:[%s7412_s0 + $0x28] sm:$0xff] }
 0x1e6   :  { %7650 = vst [vmem:[#allocation2_spill] sm:$0xff] %v6697_v0  ;;  %2725 = vmatmul.f32.gmra.mxu2 %v6341_v49  ;;  %2797 = vmatmul.f32.gmra.mxu3 %v7651_v6  ;;  %v1857_v0 = vadd.f32 %v6406_v51, %v1792_v39  ;;  %v3176_v13 = vand.u32 4294901760, %v6710_v28 }
 0x1e7   :  { %2898 = vmatmul.f32.gmra.mxu0 %v6269_v18  ;;  %3161 = vmatpush.msra.mxu3 %v3160_v9  ;;  %v3166_v53 = vand.u32 4294901760, %v3165_v19  ;;  %v3171_v20 = vsub.f32 %v6701_v50, %v3170_v63  ;;  %v7653_v9 = vand.u32 4294901760, %v6396_v16  ;;  %v7654_v19 = vand.u32 4294901760, %v6432_v40  ;;  %v47_v50 = vld [vmem:[%s7412_s0 + $0x108] sm:$0xff] }
 0x1e8   :  { %2963 = vmatmul.f32.gmra.mxu1 %v6269_v18  ;;  %3386 = vmatpush.msrb.mxu2 %v7652_v36  ;;  %v3177_v18 = vsub.f32 %v6710_v28, %v3176_v13  ;;  %v7655_v16 = vand.u32 4294901760, %v6341_v49  ;;  %v1861_v24 = vadd.f32 %v6460_v35, %v1796_v52  ;;  %v7656_v49 = vand.u32 4294901760, %v6450_v14 }
 0x1e9   :  { %v1941_v6 = vpop.f32.mrf.mxu2  ;;  %v2078_v27 = vpop.f32.mrf.mxu3  ;;  %3167 = vmatpush.msra.mxu3 %v3166_v53  ;;  %3331 = vmatpush.msra.mxu1 %v6680_v17  ;;  %v3172_v51 = vand.u32 4294901760, %v3171_v20  ;;  %v7657_v20 = vand.u32 4294901760, %v6483_v3 }
 0x1ea   :  { %v1942_v5 = vadd.f32 %v1941_v6, %v1857_v0  ;;  %v6724_v11 = vadd.f32 %v2078_v27, %v1934_v29  ;;  %3390 = vmatpush.msrb.mxu2 %v7653_v9  ;;  %3260 = vmatpush.msra.mxu0 %v6710_v28  ;;  %v3178_v27 = vand.u32 4294901760, %v3177_v18  ;;  %v6752_v0 = vand.u32 4294901760, %v19_v15 }
 0x1eb   :  { %3333 = vmatpush.msra.mxu1 %v6693_v59  ;;  %3173 = vmatpush.msra.mxu3 %v3172_v51  ;;  %v6908_v28 = vand.u32 4294901760, %v47_v50 }
 0x1ec   :  { %v6735_v39 = vpop.f32.mrf.mxu0  ;;  %3394 = vmatpush.msrb.mxu2 %v7654_v19  ;;  %v6769_v14 = vsub.f32 %v19_v15, %v6752_v0  ;;  %v7662_v19 = vand.u32 4294901760, %v6572_v41  ;;  %v7664_v41 = vand.u32 4294901760, %v6587_v46 }
 0x1ed   :  { %v6738_v29 = vpop.f32.mrf.mxu1  ;;  %3179 = vmatpush.msra.mxu3 %v3178_v27 }
 0x1ee   :  { %2730 = vmatmul.f32.gmra.mxu2 %v6370_v32  ;;  %2803 = vmatmul.f32.gmra.mxu3 %v7655_v16  ;;  %v3021_v51 = vand.u32 4294901760, %v6769_v14 }
 0x1ef   :  { %2902 = vmatmul.f32.gmra.mxu0 %v6303_v62  ;;  %3481 = vmatpush.msrb.mxu3 %v6364_v44 }
 0x1f0   :  { %2967 = vmatmul.f32.gmra.mxu1 %v6303_v62  ;;  %3398 = vmatpush.msrb.mxu2 %v7656_v49  ;;  %v1800_v62 = vadd.f32 %v6503_v8, %v6492_v58  ;;  %v26_v8 = vld [vmem:[%s7412_s0 + $0x60] sm:$0xff]  ;;  %v3022_v15 = vsub.f32 %v6769_v14, %v3021_v51 }
 0x1f1   :  { %v1949_v40 = vpop.f32.mrf.mxu2  ;;  %v2082_v36 = vpop.f32.mrf.mxu3  ;;  %3483 = vmatpush.msrb.mxu3 %v6384_v55  ;;  %v7659_v55 = vand.u32 4294901760, %v6370_v32  ;;  %v7660_v32 = vand.u32 4294901760, %v6529_v30  ;;  %v6794_v27 = vand.u32 4294901760, %v26_v8 }
 0x1f2   :  { %v1950_v53 = vadd.f32 %v1949_v40, %v1861_v24  ;;  %v6756_v6 = vadd.f32 %v2082_v36, %v1942_v5  ;;  %3402 = vmatpush.msrb.mxu2 %v7657_v20  ;;  %v7658_v5 = vand.u32 4294901760, %v6499_v56  ;;  %v1865_v3 = vadd.f32 %v6509_v43, %v1800_v62 }
 0x1f3   :  { %3485 = vmatpush.msrb.mxu3 %v6415_v10  ;;  %v167_v10 = vld [vmem:[%s7411_s1 + $0x308] sm:$0xff]  ;;  %v1804_v43 = vadd.f32 %v6548_v26, %v6538_v4  ;;  %v6820_v26 = vsub.f32 %v26_v8, %v6794_v27  ;;  %v33_v4 = vld [vmem:[%s7412_s0 + $0x98] sm:$0xff]  ;;  %v3023_v36 = vand.u32 4294901760, %v3022_v15 }
 0x1f4   :  { %v6763_v35 = vpop.f32.mrf.mxu0  ;;  %3406 = vmatpush.msrb.mxu2 %v7658_v5  ;;  %v6786_v58 = vand.u32 4294901760, %v167_v10  ;;  %v6838_v62 = vand.u32 4294901760, %v33_v4  ;;  %v7667_v5 = vand.u32 4294901760, %v6475_v21 }
 0x1f5   :  { %v6766_v44 = vpop.f32.mrf.mxu1  ;;  %3487 = vmatpush.msrb.mxu3 %v6438_v2  ;;  %v7661_v2 = vand.u32 4294901760, %v6544_v25  ;;  %v3029_v20 = vand.u32 4294901760, %v6820_v26 }
 0x1f6   :  { %2735 = vmatmul.f32.gmra.mxu2 %v6421_v22  ;;  %2809 = vmatmul.f32.gmra.mxu3 %v7659_v55 }
 0x1f7   :  { %2906 = vmatmul.f32.gmra.mxu0 %v6327_v38  ;;  %3410 = vmatpush.msrb.mxu2 %v7660_v32 }
 0x1f8   :  { %2971 = vmatmul.f32.gmra.mxu1 %v6327_v38  ;;  %3489 = vmatpush.msrb.mxu3 %v6469_v61  ;;  %v6798_v38 = vsub.f32 %v167_v10, %v6786_v58 }
 0x1f9   :  { %v1957_v56 = vpop.f32.mrf.mxu2  ;;  %v2086_v18 = vpop.f32.mrf.mxu3  ;;  %3560 = vmatpush.msrb.mxu0 %v6786_v58  ;;  %3414 = vmatpush.msrb.mxu2 %v7661_v2  ;;  %v7673_v2 = vld [vmem:[#allocation14_spill] sm:$0xff] }
 0x1fa   :  { %v1958_v9 = vadd.f32 %v1957_v56, %v1865_v3  ;;  %v6792_v52 = vadd.f32 %v2086_v18, %v1950_v53  ;;  %3491 = vmatpush.msrb.mxu3 %v6489_v12  ;;  %v3644_v61 = vand.u32 4294901760, %v6798_v38  ;;  %v7663_v12 = vand.u32 4294901760, %v6421_v22 }
 0x1fb   :  { %3418 = vmatpush.msrb.mxu2 %v7662_v19 }
 0x1fc   :  { %v6805_v30 = vpop.f32.mrf.mxu0  ;;  %3493 = vmatpush.msrb.mxu3 %v6518_v7  ;;  %v3645_v25 = vsub.f32 %v6798_v38, %v3644_v61  ;;  %v1869_v7 = vadd.f32 %v6554_v23, %v1804_v43  ;;  %v7674_v43 = vld [vmem:[#allocation3_spill] sm:$0xff] }
 0x1fd   :  { %v6810_v16 = vpop.f32.mrf.mxu1  ;;  %3422 = vmatpush.msrb.mxu2 %v7664_v41 }
 0x1fe   :  { %2740 = vmatmul.f32.gmra.mxu2 %v6475_v21  ;;  %2815 = vmatmul.f32.gmra.mxu3 %v7663_v12  ;;  %v3646_v22 = vand.u32 4294901760, %v3645_v25  ;;  %v7670_v21 = vand.u32 4294901760, %v6663_v34  ;;  %v7675_v34 = vld [vmem:[#allocation10_spill] sm:$0xff] }
 0x1ff   :  { %2910 = vmatmul.f32.gmra.mxu0 %v6351_v57  ;;  %3495 = vmatpush.msrb.mxu3 %v6535_v33  ;;  %v7665_v33 = vand.u32 4294901760, %v6616_v37  ;;  %v3030_v37 = vsub.f32 %v6820_v26, %v3029_v20  ;;  %v2154_v19 = vadd.f32 %v7675_v34, %v7674_v43 }
 0x200   :  { %2975 = vmatmul.f32.gmra.mxu1 %v6351_v57  ;;  %v2149_v57 = vadd.f32 %v6591_v54, %v6581_v60  ;;  %v40_v54 = vld [vmem:[%s7412_s0 + $0xd0] sm:$0xff]  ;;  %v7668_v60 = vld [vmem:[#allocation5_spill] sm:$0xff] }
 0x201   :  { %v1965_v24 = vpop.f32.mrf.mxu2  ;;  %v2090_v40 = vpop.f32.mrf.mxu3  ;;  %3497 = vmatpush.msrb.mxu3 %v6564_v42  ;;  %3647 = vmatpush.msrb.mxu1 %v3646_v22  ;;  %v7666_v42 = vand.u32 4294901760, %v6631_v45  ;;  %v6869_v10 = vand.u32 4294901760, %v40_v54  ;;  %v3031_v56 = vand.u32 4294901760, %v3030_v37  ;;  %v54_v37 = vld [vmem:[%s7412_s0 + $0x140] sm:$0xff] }
 0x202   :  { %v1966_v49 = vadd.f32 %v1965_v24, %v1869_v7  ;;  %v6835_v53 = vadd.f32 %v2090_v40, %v1958_v9  ;;  %3426 = vmatpush.msrb.mxu2 %v7665_v33 }
 0x203   :  { %3499 = vmatpush.msrb.mxu3 %v6578_v47  ;;  %v6858_v47 = vsub.f32 %v33_v4, %v6838_v62  ;;  %v6887_v12 = vsub.f32 %v40_v54, %v6869_v10  ;;  %v7676_v4 = vld [vmem:[#allocation6_spill] sm:$0xff] }
 0x204   :  { %v6845_v23 = vpop.f32.mrf.mxu0  ;;  %3430 = vmatpush.msrb.mxu2 %v7666_v42  ;;  %v166_v54 = vld [vmem:[%s7411_s1 + $0x300] sm:$0xff] }
 0x205   :  { %v6849_v46 = vpop.f32.mrf.mxu1  ;;  %3501 = vmatpush.msrb.mxu3 %v6607_v31  ;;  %v7669_v31 = vld [vmem:[#allocation13_spill] sm:$0xff]  ;;  %v3037_v18 = vand.u32 4294901760, %v6858_v47  ;;  %v3045_v41 = vand.u32 4294901760, %v6887_v12 }
 0x206   :  { %2821 = vmatmul.f32.gmra.mxu3 %v7667_v5  ;;  %3024 = vmatmul.f32.vlgmr.msra.gmra.mxu2 %v3023_v36  ;;  %v2223_v45 = vadd.f32 %v7669_v31, %v2149_v57  ;;  %v6921_v5 = vsub.f32 %v47_v50, %v6908_v28 }
 0x207   :  { %2914 = vmatmul.f32.gmra.mxu0 %v7668_v60  ;;  %3503 = vmatpush.msrb.mxu3 %v6622_v48  ;;  %v7671_v48 = vld [vmem:[#allocation9_spill] sm:$0xff]  ;;  %v3038_v25 = vsub.f32 %v6858_v47, %v3037_v18  ;;  %v3046_v42 = vsub.f32 %v6887_v12, %v3045_v41 }
 0x208   :  { %2979 = vmatmul.f32.gmra.mxu1 %v7668_v60  ;;  %3434 = vmatpush.msrb.mxu2 %v7670_v21  ;;  %v7672_v9 = vand.u32 4294901760, %v7671_v48  ;;  %v7680_v60 = vld [vmem:[#allocation2_spill] sm:$0xff] }
 0x209   :  { %v2094_v55 = vpop.f32.mrf.mxu3  ;;  %v2333_v8 = vpop.f32.mrf.mxu2  ;;  %3505 = vmatpush.msrb.mxu3 %v6651_v1  ;;  %v3039_v36 = vand.u32 4294901760, %v3038_v25 }
 0x20a   :  { %v6872_v3 = vadd.f32 %v2094_v55, %v1966_v49  ;;  %v2334_v32 = vadd.f32 %v2333_v8, %v2223_v45  ;;  %3438 = vmatpush.msrb.mxu2 %v7672_v9  ;;  %v7679_v49 = vld [vmem:[#allocation11_spill] sm:$0xff]  ;;  %v3561_v45 = vand.u32 4294901760, %v166_v54  ;;  %v3047_v8 = vand.u32 4294901760, %v3046_v42 }
 0x20b   :  { %3507 = vmatpush.msrb.mxu3 %v7673_v2  ;;  %v3053_v9 = vand.u32 4294901760, %v6921_v5 }
 0x20c   :  { %v6880_v15 = vpop.f32.mrf.mxu0  ;;  %3442 = vmatpush.msrb.mxu2 %v3170_v63  ;;  %v7677_v63 = vld [vmem:[#allocation7_spill] sm:$0xff]  ;;  %3562 = vmatpush.msrb.mxu0 %v3561_v45  ;;  %v3649_v2 = vsub.f32 %v166_v54, %v3561_v45 }
 0x20d   :  { %v6884_v1 = vpop.f32.mrf.mxu1  ;;  %3509 = vmatpush.msrb.mxu3 %v6680_v17  ;;  %v2229_v7 = vadd.f32 %v7677_v63, %v2154_v19 }
 0x20e   :  { %3032 = vmatmul.f32.gmra.mxu2 %v3031_v56  ;;  %3181 = vmatmul.f32.vlgmr.msra.gmra.mxu3 %v6752_v0  ;;  %v3650_v43 = vand.u32 4294901760, %v3649_v2 }
 0x20f   :  { %2918 = vmatmul.f32.gmra.mxu0 %v7676_v4  ;;  %3446 = vmatpush.msrb.mxu2 %v3176_v13  ;;  %v7678_v13 = vld [vmem:[#allocation8_spill] sm:$0xff] }
 0x210   :  { %2983 = vmatmul.f32.gmra.mxu1 %v7676_v4  ;;  %3511 = vmatpush.msrb.mxu3 %v6693_v59  ;;  %v2159_v33 = vadd.f32 %v7679_v49, %v7678_v13 }
 0x211   :  { %v2337_v17 = vpop.f32.mrf.mxu2  ;;  %v2398_v22 = vpop.f32.mrf.mxu3  ;;  %3703 = vmatpush.msra.mxu2 %v6798_v38  ;;  %v3054_v38 = vsub.f32 %v6921_v5, %v3053_v9 }
 0x212   :  { %3763 = vmatpush.msra.mxu3 %v6786_v58  ;;  %v2338_v24 = vadd.f32 %v2337_v17, %v2229_v7  ;;  %v6906_v40 = vadd.f32 %v2398_v22, %v2334_v32  ;;  %v2235_v31 = vadd.f32 %v7680_v60, %v2159_v33  ;;  %v6933_v32 = vand.u32 4294901760, %v54_v37 }
 0x213   :  { %3706 = vmatpush.msra.mxu2 %v3649_v2  ;;  %v3055_v22 = vand.u32 4294901760, %v3054_v38 }
 0x214   :  { %v6912_v57 = vpop.f32.mrf.mxu0  ;;  %3765 = vmatpush.msra.mxu3 %v3561_v45  ;;  %v6947_v19 = vsub.f32 %v54_v37, %v6933_v32 }
 0x215   :  { %v6914_v59 = vpop.f32.mrf.mxu1 }
 0x216   :  { %3040 = vmatmul.f32.gmra.mxu2 %v3039_v36  ;;  %3185 = vmatmul.f32.gmra.mxu3 %v6794_v27  ;;  %v3061_v63 = vand.u32 4294901760, %v6947_v19 }
 0x217   :  { %3263 = vmatmul.f32.vlgmr.msra.gmra.mxu0 %v6769_v14  ;;  %v2164_v14 = vadd.f32 %v6735_v39, %v6724_v11  ;;  %v61_v11 = vld [vmem:[%s7412_s0 + $0x178] sm:$0xff] }
 0x218   :  { %3337 = vmatmul.f32.vlgmr.msra.gmra.mxu1 %v3021_v51  ;;  %3832 = vmatpush.msra.mxu0 %v3644_v61  ;;  %v3651_v61 = vsub.f32 %v3649_v2, %v3650_v43  ;;  %v3062_v36 = vsub.f32 %v6947_v19, %v3061_v63 }
 0x219   :  { %v2341_v21 = vpop.f32.mrf.mxu2  ;;  %v2402_v55 = vpop.f32.mrf.mxu3  ;;  %v2241_v39 = vadd.f32 %v6738_v29, %v2164_v14  ;;  %v2169_v29 = vadd.f32 %v6763_v35, %v6756_v6  ;;  %v68_v6 = vld [vmem:[%s7412_s0 + $0x1b0] sm:$0xff]  ;;  %v2179_v14 = vadd.f32 %v6845_v23, %v6835_v53 }
 0x21a   :  { %v2342_v56 = vadd.f32 %v2341_v21, %v2235_v31  ;;  %v6935_v48 = vadd.f32 %v2402_v55, %v2338_v24  ;;  %v3652_v25 = vand.u32 4294901760, %v3651_v61  ;;  %3836 = vmatpush.msra.mxu0 %v3650_v43  ;;  %v6963_v24 = vand.u32 4294901760, %v61_v11 }
 0x21b   :  { %v2247_v35 = vadd.f32 %v6766_v44, %v2169_v29  ;;  %v3063_v33 = vand.u32 4294901760, %v3062_v36  ;;  %v6989_v60 = vand.u32 4294901760, %v68_v6  ;;  %v2174_v31 = vadd.f32 %v6805_v30, %v6792_v52 }
 0x21c   :  { %v6942_v51 = vpop.f32.mrf.mxu0  ;;  %3653 = vmatpush.msrb.mxu1 %v3652_v25  ;;  %v6977_v13 = vsub.f32 %v61_v11, %v6963_v24  ;;  %v2468_v29 = vadd.f32 %v6912_v57, %v6906_v40 }
 0x21d   :  { %v6944_v34 = vpop.f32.mrf.mxu1 }
 0x21e   :  { %3048 = vmatmul.f32.gmra.mxu2 %v3047_v8  ;;  %3189 = vmatmul.f32.gmra.mxu3 %v6838_v62  ;;  %v3069_v54 = vand.u32 4294901760, %v6977_v13 }
 0x21f   :  { %3268 = vmatmul.f32.gmra.mxu0 %v6820_v26  ;;  %3885 = vmatpush.msra.mxu1 %v6786_v58 }
 0x220   :  { %3343 = vmatmul.f32.gmra.mxu1 %v3029_v20  ;;  %v3070_v44 = vsub.f32 %v6977_v13, %v3069_v54 }
 0x221   :  { %v2345_v4 = vpop.f32.mrf.mxu2  ;;  %v2406_v50 = vpop.f32.mrf.mxu3  ;;  %3887 = vmatpush.msra.mxu1 %v3561_v45 }
 0x222   :  { %v2346_v7 = vadd.f32 %v2345_v4, %v2241_v39  ;;  %v6961_v17 = vadd.f32 %v2406_v50, %v2342_v56  ;;  %v3071_v56 = vand.u32 4294901760, %v3070_v44  ;;  %v2184_v39 = vadd.f32 %v6880_v15, %v6872_v3 }
 0x224   :  { %v6968_v26 = vpop.f32.mrf.mxu0 }
 0x225   :  { %v6970_v20 = vpop.f32.mrf.mxu1 }
 0x226   :  { %3056 = vmatmul.f32.gmra.mxu2 %v3055_v22  ;;  %3193 = vmatmul.f32.gmra.mxu3 %v6869_v10 }
 0x227   :  { %3273 = vmatmul.f32.gmra.mxu0 %v6858_v47  ;;  %v7000_v47 = vsub.f32 %v68_v6, %v6989_v60 }
 0x228   :  { %3349 = vmatmul.f32.gmra.mxu1 %v3037_v18  ;;  %v2253_v18 = vadd.f32 %v6810_v16, %v2174_v31 }
 0x229   :  { %v2349_v58 = vpop.f32.mrf.mxu2  ;;  %v2410_v49 = vpop.f32.mrf.mxu3  ;;  %v3077_v2 = vand.u32 4294901760, %v7000_v47 }
 0x22a   :  { %v2350_v42 = vadd.f32 %v2349_v58, %v2247_v35  ;;  %v6986_v37 = vadd.f32 %v2410_v49, %v2346_v7 }
 0x22b   :  { %v3078_v16 = vsub.f32 %v7000_v47, %v3077_v2 }
 0x22c   :  { %v6993_v45 = vpop.f32.mrf.mxu0 }
 0x22d   :  { %v6995_v21 = vpop.f32.mrf.mxu1  ;;  %v3079_v23 = vand.u32 4294901760, %v3078_v16  ;;  %v2484_v16 = vadd.f32 %v6968_v26, %v6961_v17 }
 0x22e   :  { %3064 = vmatmul.f32.gmra.mxu2 %v3063_v33  ;;  %3197 = vmatmul.f32.gmra.mxu3 %v6908_v28 }
 0x22f   :  { %3278 = vmatmul.f32.gmra.mxu0 %v6887_v12  ;;  %v2259_v12 = vadd.f32 %v6849_v46, %v2179_v14  ;;  %v20_v46 = vld [vmem:[%s7412_s0 + $0x30] sm:$0xff]  ;;  %v2633_v17 = vadd.f32 %v6970_v20, %v2484_v16 }
 0x230   :  { %3355 = vmatmul.f32.gmra.mxu1 %v3045_v41  ;;  %v174_v3 = vsel %vm172_vm0, %v20_v46, 0 }
 0x231   :  { %v2353_v52 = vpop.f32.mrf.mxu2  ;;  %v2414_v30 = vpop.f32.mrf.mxu3  ;;  %v7040_v22 = vand.u32 4294901760, %v174_v3 }
 0x232   :  { %v2354_v55 = vadd.f32 %v2353_v52, %v2253_v18  ;;  %v7006_v8 = vadd.f32 %v2414_v30, %v2350_v42 }
 0x234   :  { %v7011_v43 = vpop.f32.mrf.mxu0 }
 0x235   :  { %v7013_v38 = vpop.f32.mrf.mxu1 }
 0x236   :  { %3072 = vmatmul.f32.gmra.mxu2 %v3071_v56  ;;  %3201 = vmatmul.f32.gmra.mxu3 %v6933_v32 }
 0x237   :  { %3283 = vmatmul.f32.gmra.mxu0 %v6921_v5  ;;  %v2265_v5 = vadd.f32 %v6884_v1, %v2184_v39  ;;  %v27_v1 = vld [vmem:[%s7412_s0 + $0x68] sm:$0xff] }
 0x238   :  { %3361 = vmatmul.f32.gmra.mxu1 %v3053_v9  ;;  %v177_v40 = vsel %vm172_vm0, %v27_v1, 0 }
 0x239   :  { %v2357_v41 = vpop.f32.mrf.mxu2  ;;  %v2418_v61 = vpop.f32.mrf.mxu3  ;;  %v7062_v42 = vand.u32 4294901760, %v177_v40 }
 0x23a   :  { %v2358_v11 = vadd.f32 %v2357_v41, %v2259_v12  ;;  %v7021_v53 = vadd.f32 %v2418_v61, %v2354_v55 }
 0x23c   :  { %v7025_v25 = vpop.f32.mrf.mxu0 }
 0x23d   :  { %v7027_v4 = vpop.f32.mrf.mxu1 }
 0x23e   :  { %3080 = vmatmul.f32.gmra.mxu2 %v3079_v23  ;;  %3205 = vmatmul.f32.gmra.mxu3 %v6963_v24 }
 0x23f   :  { %3288 = vmatmul.f32.gmra.mxu0 %v6947_v19  ;;  %v7055_v19 = vsub.f32 %v174_v3, %v7040_v22 }
 0x240   :  { %3367 = vmatmul.f32.gmra.mxu1 %v3061_v63  ;;  %v2625_v63 = vadd.f32 %v6914_v59, %v2468_v29  ;;  %v34_v59 = vld [vmem:[%s7412_s0 + $0xa0] sm:$0xff] }
 0x241   :  { %v2361_v15 = vpop.f32.mrf.mxu2  ;;  %v2422_v9 = vpop.f32.mrf.mxu3  ;;  %v3565_v33 = vand.u32 4294901760, %v7055_v19  ;;  %v180_v18 = vsel %vm172_vm0, %v34_v59, 0  ;;  %v2500_v59 = vadd.f32 %v7011_v43, %v7006_v8 }
 0x242   :  { %v2362_v50 = vadd.f32 %v2361_v15, %v2265_v5  ;;  %v7038_v7 = vadd.f32 %v2422_v9, %v2358_v11  ;;  %v7087_v14 = vand.u32 4294901760, %v180_v18  ;;  %v2492_v15 = vadd.f32 %v6993_v45, %v6986_v37 }
 0x243   :  { %v2641_v8 = vadd.f32 %v7013_v38, %v2500_v59 }
 0x244   :  { %v7044_v36 = vpop.f32.mrf.mxu0  ;;  %v7104_v61 = vsub.f32 %v180_v18, %v7087_v14  ;;  %v2637_v37 = vadd.f32 %v6995_v21, %v2492_v15 }
 0x245   :  { %v7046_v6 = vpop.f32.mrf.mxu1 }
 0x246   :  { %3209 = vmatmul.f32.gmra.mxu3 %v6989_v60  ;;  %3448 = vmatmul.f32.vlgmr.msrb.gmra.mxu2 %v6752_v0  ;;  %v3581_v5 = vand.u32 4294901760, %v7104_v61 }
 0x247   :  { %3293 = vmatmul.f32.gmra.mxu0 %v6977_v13  ;;  %v2476_v13 = vadd.f32 %v6942_v51, %v6935_v48  ;;  %v7080_v48 = vsub.f32 %v177_v40, %v7062_v42 }
 0x248   :  { %3373 = vmatmul.f32.gmra.mxu1 %v3069_v54  ;;  %v3566_v54 = vsub.f32 %v7055_v19, %v3565_v33  ;;  %v3582_v29 = vsub.f32 %v7104_v61, %v3581_v5 }
 0x249   :  { %v2426_v57 = vpop.f32.mrf.mxu3  ;;  %v2706_v35 = vpop.f32.mrf.mxu2  ;;  %v2629_v51 = vadd.f32 %v6944_v34, %v2476_v13  ;;  %v41_v34 = vld [vmem:[%s7412_s0 + $0xd8] sm:$0xff] }
 0x24a   :  { %v7059_v58 = vadd.f32 %v2426_v57, %v2362_v50  ;;  %v2707_v49 = vadd.f32 %v2706_v35, %v2625_v63  ;;  %v183_v26 = vsel %vm172_vm0, %v41_v34, 0  ;;  %v48_v50 = vld [vmem:[%s7412_s0 + $0x110] sm:$0xff] }
 0x24b   :  { %v7112_v3 = vand.u32 4294901760, %v183_v26  ;;  %v186_v45 = vsel %vm172_vm0, %v48_v50, 0 }
 0x24c   :  { %v7066_v31 = vpop.f32.mrf.mxu0  ;;  %v7137_v13 = vand.u32 4294901760, %v186_v45 }
 0x24d   :  { %v7068_v44 = vpop.f32.mrf.mxu1  ;;  %v7129_v1 = vsub.f32 %v183_v26, %v7112_v3 }
 0x24e   :  { %3452 = vmatmul.f32.gmra.mxu2 %v6794_v27  ;;  %3513 = vmatmul.f32.vlgmr.msrb.gmra.mxu3 %v6752_v0  ;;  %v3567_v0 = vand.u32 4294901760, %v3566_v54 }
 0x24f   :  { %3298 = vmatmul.f32.gmra.mxu0 %v7000_v47  ;;  %v3573_v47 = vand.u32 4294901760, %v7080_v48 }
 0x250   :  { %3379 = vmatmul.f32.gmra.mxu1 %v3077_v2 }
 0x251   :  { %v2711_v52 = vpop.f32.mrf.mxu2  ;;  %v2780_v30 = vpop.f32.mrf.mxu3  ;;  %v3574_v2 = vsub.f32 %v7080_v48, %v3573_v47 }
 0x252   :  { %v2712_v55 = vadd.f32 %v2711_v52, %v2629_v51  ;;  %v7084_v56 = vadd.f32 %v2780_v30, %v2707_v49  ;;  %v3589_v49 = vand.u32 4294901760, %v7129_v1  ;;  %v55_v51 = vld [vmem:[%s7412_s0 + $0x148] sm:$0xff]  ;;  %v7154_v52 = vsub.f32 %v186_v45, %v7137_v13 }
 0x253   :  { %v189_v43 = vsel %vm172_vm0, %v55_v51, 0 }
 0x254   :  { %v7091_v12 = vpop.f32.mrf.mxu0  ;;  %v3590_v18 = vsub.f32 %v7129_v1, %v3589_v49  ;;  %v3597_v34 = vand.u32 4294901760, %v7154_v52 }
 0x255   :  { %v7093_v41 = vpop.f32.mrf.mxu1 }
 0x256   :  { %3456 = vmatmul.f32.gmra.mxu2 %v6838_v62  ;;  %3517 = vmatmul.f32.gmra.mxu3 %v6794_v27  ;;  %v3575_v27 = vand.u32 4294901760, %v3574_v2  ;;  %v7162_v2 = vand.u32 4294901760, %v189_v43 }
 0x257   :  { %3568 = vmatmul.f32.vlgmr.msrb.gmra.mxu0 %v3567_v0 }
 0x258   :  { %3655 = vmatmul.f32.vlgmr.msrb.gmra.mxu1 %v7040_v22 }
 0x259   :  { %v2716_v11 = vpop.f32.mrf.mxu2  ;;  %v2786_v23 = vpop.f32.mrf.mxu3 }
 0x25a   :  { %v2717_v39 = vadd.f32 %v2716_v11, %v2633_v17  ;;  %v7109_v46 = vadd.f32 %v2786_v23, %v2712_v55  ;;  %v2508_v17 = vadd.f32 %v7025_v25, %v7021_v53  ;;  %v62_v11 = vld [vmem:[%s7412_s0 + $0x180] sm:$0xff]  ;;  %v3598_v23 = vsub.f32 %v7154_v52, %v3597_v34 }
 0x25b   :  { %v192_v25 = vsel %vm172_vm0, %v62_v11, 0 }
 0x25c   :  { %v7116_v9 = vpop.f32.mrf.mxu0  ;;  %v2645_v53 = vadd.f32 %v7027_v4, %v2508_v17  ;;  %v7187_v45 = vand.u32 4294901760, %v192_v25 }
 0x25d   :  { %v7118_v20 = vpop.f32.mrf.mxu1 }
 0x25e   :  { %3460 = vmatmul.f32.gmra.mxu2 %v6869_v10  ;;  %3521 = vmatmul.f32.gmra.mxu3 %v6838_v62  ;;  %v3583_v62 = vand.u32 4294901760, %v3582_v29  ;;  %v7204_v59 = vsub.f32 %v192_v25, %v7187_v45 }
 0x25f   :  { %3576 = vmatmul.f32.gmra.mxu0 %v3575_v27 }
 0x260   :  { %3659 = vmatmul.f32.gmra.mxu1 %v7062_v42 }
 0x261   :  { %v2721_v63 = vpop.f32.mrf.mxu2  ;;  %v2792_v40 = vpop.f32.mrf.mxu3 }
 0x262   :  { %v2722_v57 = vadd.f32 %v2721_v63, %v2637_v37  ;;  %v7134_v35 = vadd.f32 %v2792_v40, %v2717_v39  ;;  %v7179_v39 = vsub.f32 %v189_v43, %v7162_v2  ;;  %v2516_v63 = vadd.f32 %v7044_v36, %v7038_v7 }
 0x264   :  { %v7141_v54 = vpop.f32.mrf.mxu0  ;;  %v3605_v37 = vand.u32 4294901760, %v7179_v39  ;;  %v2649_v7 = vadd.f32 %v7046_v6, %v2516_v63 }
 0x265   :  { %v7143_v21 = vpop.f32.mrf.mxu1 }
 0x266   :  { %3464 = vmatmul.f32.gmra.mxu2 %v6908_v28  ;;  %3525 = vmatmul.f32.gmra.mxu3 %v6869_v10  ;;  %v3591_v10 = vand.u32 4294901760, %v3590_v18 }
 0x267   :  { %3584 = vmatmul.f32.gmra.mxu0 %v3583_v62  ;;  %v3606_v62 = vsub.f32 %v7179_v39, %v3605_v37 }
 0x268   :  { %3663 = vmatmul.f32.gmra.mxu1 %v7087_v14 }
 0x269   :  { %v2726_v30 = vpop.f32.mrf.mxu2  ;;  %v2798_v55 = vpop.f32.mrf.mxu3 }
 0x26a   :  { %v2727_v0 = vadd.f32 %v2726_v30, %v2641_v8  ;;  %v7159_v16 = vadd.f32 %v2798_v55, %v2722_v57  ;;  %v69_v57 = vld [vmem:[%s7412_s0 + $0x1b8] sm:$0xff]  ;;  %v3613_v30 = vand.u32 4294901760, %v7204_v59 }
 0x26b   :  { %v195_v36 = vsel %vm172_vm0, %v69_v57, 0 }
 0x26c   :  { %v7166_v26 = vpop.f32.mrf.mxu0  ;;  %v7212_v55 = vand.u32 4294901760, %v195_v36  ;;  %v3614_v17 = vsub.f32 %v7204_v59, %v3613_v30 }
 0x26d   :  { %v7168_v38 = vpop.f32.mrf.mxu1 }
 0x26e   :  { %3468 = vmatmul.f32.gmra.mxu2 %v6933_v32  ;;  %3529 = vmatmul.f32.gmra.mxu3 %v6908_v28  ;;  %v3599_v28 = vand.u32 4294901760, %v3598_v23  ;;  %v7226_v11 = vsub.f32 %v195_v36, %v7212_v55 }
 0x26f   :  { %3592 = vmatmul.f32.gmra.mxu0 %v3591_v10 }
 0x270   :  { %3667 = vmatmul.f32.gmra.mxu1 %v7112_v3 }
 0x271   :  { %v2731_v27 = vpop.f32.mrf.mxu2  ;;  %v2804_v15 = vpop.f32.mrf.mxu3 }
 0x272   :  { %v2732_v50 = vadd.f32 %v2731_v27, %v2645_v53  ;;  %v7184_v29 = vadd.f32 %v2804_v15, %v2727_v0  ;;  %v2524_v0 = vadd.f32 %v7066_v31, %v7059_v58  ;;  %v3615_v27 = vand.u32 4294901760, %v3614_v17 }
 0x273   :  { %v2892_v15 = vadd.f32 %v7091_v12, %v7084_v56 }
 0x274   :  { %v7191_v40 = vpop.f32.mrf.mxu0  ;;  %v2653_v23 = vadd.f32 %v7068_v44, %v2524_v0 }
 0x275   :  { %v7193_v4 = vpop.f32.mrf.mxu1  ;;  %v2957_v63 = vadd.f32 %v7093_v41, %v2892_v15 }
 0x276   :  { %3472 = vmatmul.f32.gmra.mxu2 %v6963_v24  ;;  %3533 = vmatmul.f32.gmra.mxu3 %v6933_v32  ;;  %v3607_v32 = vand.u32 4294901760, %v3606_v62 }
 0x277   :  { %3600 = vmatmul.f32.gmra.mxu0 %v3599_v28 }
 0x278   :  { %3671 = vmatmul.f32.gmra.mxu1 %v7137_v13 }
 0x279   :  { %v2736_v51 = vpop.f32.mrf.mxu2  ;;  %v2810_v18 = vpop.f32.mrf.mxu3 }
 0x27a   :  { %v2737_v8 = vadd.f32 %v2736_v51, %v2649_v7  ;;  %v7209_v43 = vadd.f32 %v2810_v18, %v2732_v50 }
 0x27c   :  { %v7216_v10 = vpop.f32.mrf.mxu0 }
 0x27d   :  { %v7218_v6 = vpop.f32.mrf.mxu1 }
 0x27e   :  { %3476 = vmatmul.f32.gmra.mxu2 %v6989_v60  ;;  %3537 = vmatmul.f32.gmra.mxu3 %v6963_v24  ;;  %v3621_v24 = vand.u32 4294901760, %v7226_v11 }
 0x27f   :  { %3608 = vmatmul.f32.gmra.mxu0 %v3607_v32 }
 0x280   :  { %3675 = vmatmul.f32.gmra.mxu1 %v7162_v2  ;;  %v3622_v44 = vsub.f32 %v7226_v11, %v3621_v24 }
 0x281   :  { %v2741_v58 = vpop.f32.mrf.mxu2  ;;  %v2816_v31 = vpop.f32.mrf.mxu3 }
 0x282   :  { %v2742_v53 = vadd.f32 %v2741_v58, %v2653_v23  ;;  %v7230_v25 = vadd.f32 %v2816_v31, %v2737_v8  ;;  %v3623_v7 = vand.u32 4294901760, %v3622_v44 }
 0x284   :  { %v7235_v50 = vpop.f32.mrf.mxu0 }
 0x285   :  { %v7237_v28 = vpop.f32.mrf.mxu1 }
 0x286   :  { %3541 = vmatmul.f32.gmra.mxu3 %v6989_v60  ;;  %3709 = vmatmul.f32.vlgmr.msra.gmra.mxu2 %v7055_v19  ;;  %v2896_v60 = vadd.f32 %v7116_v9, %v7109_v46  ;;  %v2900_v46 = vadd.f32 %v7141_v54, %v7134_v35  ;;  %v2904_v54 = vadd.f32 %v7166_v26, %v7159_v16 }
 0x287   :  { %3616 = vmatmul.f32.gmra.mxu0 %v3615_v27  ;;  %v2908_v26 = vadd.f32 %v7191_v40, %v7184_v29  ;;  %v2912_v40 = vadd.f32 %v7216_v10, %v7209_v43  ;;  %v2916_v10 = vadd.f32 %v7235_v50, %v7230_v25 }
 0x288   :  { %3679 = vmatmul.f32.gmra.mxu1 %v7187_v45  ;;  %v2961_v41 = vadd.f32 %v7118_v20, %v2896_v60 }
 0x289   :  { %v2822_v57 = vpop.f32.mrf.mxu3  ;;  %v3025_v62 = vpop.f32.mrf.mxu2 }
 0x28a   :  { %v7246_v56 = vadd.f32 %v2822_v57, %v2742_v53  ;;  %v3026_v12 = vadd.f32 %v3025_v62, %v2957_v63 }
 0x28c   :  { %v7250_v36 = vpop.f32.mrf.mxu0 }
 0x28d   :  { %v7252_v51 = vpop.f32.mrf.mxu1  ;;  %v2920_v50 = vadd.f32 %v7250_v36, %v7246_v56 }
 0x28e   :  { %3714 = vmatmul.f32.gmra.mxu2 %v7080_v48  ;;  %3769 = vmatmul.f32.vlgmr.msra.gmra.mxu3 %v3565_v33  ;;  %v2965_v33 = vadd.f32 %v7143_v21, %v2900_v46 }
 0x28f   :  { %3624 = vmatmul.f32.gmra.mxu0 %v3623_v7 }
 0x290   :  { %3683 = vmatmul.f32.gmra.mxu1 %v7212_v55 }
 0x291   :  { %v3033_v18 = vpop.f32.mrf.mxu2  ;;  %v3182_v8 = vpop.f32.mrf.mxu3 }
 0x292   :  { %v3034_v32 = vadd.f32 %v3033_v18, %v2961_v41  ;;  %v3183_v0 = vadd.f32 %v3182_v8, %v3026_v12 }
 0x294   :  { %v3264_v9 = vpop.f32.mrf.mxu0 }
 0x295   :  { %v3265_v17 = vadd.f32 %v3264_v9, %v3183_v0  ;;  %v3338_v23 = vpop.f32.mrf.mxu1 }
 0x296   :  { %3719 = vmatmul.f32.gmra.mxu2 %v7104_v61  ;;  %3775 = vmatmul.f32.gmra.mxu3 %v3573_v47 }
 0x297   :  { %v7264_v19 = vadd.f32 %v3338_v23, %v3265_v17  ;;  %3838 = vmatmul.f32.vlgmr.msra.gmra.mxu0 %v7040_v22 }
 0x298   :  { %3889 = vmatmul.f32.vlgmr.msra.gmra.mxu1 %v7040_v22  ;;  %v2969_v22 = vadd.f32 %v7168_v38, %v2904_v54 }
 0x299   :  { %v3041_v20 = vpop.f32.mrf.mxu2  ;;  %v3186_v58 = vpop.f32.mrf.mxu3 }
 0x29a   :  { %v3042_v31 = vadd.f32 %v3041_v20, %v2965_v33  ;;  %v3187_v35 = vadd.f32 %v3186_v58, %v3034_v32 }
 0x29c   :  { %v3269_v53 = vpop.f32.mrf.mxu0 }
 0x29d   :  { %v3270_v27 = vadd.f32 %v3269_v53, %v3187_v35  ;;  %v3344_v15 = vpop.f32.mrf.mxu1 }
 0x29e   :  { %3724 = vmatmul.f32.gmra.mxu2 %v7129_v1  ;;  %3781 = vmatmul.f32.gmra.mxu3 %v3581_v5 }
 0x29f   :  { %v7274_v48 = vadd.f32 %v3344_v15, %v3270_v27  ;;  %3842 = vmatmul.f32.gmra.mxu0 %v7062_v42 }
 0x2a0   :  { %3893 = vmatmul.f32.gmra.mxu1 %v7062_v42  ;;  %v2973_v42 = vadd.f32 %v7193_v4, %v2908_v26 }
 0x2a1   :  { %v3049_v47 = vpop.f32.mrf.mxu2  ;;  %v3190_v21 = vpop.f32.mrf.mxu3 }
 0x2a2   :  { %v3050_v44 = vadd.f32 %v3049_v47, %v2969_v22  ;;  %v3191_v16 = vadd.f32 %v3190_v21, %v3042_v31 }
 0x2a4   :  { %v3274_v63 = vpop.f32.mrf.mxu0 }
 0x2a5   :  { %v3275_v57 = vadd.f32 %v3274_v63, %v3191_v16  ;;  %v3350_v62 = vpop.f32.mrf.mxu1 }
 0x2a6   :  { %3729 = vmatmul.f32.gmra.mxu2 %v7154_v52  ;;  %3787 = vmatmul.f32.gmra.mxu3 %v3589_v49 }
 0x2a7   :  { %v7284_v61 = vadd.f32 %v3350_v62, %v3275_v57  ;;  %3846 = vmatmul.f32.gmra.mxu0 %v7087_v14 }
 0x2a8   :  { %3897 = vmatmul.f32.gmra.mxu1 %v7087_v14  ;;  %v2977_v14 = vadd.f32 %v7218_v6, %v2912_v40 }
 0x2a9   :  { %v3057_v5 = vpop.f32.mrf.mxu2  ;;  %v3194_v38 = vpop.f32.mrf.mxu3 }
 0x2aa   :  { %v3058_v12 = vadd.f32 %v3057_v5, %v2973_v42  ;;  %v3195_v29 = vadd.f32 %v3194_v38, %v3050_v44 }
 0x2ac   :  { %v3279_v7 = vpop.f32.mrf.mxu0 }
 0x2ad   :  { %v3280_v60 = vadd.f32 %v3279_v7, %v3195_v29  ;;  %v3356_v41 = vpop.f32.mrf.mxu1 }
 0x2ae   :  { %3734 = vmatmul.f32.gmra.mxu2 %v7179_v39  ;;  %3793 = vmatmul.f32.gmra.mxu3 %v3597_v34 }
 0x2af   :  { %v7294_v1 = vadd.f32 %v3356_v41, %v3280_v60  ;;  %3850 = vmatmul.f32.gmra.mxu0 %v7112_v3 }
 0x2b0   :  { %3901 = vmatmul.f32.gmra.mxu1 %v7112_v3  ;;  %v2981_v3 = vadd.f32 %v7237_v28, %v2916_v10 }
 0x2b1   :  { %v3065_v49 = vpop.f32.mrf.mxu2  ;;  %v3198_v4 = vpop.f32.mrf.mxu3 }
 0x2b2   :  { %v3066_v18 = vadd.f32 %v3065_v49, %v2977_v14  ;;  %v3199_v43 = vadd.f32 %v3198_v4, %v3058_v12 }
 0x2b4   :  { %v3284_v8 = vpop.f32.mrf.mxu0 }
 0x2b5   :  { %v3285_v32 = vadd.f32 %v3284_v8, %v3199_v43  ;;  %v3362_v0 = vpop.f32.mrf.mxu1 }
 0x2b6   :  { %3739 = vmatmul.f32.gmra.mxu2 %v7204_v59  ;;  %3799 = vmatmul.f32.gmra.mxu3 %v3605_v37 }
 0x2b7   :  { %v7304_v52 = vadd.f32 %v3362_v0, %v3285_v32  ;;  %3854 = vmatmul.f32.gmra.mxu0 %v7137_v13 }
 0x2b8   :  { %3905 = vmatmul.f32.gmra.mxu1 %v7137_v13  ;;  %v2985_v13 = vadd.f32 %v7252_v51, %v2920_v50 }
 0x2b9   :  { %v3073_v34 = vpop.f32.mrf.mxu2  ;;  %v3202_v6 = vpop.f32.mrf.mxu3 }
 0x2ba   :  { %v3074_v46 = vadd.f32 %v3073_v34, %v2981_v3  ;;  %v3203_v25 = vadd.f32 %v3202_v6, %v3066_v18 }
 0x2bc   :  { %v3289_v9 = vpop.f32.mrf.mxu0 }
 0x2bd   :  { %v3290_v17 = vadd.f32 %v3289_v9, %v3203_v25  ;;  %v3368_v23 = vpop.f32.mrf.mxu1 }
 0x2be   :  { %3744 = vmatmul.f32.gmra.mxu2 %v7226_v11  ;;  %3805 = vmatmul.f32.gmra.mxu3 %v3613_v30 }
 0x2bf   :  { %v7314_v39 = vadd.f32 %v3368_v23, %v3290_v17  ;;  %3858 = vmatmul.f32.gmra.mxu0 %v7162_v2 }
 0x2c0   :  { %3909 = vmatmul.f32.gmra.mxu1 %v7162_v2 }
 0x2c1   :  { %v3081_v37 = vpop.f32.mrf.mxu2  ;;  %v3206_v28 = vpop.f32.mrf.mxu3 }
 0x2c2   :  { %v3082_v33 = vadd.f32 %v3081_v37, %v2985_v13  ;;  %v3207_v56 = vadd.f32 %v3206_v28, %v3074_v46 }
 0x2c4   :  { %v3294_v36 = vpop.f32.mrf.mxu0 }
 0x2c5   :  { %v3295_v20 = vadd.f32 %v3294_v36, %v3207_v56  ;;  %v3374_v58 = vpop.f32.mrf.mxu1 }
 0x2c6   :  { %3811 = vmatmul.f32.gmra.mxu3 %v3621_v24 }
 0x2c7   :  { %v7321_v59 = vadd.f32 %v3374_v58, %v3295_v20  ;;  %3862 = vmatmul.f32.gmra.mxu0 %v7187_v45 }
 0x2c8   :  { %3913 = vmatmul.f32.gmra.mxu1 %v7187_v45 }
 0x2c9   :  { %v3210_v30 = vpop.f32.mrf.mxu3  ;;  %v3449_v51 = vpop.f32.mrf.mxu2 }
 0x2ca   :  { %v3211_v31 = vadd.f32 %v3210_v30, %v3082_v33  ;;  %v3450_v4 = vadd.f32 %v3449_v51, %v7264_v19 }
 0x2cc   :  { %v3299_v2 = vpop.f32.mrf.mxu0 }
 0x2cd   :  { %v3300_v35 = vadd.f32 %v3299_v2, %v3211_v31  ;;  %v3380_v54 = vpop.f32.mrf.mxu1 }
 0x2cf   :  { %v7325_v53 = vadd.f32 %v3380_v54, %v3300_v35  ;;  %3866 = vmatmul.f32.gmra.mxu0 %v7212_v55 }
 0x2d0   :  { %3917 = vmatmul.f32.gmra.mxu1 %v7212_v55 }
 0x2d1   :  { %v3453_v11 = vpop.f32.mrf.mxu2  ;;  %v3514_v24 = vpop.f32.mrf.mxu3 }
 0x2d2   :  { %v3515_v10 = vadd.f32 %v3514_v24, %v3450_v4  ;;  %v3454_v3 = vadd.f32 %v3453_v11, %v7274_v48 }
 0x2d4   :  { %v3569_v27 = vpop.f32.mrf.mxu0 }
 0x2d5   :  { %v3656_v15 = vpop.f32.mrf.mxu1  ;;  %v3570_v0 = vadd.f32 %v3569_v27, %v3515_v10 }
 0x2d7   :  { %v3657_v46 = vadd.f32 %v3656_v15, %v3570_v0 }
 0x2d9   :  { %v3457_v22 = vpop.f32.mrf.mxu2  ;;  %v3518_v47 = vpop.f32.mrf.mxu3 }
 0x2da   :  { %v3519_v25 = vadd.f32 %v3518_v47, %v3454_v3  ;;  %v3458_v13 = vadd.f32 %v3457_v22, %v7284_v61 }
 0x2dc   :  { %v3577_v21 = vpop.f32.mrf.mxu0 }
 0x2dd   :  { %v3660_v45 = vpop.f32.mrf.mxu1  ;;  %v3578_v17 = vadd.f32 %v3577_v21, %v3519_v25 }
 0x2df   :  { %v3661_v56 = vadd.f32 %v3660_v45, %v3578_v17 }
 0x2e1   :  { %v3461_v44 = vpop.f32.mrf.mxu2  ;;  %v3522_v16 = vpop.f32.mrf.mxu3 }
 0x2e2   :  { %v3523_v36 = vadd.f32 %v3522_v16, %v3458_v13  ;;  %v3462_v2 = vadd.f32 %v3461_v44, %v7294_v1 }
 0x2e4   :  { %v3585_v26 = vpop.f32.mrf.mxu0 }
 0x2e5   :  { %v3664_v63 = vpop.f32.mrf.mxu1  ;;  %v3586_v51 = vadd.f32 %v3585_v26, %v3523_v36 }
 0x2e7   :  { %v3665_v11 = vadd.f32 %v3664_v63, %v3586_v51 }
 0x2e9   :  { %v3465_v57 = vpop.f32.mrf.mxu2  ;;  %v3526_v62 = vpop.f32.mrf.mxu3 }
 0x2ea   :  { %v3527_v24 = vadd.f32 %v3526_v62, %v3462_v2  ;;  %v3466_v16 = vadd.f32 %v3465_v57, %v7304_v52 }
 0x2ec   :  { %v3593_v42 = vpop.f32.mrf.mxu0 }
 0x2ed   :  { %v3668_v5 = vpop.f32.mrf.mxu1  ;;  %v3594_v21 = vadd.f32 %v3593_v42, %v3527_v24 }
 0x2ef   :  { %v3669_v4 = vadd.f32 %v3668_v5, %v3594_v21 }
 0x2f1   :  { %v7329_v38 = vpop.f32.mrf.mxu2  ;;  %v3530_v12 = vpop.f32.mrf.mxu3 }
 0x2f2   :  { %v3531_v10 = vadd.f32 %v3530_v12, %v3466_v16  ;;  %v3470_v52 = vadd.f32 %v7329_v38, %v7314_v39 }
 0x2f4   :  { %v7331_v55 = vpop.f32.mrf.mxu0 }
 0x2f5   :  { %v7333_v29 = vpop.f32.mrf.mxu1  ;;  %v3602_v3 = vadd.f32 %v7331_v55, %v3531_v10 }
 0x2f7   :  { %v3673_v5 = vadd.f32 %v7333_v29, %v3602_v3 }
 0x2f9   :  { %v7335_v40 = vpop.f32.mrf.mxu2  ;;  %v7337_v7 = vpop.f32.mrf.mxu3 }
 0x2fa   :  { %v3535_v12 = vadd.f32 %v7337_v7, %v3470_v52  ;;  %v3474_v39 = vadd.f32 %v7335_v40, %v7321_v59 }
 0x2fc   :  { %v7339_v60 = vpop.f32.mrf.mxu0 }
 0x2fd   :  { %v7341_v41 = vpop.f32.mrf.mxu1  ;;  %v3610_v17 = vadd.f32 %v7339_v60, %v3535_v12 }
 0x2ff   :  { %v3677_v7 = vadd.f32 %v7341_v41, %v3610_v17 }
 0x301   :  { %v7343_v14 = vpop.f32.mrf.mxu2  ;;  %v7345_v49 = vpop.f32.mrf.mxu3 }
 0x302   :  { %v3478_v59 = vadd.f32 %v7343_v14, %v7325_v53 }
 0x304   :  { %v7348_v18 = vpop.f32.mrf.mxu0 }
 0x305   :  { %v7350_v43 = vpop.f32.mrf.mxu1 }
 0x309   :  { %v7352_v8 = vpop.f32.mrf.mxu3  ;;  %v3710_v32 = vpop.f32.mrf.mxu2 }
 0x30a   :  { %v3711_v50 = vadd.f32 %v3710_v32, %v3657_v46 }
 0x30c   :  { %v7355_v34 = vpop.f32.mrf.mxu0 }
 0x30d   :  { %v7357_v6 = vpop.f32.mrf.mxu1 }
 0x311   :  { %v3715_v9 = vpop.f32.mrf.mxu2  ;;  %v3770_v19 = vpop.f32.mrf.mxu3 }
 0x312   :  { %v3771_v23 = vadd.f32 %v3770_v19, %v3711_v50  ;;  %v3716_v20 = vadd.f32 %v3715_v9, %v3661_v56 }
 0x314   :  { %v3839_v37 = vpop.f32.mrf.mxu0 }
 0x315   :  { %v3840_v28 = vadd.f32 %v3839_v37, %v3771_v23  ;;  %v3890_v33 = vpop.f32.mrf.mxu1  ;;  %v3539_v37 = vadd.f32 %v7345_v49, %v3474_v39 }
 0x317   :  { %v3891_v48 = vadd.f32 %v3890_v33, %v3840_v28  ;;  %v3618_v60 = vadd.f32 %v7348_v18, %v3539_v37 }
 0x319   :  { %3922 = vst.msk [vmem:[%s7414_s3] sm:$0xff] %vm3921_vm1, %v3891_v48  ;;  %v3720_v58 = vpop.f32.mrf.mxu2  ;;  %v3776_v30 = vpop.f32.mrf.mxu3  ;;  %v3681_v49 = vadd.f32 %v7350_v43, %v3618_v60 }
 0x31a   :  { %v3777_v31 = vadd.f32 %v3776_v30, %v3716_v20  ;;  %v3721_v15 = vadd.f32 %v3720_v58, %v3665_v11  ;;  %v3543_v58 = vadd.f32 %v7352_v8, %v3478_v59 }
 0x31c   :  { %v3843_v61 = vpop.f32.mrf.mxu0 }
 0x31d   :  { %v3844_v35 = vadd.f32 %v3843_v61, %v3777_v31  ;;  %v3894_v54 = vpop.f32.mrf.mxu1  ;;  %v3626_v31 = vadd.f32 %v7355_v34, %v3543_v58 }
 0x31f   :  { %v3895_v27 = vadd.f32 %v3894_v54, %v3844_v35  ;;  %v3685_v54 = vadd.f32 %v7357_v6, %v3626_v31 }
 0x321   :  { %3923 = vst.msk [vmem:[%s7414_s3 + $0x8] sm:$0xff] %vm3921_vm1, %v3895_v27  ;;  %v3725_v22 = vpop.f32.mrf.mxu2  ;;  %v3782_v47 = vpop.f32.mrf.mxu3 }
 0x322   :  { %v3783_v45 = vadd.f32 %v3782_v47, %v3721_v15  ;;  %v3726_v62 = vadd.f32 %v3725_v22, %v3669_v4 }
 0x324   :  { %v3847_v26 = vpop.f32.mrf.mxu0 }
 0x325   :  { %v3848_v1 = vadd.f32 %v3847_v26, %v3783_v45  ;;  %v3898_v44 = vpop.f32.mrf.mxu1 }
 0x327   :  { %v3899_v63 = vadd.f32 %v3898_v44, %v3848_v1 }
 0x329   :  { %3924 = vst.msk [vmem:[%s7414_s3 + $0x10] sm:$0xff] %vm3921_vm1, %v3899_v63  ;;  %v3730_v32 = vpop.f32.mrf.mxu2  ;;  %v3788_v0 = vpop.f32.mrf.mxu3 }
 0x32a   :  { %v3789_v42 = vadd.f32 %v3788_v0, %v3726_v62  ;;  %v3731_v9 = vadd.f32 %v3730_v32, %v3673_v5 }
 0x32c   :  { %v3851_v57 = vpop.f32.mrf.mxu0 }
 0x32d   :  { %v3852_v46 = vadd.f32 %v3851_v57, %v3789_v42  ;;  %v3902_v25 = vpop.f32.mrf.mxu1 }
 0x32f   :  { %v3903_v50 = vadd.f32 %v3902_v25, %v3852_v46 }
 0x331   :  { %3925 = vst.msk [vmem:[%s7414_s3 + $0x18] sm:$0xff] %vm3921_vm1, %v3903_v50  ;;  %v3735_v19 = vpop.f32.mrf.mxu2  ;;  %v3794_v55 = vpop.f32.mrf.mxu3 }
 0x332   :  { %v3795_v23 = vadd.f32 %v3794_v55, %v3731_v9  ;;  %v3736_v33 = vadd.f32 %v3735_v19, %v3677_v7 }
 0x334   :  { %v3855_v38 = vpop.f32.mrf.mxu0 }
 0x335   :  { %v3856_v13 = vadd.f32 %v3855_v38, %v3795_v23  ;;  %v3906_v29 = vpop.f32.mrf.mxu1 }
 0x337   :  { %v3907_v28 = vadd.f32 %v3906_v29, %v3856_v13 }
 0x339   :  { %3926 = vst.msk [vmem:[%s7414_s3 + $0x20] sm:$0xff] %vm3921_vm1, %v3907_v28  ;;  %v3800_v56 = vpop.f32.mrf.mxu3  ;;  %v3740_v48 = vpop.f32.mrf.mxu2 }
 0x33a   :  { %v3801_v36 = vadd.f32 %v3800_v56, %v3736_v33  ;;  %v3741_v51 = vadd.f32 %v3740_v48, %v3681_v49 }
 0x33c   :  { %v3859_v40 = vpop.f32.mrf.mxu0 }
 0x33d   :  { %v3860_v20 = vadd.f32 %v3859_v40, %v3801_v36  ;;  %v3910_v41 = vpop.f32.mrf.mxu1 }
 0x33f   :  { %v3911_v30 = vadd.f32 %v3910_v41, %v3860_v20 }
 0x341   :  { %3927 = vst.msk [vmem:[%s7414_s3 + $0x28] sm:$0xff] %vm3921_vm1, %v3911_v30  ;;  %v3806_v18 = vpop.f32.mrf.mxu3  ;;  %v3745_v53 = vpop.f32.mrf.mxu2 }
 0x342   :  { %v3807_v2 = vadd.f32 %v3806_v18, %v3741_v51  ;;  %v3746_v11 = vadd.f32 %v3745_v53, %v3685_v54 }
 0x344   :  { %v3863_v61 = vpop.f32.mrf.mxu0 }
 0x345   :  { %v3864_v14 = vadd.f32 %v3863_v61, %v3807_v2  ;;  %v3914_v35 = vpop.f32.mrf.mxu1 }
 0x347   :  { %v3915_v43 = vadd.f32 %v3914_v35, %v3864_v14 }
 0x349   :  { %3928 = vst.msk [vmem:[%s7414_s3 + $0x30] sm:$0xff] %vm3921_vm1, %v3915_v43  ;;  %v3812_v8 = vpop.f32.mrf.mxu3 }
 0x34a   :  { %v3813_v24 = vadd.f32 %v3812_v8, %v3746_v11 }
 0x34c   :  { %v3867_v27 = vpop.f32.mrf.mxu0 }
 0x34d   :  { %v3868_v15 = vadd.f32 %v3867_v27, %v3813_v24  ;;  %v3918_v22 = vpop.f32.mrf.mxu1 }
 0x34f   :  { %v3919_v34 = vadd.f32 %v3918_v22, %v3868_v15 }
 0x351   :  { %3929 = vst.msk [vmem:[%s7414_s3 + $0x38] sm:$0xff] %vm3921_vm1, %v3919_v34 }

</bundles_post_ra>
